<compile_context>
chip_gen: v5e
topology: v5e:2x2
jax: 0.10.0
libtpu: 0.0.40
codegen_flags: <defaults>
</compile_context>

<pallas_src>
from functools import partial

import jax
import jax.numpy as jnp
from jax import lax
from jax.experimental import pallas as pl
from jax.experimental.pallas import tpu as pltpu


def _round_up(n, m):
    return ((n + m - 1) // m) * m


# ---------------------------------------------------------------------------
# Kernel 1: fused f_value / f_key(=f_query) projection.
#   x: (C, Np) ->  v  = Wv  @ x + bv              (Ck, Np)
#                  qk = relu(Wqk @ x + bqk)        (Ck, Np)   (BN folded)
# ---------------------------------------------------------------------------
def _proj_kernel(x_ref, wv_ref, bv_ref, wqk_ref, bqk_ref, v_ref, qk_ref):
    xb = x_ref[...].astype(jnp.bfloat16)
    v = jnp.dot(wv_ref[...], xb, preferred_element_type=jnp.float32) + bv_ref[...]
    qk = jnp.dot(wqk_ref[...], xb, preferred_element_type=jnp.float32) + bqk_ref[...]
    v_ref[...] = v
    qk_ref[...] = jnp.maximum(qk, 0.0)


def qkv_projection(xf, wv, bv, wqk, bqk):
    C, Np = xf.shape
    Ck = wv.shape[0]
    return pl.pallas_call(
        _proj_kernel,
        out_shape=(jax.ShapeDtypeStruct((Ck, Np), jnp.float32),
                   jax.ShapeDtypeStruct((Ck, Np), jnp.float32)),
    )(xf,
      wv.astype(jnp.bfloat16), bv.reshape(Ck, 1).astype(jnp.float32),
      wqk.astype(jnp.bfloat16), bqk.reshape(Ck, 1).astype(jnp.float32))


# ---------------------------------------------------------------------------
# Kernel 2/3: whole SPP dilated-conv path in one kernel.
#   Input feat (Ck, Np) with batch folded into the lane axis.
#   a  = dilate1(x)            (d=1)
#   b_ = dilate2(x)            (d=3)
#   c_ = dilate2(a)            (d=3)
#   e_ = dilate3(c_)           (d=5)
#   out = relu(a) + relu(c1(b_)) + relu(c1(c_)) + relu(c1(e_))
# Shifted taps are read from a zero-padded VMEM scratch; out-of-image and
# cross-batch reads are killed with (h, w) coordinate masks.
# ---------------------------------------------------------------------------
def _spp_conv_kernel(x_ref, hmap_ref, wmap_ref,
                     wd1_ref, bd1_ref, wd2_ref, bd2_ref, wd3_ref, bd3_ref,
                     wc1_ref, bc1_ref, o_ref, xpad_ref,
                     *, H, W, Np, maxoff):
    hmap = hmap_ref[...]          # (1, Np) int32; lane-padding columns = -1e6
    wmap = wmap_ref[...]
    xpad_ref[...] = jnp.zeros_like(xpad_ref)

    def dconv(src, wmat_ref, b_ref, d):
        # src: (Ck, Np) f32 -> "same" 3x3 conv with dilation d.
        xpad_ref[:, maxoff:maxoff + Np] = src
        taps = []
        for kh in range(3):
            for kw in range(3):
                oh = (kh - 1) * d
                ow = (kw - 1) * d
                off = oh * W + ow
                sh = xpad_ref[:, maxoff + off:maxoff + off + Np]
                valid = ((hmap >= -oh) & (hmap < H - oh) &
                         (wmap >= -ow) & (wmap < W - ow))
                taps.append(jnp.where(valid, sh, 0.0))
        # im2col lives only in VMEM; one MXU matmul with a 9*Ck contraction.
        col = jnp.concatenate(taps, axis=0).astype(jnp.bfloat16)      # (9*Ck, Np)
        y = jnp.dot(wmat_ref[...], col, preferred_element_type=jnp.float32)
        return y + b_ref[...]

    x = x_ref[...]
    a = dconv(x, wd1_ref, bd1_ref, 1)           # dilate1(x)
    b_ = dconv(x, wd2_ref, bd2_ref, 3)          # dilate2(x)
    c_ = dconv(a, wd2_ref, bd2_ref, 3)          # dilate2(dilate1(x))
    e_ = dconv(c_, wd3_ref, bd3_ref, 5)         # dilate3(dilate2(dilate1(x)))

    wc = wc1_ref[...]                           # shared 1x1 weight, loaded once
    bc = bc1_ref[...]

    def c1relu(z):
        return jnp.maximum(
            jnp.dot(wc, z.astype(jnp.bfloat16),
                    preferred_element_type=jnp.float32) + bc, 0.0)

    cnn = jnp.maximum(a, 0.0) + c1relu(b_) + c1relu(c_) + c1relu(e_)
    o_ref[...] = cnn.astype(o_ref.dtype)


def _tap_major(w):
    # (Co, Ci, 3, 3) -> (Co, 9*Ci) with columns ordered (kh*3+kw)*Ci + ci,
    # matching the tap stacking order inside the kernel.
    Co, Ci = w.shape[0], w.shape[1]
    return jnp.transpose(w, (0, 2, 3, 1)).reshape(Co, 9 * Ci).astype(jnp.bfloat16)


def spp_conv_path(feat, hmap, wmap, p, *, H, W):
    Ck, Np = feat.shape
    maxoff = _round_up(5 * W + 5, 128)          # covers max |offset|, lane aligned
    b2 = lambda b: b.reshape(Ck, 1).astype(jnp.float32)
    kernel = partial(_spp_conv_kernel, H=H, W=W, Np=Np, maxoff=maxoff)
    return pl.pallas_call(
        kernel,
        out_shape=jax.ShapeDtypeStruct((Ck, Np), jnp.float32),
        scratch_shapes=[pltpu.VMEM((Ck, Np + 2 * maxoff), jnp.float32)],
    )(feat, hmap, wmap,
      _tap_major(p["d1_w"]), b2(p["d1_b"]),
      _tap_major(p["d2_w"]), b2(p["d2_b"]),
      _tap_major(p["d3_w"]), b2(p["d3_b"]),
      p["c1_w"].astype(jnp.bfloat16), b2(p["c1_b"]))


# ---------------------------------------------------------------------------
# Kernel 4: attention + final W projection, fused.
#   qk: (Ck, Np) (query features, batch folded on lanes)
#   key/value: (B, Ck, L)   ->   out: (B, C, HW)
# ---------------------------------------------------------------------------
def _attn_kernel(qk_ref, key_ref, val_ref, ww_ref, wb_ref, o_ref, *, HW, scale):
    B = key_ref.shape[0]
    ww = ww_ref[...]                            # (C, Ck) bf16
    wb = wb_ref[...]                            # (C, 1)  f32
    for b in range(B):
        qb = qk_ref[:, b * HW:(b + 1) * HW].astype(jnp.bfloat16)     # (Ck, HW)
        kb = key_ref[b].astype(jnp.bfloat16)                         # (Ck, L)
        vb = val_ref[b].astype(jnp.bfloat16)                         # (Ck, L)
        s = lax.dot_general(qb, kb, (((0,), (0,)), ((), ())),
                            preferred_element_type=jnp.float32) * scale   # (HW, L)
        m = jnp.max(s, axis=-1, keepdims=True)
        e = jnp.exp(s - m)
        p = e * pl.reciprocal(jnp.sum(e, axis=-1, keepdims=True), approx=True)
        ctx = lax.dot_general(p.astype(jnp.bfloat16), vb,
                              (((1,), (1,)), ((), ())),
                              preferred_element_type=jnp.float32)          # (HW, Ck)
        out_b = lax.dot_general(ww, ctx.astype(jnp.bfloat16),
                                (((1,), (1,)), ((), ())),
                                preferred_element_type=jnp.float32) + wb   # (C, HW)
        o_ref[b] = out_b.astype(o_ref.dtype)


def attention_project(qk_flat, key, value, Ww, Wb, *, HW, scale):
    B = key.shape[0]
    C = Ww.shape[0]
    kernel = partial(_attn_kernel, HW=HW, scale=scale)
    return pl.pallas_call(
        kernel,
        out_shape=jax.ShapeDtypeStruct((B, C, HW), jnp.float32),
    )(qk_flat, value.astype(jnp.float32), Ww.astype(jnp.bfloat16),
      Wb.reshape(C, 1).astype(jnp.float32)) if False else pl.pallas_call(
        kernel,
        out_shape=jax.ShapeDtypeStruct((B, C, HW), jnp.float32),
    )(qk_flat, key, value, Ww.astype(jnp.bfloat16),
      Wb.reshape(C, 1).astype(jnp.float32))


# ---------------------------------------------------------------------------
# Module forward (glue around the Pallas kernels)
# ---------------------------------------------------------------------------
def _max_pool(x, k):
    # nn.MaxPool2d(kernel_size=k, stride=k), ceil_mode=False.
    # TODO(synk): max-pooling stays in XLA (lax.reduce_window); no perf win from Pallas here.
    return lax.reduce_window(x, -jnp.inf, lax.max,
                             window_dimensions=(1, 1, k, k),
                             window_strides=(1, 1, k, k),
                             padding="VALID")


def spp_inception_block(feat_flat, hmap, wmap, p, *, B, H, W):
    """feat_flat: (Ck, Np) -> (B, Ck, L) with L = P + H*W (pool tokens first)."""
    Ck, _ = feat_flat.shape
    HW = H * W
    N = B * HW
    feat_sp = feat_flat[:, :N].reshape(Ck, B, H, W)
    pools = [_max_pool(feat_sp, k).reshape(Ck, B, -1) for k in (2, 3, 5, 6)]
    pool_cat = jnp.concatenate(pools, axis=-1)                       # (Ck, B, P)
    cnn = spp_conv_path(feat_flat, hmap, wmap, p, H=H, W=W)          # (Ck, Np)
    cnn = cnn[:, :N].reshape(Ck, B, HW)
    out = jnp.concatenate([pool_cat, cnn], axis=-1)                  # (Ck, B, L)
    return jnp.transpose(out, (1, 0, 2))                             # (B, Ck, L)


def nonlocal_spp_inception_block(x, params):
    B, C, H, W = x.shape
    Ck = params["fv_w"].shape[0]
    HW = H * W
    N = B * HW
    Np = _round_up(N, 128)

    # Channel-major, batch folded onto the lane axis, lane-padded to 128.
    xf = jnp.transpose(x, (1, 0, 2, 3)).reshape(C, N).astype(jnp.float32)
    xf = jnp.pad(xf, ((0, 0), (0, Np - N)))

    # (h, w) coordinate maps for the in-kernel "same"-padding masks.
    idx = jnp.arange(Np, dtype=jnp.int32)
    li = idx % HW
    big = jnp.int32(-10**6)
    hmap = jnp.where(idx < N, li // W, big).reshape(1, Np)
    wmap = jnp.where(idx < N, li % W, big).reshape(1, Np)

    # f_key/f_query BatchNorm folded into the 1x1 conv (inference mode).
    eps = 1e-5
    bn_scale = params["bn_gamma"] / jnp.sqrt(params["bn_var"] + eps)
    wqk = params["fk_w"] * bn_scale[:, None]
    bqk = bn_scale * (params["fk_b"] - params["bn_mean"]) + params["bn_beta"]

    x_v, x_qk = qkv_projection(xf, params["fv_w"], params["fv_b"], wqk, bqk)  # (Ck, Np)

    value = spp_inception_block(x_v, hmap, wmap, params["spp_v"], B=B, H=H, W=W)  # (B, Ck, L)
    key = spp_inception_block(x_qk, hmap, wmap, params["spp_k"], B=B, H=H, W=W)   # (B, Ck, L)

    out = attention_project(x_qk, key, value, params["W_w"], params["W_b"],
                            HW=HW, scale=float(Ck) ** -0.5)                       # (B, C, HW)
    return out.reshape(B, C, H, W)


# ---------------------------------------------------------------------------
# Deterministic parameter init (shapes from the module's __init__)
# ---------------------------------------------------------------------------
def init_params(key, in_channels, ratio=2):
    Ck = in_channels // ratio

    def uni(k, shape, fan_in):
        bound = 1.0 / (fan_in ** 0.5)
        return jax.random.uniform(k, shape, jnp.float32, -bound, bound)

    keys = jax.random.split(key, 14)

    def spp_params(ks):
        # Conv biases inside SPP_inception_block are zeroed in __init__.
        return {
            "d1_w": uni(ks[0], (Ck, Ck, 3, 3), Ck * 9),
            "d1_b": jnp.zeros((Ck,), jnp.float32),
            "d2_w": uni(ks[1], (Ck, Ck, 3, 3), Ck * 9),
            "d2_b": jnp.zeros((Ck,), jnp.float32),
            "d3_w": uni(ks[2], (Ck, Ck, 3, 3), Ck * 9),
            "d3_b": jnp.zeros((Ck,), jnp.float32),
            "c1_w": uni(ks[3], (Ck, Ck), Ck),
            "c1_b": jnp.zeros((Ck,), jnp.float32),
        }

    return {
        "fv_w": uni(keys[0], (Ck, in_channels), in_channels),
        "fv_b": uni(keys[1], (Ck,), in_channels),
        "fk_w": uni(keys[2], (Ck, in_channels), in_channels),
        "fk_b": uni(keys[3], (Ck,), in_channels),
        "bn_gamma": jnp.ones((Ck,), jnp.float32),
        "bn_beta": jnp.zeros((Ck,), jnp.float32),
        "bn_mean": jnp.zeros((Ck,), jnp.float32),
        "bn_var": jnp.ones((Ck,), jnp.float32),
        # NOTE: the reference zero-inits W.weight/W.bias (residual-style), which
        # would zero the whole output; use non-zero weights to exercise kernels.
        "W_w": uni(keys[4], (in_channels, Ck), Ck),
        "W_b": uni(keys[5], (in_channels,), Ck),
        "spp_v": spp_params(keys[6:10]),
        "spp_k": spp_params(keys[10:14]),
    }


if __name__ == "__main__":
    root = jax.random.PRNGKey(0)
    k_x, k_p = jax.random.split(root)

    B, C, H, W = 2, 16, 12, 12          # ratio=2 -> key/value channels = 8
    x = jax.random.normal(k_x, (B, C, H, W), jnp.float32)
    params = init_params(k_p, C, ratio=2)

    fwd = jax.jit(nonlocal_spp_inception_block)
    out = jax.block_until_ready(fwd(x, params))
    assert out.shape == (B, C, H, W), out.shape
    assert bool(jnp.all(jnp.isfinite(out)))
    print("KERNEL_OK")
</pallas_src>

<mosaic_0001>
module attributes {stable_mosaic.version = 11 : i64} {
  func.func @_proj_kernel(%arg0: memref<16x384xf32, #tpu.memory_space<vmem>>, %arg1: memref<8x16xbf16, #tpu.memory_space<vmem>>, %arg2: memref<8x1xf32, #tpu.memory_space<vmem>>, %arg3: memref<8x16xbf16, #tpu.memory_space<vmem>>, %arg4: memref<8x1xf32, #tpu.memory_space<vmem>>, %arg5: memref<8x384xf32, #tpu.memory_space<vmem>>, %arg6: memref<8x384xf32, #tpu.memory_space<vmem>>) attributes {dimension_semantics = [], scalar_prefetch = 0 : i64, scratch_operands = 0 : i64, tpu.core_type = #tpu.core_type<tc>} {
    %c0 = arith.constant 0 : index
    %c0_0 = arith.constant 0 : index
    %0 = vector.load %arg0[%c0, %c0_0] : memref<16x384xf32, #tpu.memory_space<vmem>>, vector<16x384xf32>
    %1 = arith.truncf %0 : vector<16x384xf32> to vector<16x384xbf16>
    %c0_1 = arith.constant 0 : index
    %c0_2 = arith.constant 0 : index
    %2 = vector.load %arg1[%c0_1, %c0_2] : memref<8x16xbf16, #tpu.memory_space<vmem>>, vector<8x16xbf16>
    %cst = arith.constant dense<0.000000e+00> : vector<8x384xf32>
    %3 = tpu.matmul %2, %1, %cst {dimension_numbers = #tpu.dot_dimension_numbers<[1], [0], [0], [1], [0, 0, 1, 1], [], []>} : vector<8x16xbf16>, vector<16x384xbf16>, vector<8x384xf32> -> vector<8x384xf32>
    %c0_3 = arith.constant 0 : index
    %c0_4 = arith.constant 0 : index
    %4 = vector.load %arg2[%c0_3, %c0_4] : memref<8x1xf32, #tpu.memory_space<vmem>>, vector<8x1xf32>
    %5 = vector.broadcast %4 : vector<8x1xf32> to vector<8x384xf32>
    %6 = arith.addf %3, %5 : vector<8x384xf32>
    %c0_5 = arith.constant 0 : index
    %c0_6 = arith.constant 0 : index
    %7 = vector.load %arg3[%c0_5, %c0_6] : memref<8x16xbf16, #tpu.memory_space<vmem>>, vector<8x16xbf16>
    %cst_7 = arith.constant dense<0.000000e+00> : vector<8x384xf32>
    %8 = tpu.matmul %7, %1, %cst_7 {dimension_numbers = #tpu.dot_dimension_numbers<[1], [0], [0], [1], [0, 0, 1, 1], [], []>} : vector<8x16xbf16>, vector<16x384xbf16>, vector<8x384xf32> -> vector<8x384xf32>
    %c0_8 = arith.constant 0 : index
    %c0_9 = arith.constant 0 : index
    %9 = vector.load %arg4[%c0_8, %c0_9] : memref<8x1xf32, #tpu.memory_space<vmem>>, vector<8x1xf32>
    %10 = vector.broadcast %9 : vector<8x1xf32> to vector<8x384xf32>
    %11 = arith.addf %8, %10 : vector<8x384xf32>
    %c0_10 = arith.constant 0 : index
    %c0_11 = arith.constant 0 : index
    %12 = vector.load %arg5[%c0_10, %c0_11] : memref<8x384xf32, #tpu.memory_space<vmem>>, vector<8x384xf32>
    tpu.vector_store %arg5[%c0_10, %c0_11], %6 {strides = array<i32>} : memref<8x384xf32, #tpu.memory_space<vmem>>, vector<8x384xf32>,
    %cst_12 = arith.constant 0.000000e+00 : f32
    %13 = vector.broadcast %cst_12 : f32 to vector<8x384xf32>
    %14 = arith.maximumf %11, %13 : vector<8x384xf32>
    %c0_13 = arith.constant 0 : index
    %c0_14 = arith.constant 0 : index
    %15 = vector.load %arg6[%c0_13, %c0_14] : memref<8x384xf32, #tpu.memory_space<vmem>>, vector<8x384xf32>
    tpu.vector_store %arg6[%c0_13, %c0_14], %14 {strides = array<i32>} : memref<8x384xf32, #tpu.memory_space<vmem>>, vector<8x384xf32>,
    return
  }
}

module attributes {stable_mosaic.version = 11 : i64} {
  func.func @_attn_kernel(%arg0: memref<8x384xf32, #tpu.memory_space<vmem>>, %arg1: memref<2x8x204xf32, #tpu.memory_space<vmem>>, %arg2: memref<2x8x204xf32, #tpu.memory_space<vmem>>, %arg3: memref<16x8xbf16, #tpu.memory_space<vmem>>, %arg4: memref<16x1xf32, #tpu.memory_space<vmem>>, %arg5: memref<2x16x144xf32, #tpu.memory_space<vmem>>) attributes {dimension_semantics = [], scalar_prefetch = 0 : i64, scratch_operands = 0 : i64, tpu.core_type = #tpu.core_type<tc>} {
    %c0 = arith.constant 0 : index
    %c0_0 = arith.constant 0 : index
    %0 = vector.load %arg3[%c0, %c0_0] : memref<16x8xbf16, #tpu.memory_space<vmem>>, vector<16x8xbf16>
    %c0_1 = arith.constant 0 : index
    %c0_2 = arith.constant 0 : index
    %1 = vector.load %arg4[%c0_1, %c0_2] : memref<16x1xf32, #tpu.memory_space<vmem>>, vector<16x1xf32>
    %c0_3 = arith.constant 0 : index
    %c0_4 = arith.constant 0 : index
    %2 = vector.load %arg0[%c0_3, %c0_4] : memref<8x384xf32, #tpu.memory_space<vmem>>, vector<8x144xf32>
    %3 = arith.truncf %2 : vector<8x144xf32> to vector<8x144xbf16>
    %c0_5 = arith.constant 0 : index
    %c0_6 = arith.constant 0 : index
    %c0_7 = arith.constant 0 : index
    %4 = vector.load %arg1[%c0_5, %c0_6, %c0_7] : memref<2x8x204xf32, #tpu.memory_space<vmem>>, vector<1x8x204xf32>
    %5 = vector.shape_cast %4 : vector<1x8x204xf32> to vector<8x204xf32>
    %6 = arith.truncf %5 : vector<8x204xf32> to vector<8x204xbf16>
    %c0_8 = arith.constant 0 : index
    %c0_9 = arith.constant 0 : index
    %c0_10 = arith.constant 0 : index
    %7 = vector.load %arg2[%c0_8, %c0_9, %c0_10] : memref<2x8x204xf32, #tpu.memory_space<vmem>>, vector<1x8x204xf32>
    %8 = vector.shape_cast %7 : vector<1x8x204xf32> to vector<8x204xf32>
    %9 = arith.truncf %8 : vector<8x204xf32> to vector<8x204xbf16>
    %cst = arith.constant dense<0.000000e+00> : vector<144x204xf32>
    %10 = tpu.matmul %3, %6, %cst {dimension_numbers = #tpu.dot_dimension_numbers<[0], [0], [1], [1], [0, 1, 1, 1], [], []>} : vector<8x144xbf16>, vector<8x204xbf16>, vector<144x204xf32> -> vector<144x204xf32>
    %cst_11 = arith.constant 0.353553385 : f32
    %11 = vector.broadcast %cst_11 : f32 to vector<144x204xf32>
    %12 = arith.mulf %10, %11 : vector<144x204xf32>
    %cst_12 = arith.constant dense<0xFF800000> : vector<144xf32>
    %13 = vector.multi_reduction <maximumf>, %12, %cst_12 [1] : vector<144x204xf32> to vector<144xf32>
    %14 = vector.shape_cast %13 : vector<144xf32> to vector<144x1xf32>
    %15 = vector.broadcast %14 : vector<144x1xf32> to vector<144x204xf32>
    %16 = arith.subf %12, %15 : vector<144x204xf32>
    %17 = math.exp %16 : vector<144x204xf32>
    %cst_13 = arith.constant dense<0.000000e+00> : vector<144xf32>
    %18 = vector.multi_reduction <add>, %17, %cst_13 [1] : vector<144x204xf32> to vector<144xf32>
    %19 = vector.shape_cast %18 : vector<144xf32> to vector<144x1xf32>
    %20 = tpu.reciprocal %19 {approx = true} : vector<144x1xf32> -> vector<144x1xf32>
    %21 = vector.broadcast %20 : vector<144x1xf32> to vector<144x204xf32>
    %22 = arith.mulf %17, %21 : vector<144x204xf32>
    %23 = arith.truncf %22 : vector<144x204xf32> to vector<144x204xbf16>
    %cst_14 = arith.constant dense<0.000000e+00> : vector<144x8xf32>
    %24 = tpu.matmul %23, %9, %cst_14 {dimension_numbers = #tpu.dot_dimension_numbers<[1], [1], [0], [0], [0, 0, 1, 0], [], []>} : vector<144x204xbf16>, vector<8x204xbf16>, vector<144x8xf32> -> vector<144x8xf32>
    %25 = arith.truncf %24 : vector<144x8xf32> to vector<144x8xbf16>
    %cst_15 = arith.constant dense<0.000000e+00> : vector<16x144xf32>
    %26 = tpu.matmul %0, %25, %cst_15 {dimension_numbers = #tpu.dot_dimension_numbers<[1], [1], [0], [0], [0, 0, 1, 0], [], []>} : vector<16x8xbf16>, vector<144x8xbf16>, vector<16x144xf32> -> vector<16x144xf32>
    %27 = vector.broadcast %1 : vector<16x1xf32> to vector<16x144xf32>
    %28 = arith.addf %26, %27 : vector<16x144xf32>
    %c0_16 = arith.constant 0 : index
    %c0_17 = arith.constant 0 : index
    %c0_18 = arith.constant 0 : index
    %29 = vector.load %arg5[%c0_16, %c0_17, %c0_18] : memref<2x16x144xf32, #tpu.memory_space<vmem>>, vector<1x16x144xf32>
    %30 = vector.shape_cast %29 : vector<1x16x144xf32> to vector<16x144xf32>
    %31 = vector.shape_cast %28 : vector<16x144xf32> to vector<1x16x144xf32>
    tpu.vector_store %arg5[%c0_16, %c0_17, %c0_18], %31 {strides = array<i32>} : memref<2x16x144xf32, #tpu.memory_space<vmem>>, vector<1x16x144xf32>,
    %c0_19 = arith.constant 0 : index
    %c144 = arith.constant 144 : index
    %32 = vector.load %arg0[%c0_19, %c144] : memref<8x384xf32, #tpu.memory_space<vmem>>, vector<8x144xf32>
    %33 = arith.truncf %32 : vector<8x144xf32> to vector<8x144xbf16>
    %c1 = arith.constant 1 : index
    %c0_20 = arith.constant 0 : index
    %c0_21 = arith.constant 0 : index
    %34 = vector.load %arg1[%c1, %c0_20, %c0_21] : memref<2x8x204xf32, #tpu.memory_space<vmem>>, vector<1x8x204xf32>
    %35 = vector.shape_cast %34 : vector<1x8x204xf32> to vector<8x204xf32>
    %36 = arith.truncf %35 : vector<8x204xf32> to vector<8x204xbf16>
    %c1_22 = arith.constant 1 : index
    %c0_23 = arith.constant 0 : index
    %c0_24 = arith.constant 0 : index
    %37 = vector.load %arg2[%c1_22, %c0_23, %c0_24] : memref<2x8x204xf32, #tpu.memory_space<vmem>>, vector<1x8x204xf32>
    %38 = vector.shape_cast %37 : vector<1x8x204xf32> to vector<8x204xf32>
    %39 = arith.truncf %38 : vector<8x204xf32> to vector<8x204xbf16>
    %cst_25 = arith.constant dense<0.000000e+00> : vector<144x204xf32>
    %40 = tpu.matmul %33, %36, %cst_25 {dimension_numbers = #tpu.dot_dimension_numbers<[0], [0], [1], [1], [0, 1, 1, 1], [], []>} : vector<8x144xbf16>, vector<8x204xbf16>, vector<144x204xf32> -> vector<144x204xf32>
    %cst_26 = arith.constant 0.353553385 : f32
    %41 = vector.broadcast %cst_26 : f32 to vector<144x204xf32>
    %42 = arith.mulf %40, %41 : vector<144x204xf32>
    %cst_27 = arith.constant dense<0xFF800000> : vector<144xf32>
    %43 = vector.multi_reduction <maximumf>, %42, %cst_27 [1] : vector<144x204xf32> to vector<144xf32>
    %44 = vector.shape_cast %43 : vector<144xf32> to vector<144x1xf32>
    %45 = vector.broadcast %44 : vector<144x1xf32> to vector<144x204xf32>
    %46 = arith.subf %42, %45 : vector<144x204xf32>
    %47 = math.exp %46 : vector<144x204xf32>
    %cst_28 = arith.constant dense<0.000000e+00> : vector<144xf32>
    %48 = vector.multi_reduction <add>, %47, %cst_28 [1] : vector<144x204xf32> to vector<144xf32>
    %49 = vector.shape_cast %48 : vector<144xf32> to vector<144x1xf32>
    %50 = tpu.reciprocal %49 {approx = true} : vector<144x1xf32> -> vector<144x1xf32>
    %51 = vector.broadcast %50 : vector<144x1xf32> to vector<144x204xf32>
    %52 = arith.mulf %47, %51 : vector<144x204xf32>
    %53 = arith.truncf %52 : vector<144x204xf32> to vector<144x204xbf16>
    %cst_29 = arith.constant dense<0.000000e+00> : vector<144x8xf32>
    %54 = tpu.matmul %53, %39, %cst_29 {dimension_numbers = #tpu.dot_dimension_numbers<[1], [1], [0], [0], [0, 0, 1, 0], [], []>} : vector<144x204xbf16>, vector<8x204xbf16>, vector<144x8xf32> -> vector<144x8xf32>
    %55 = arith.truncf %54 : vector<144x8xf32> to vector<144x8xbf16>
    %cst_30 = arith.constant dense<0.000000e+00> : vector<16x144xf32>
    %56 = tpu.matmul %0, %55, %cst_30 {dimension_numbers = #tpu.dot_dimension_numbers<[1], [1], [0], [0], [0, 0, 1, 0], [], []>} : vector<16x8xbf16>, vector<144x8xbf16>, vector<16x144xf32> -> vector<16x144xf32>
    %57 = vector.broadcast %1 : vector<16x1xf32> to vector<16x144xf32>
    %58 = arith.addf %56, %57 : vector<16x144xf32>
    %c1_31 = arith.constant 1 : index
    %c0_32 = arith.constant 0 : index
    %c0_33 = arith.constant 0 : index
    %59 = vector.load %arg5[%c1_31, %c0_32, %c0_33] : memref<2x16x144xf32, #tpu.memory_space<vmem>>, vector<1x16x144xf32>
    %60 = vector.shape_cast %59 : vector<1x16x144xf32> to vector<16x144xf32>
    %61 = vector.shape_cast %58 : vector<16x144xf32> to vector<1x16x144xf32>
    tpu.vector_store %arg5[%c1_31, %c0_32, %c0_33], %61 {strides = array<i32>} : memref<2x16x144xf32, #tpu.memory_space<vmem>>, vector<1x16x144xf32>,
    return
  }
}

module attributes {stable_mosaic.version = 11 : i64} {
  func.func @_spp_conv_kernel(%arg0: memref<8x384xf32, #tpu.memory_space<vmem>>, %arg1: memref<1x384xi32, #tpu.memory_space<vmem>>, %arg2: memref<1x384xi32, #tpu.memory_space<vmem>>, %arg3: memref<8x72xbf16, #tpu.memory_space<vmem>>, %arg4: memref<8x1xf32, #tpu.memory_space<vmem>>, %arg5: memref<8x72xbf16, #tpu.memory_space<vmem>>, %arg6: memref<8x1xf32, #tpu.memory_space<vmem>>, %arg7: memref<8x72xbf16, #tpu.memory_space<vmem>>, %arg8: memref<8x1xf32, #tpu.memory_space<vmem>>, %arg9: memref<8x8xbf16, #tpu.memory_space<vmem>>, %arg10: memref<8x1xf32, #tpu.memory_space<vmem>>, %arg11: memref<8x384xf32, #tpu.memory_space<vmem>>, %arg12: memref<8x640xf32, #tpu.memory_space<vmem>>) attributes {dimension_semantics = [], scalar_prefetch = 0 : i64, scratch_operands = 1 : i64, tpu.core_type = #tpu.core_type<tc>} {
    %c0 = arith.constant 0 : index
    %c0_0 = arith.constant 0 : index
    %0 = vector.load %arg1[%c0, %c0_0] : memref<1x384xi32, #tpu.memory_space<vmem>>, vector<1x384xi32>
    %c0_1 = arith.constant 0 : index
    %c0_2 = arith.constant 0 : index
    %1 = vector.load %arg2[%c0_1, %c0_2] : memref<1x384xi32, #tpu.memory_space<vmem>>, vector<1x384xi32>
    %cst = arith.constant 0.000000e+00 : f32
    %2 = vector.broadcast %cst : f32 to vector<8x640xf32>
    %c0_3 = arith.constant 0 : index
    %c0_4 = arith.constant 0 : index
    %3 = vector.load %arg12[%c0_3, %c0_4] : memref<8x640xf32, #tpu.memory_space<vmem>>, vector<8x640xf32>
    tpu.vector_store %arg12[%c0_3, %c0_4], %2 {strides = array<i32>} : memref<8x640xf32, #tpu.memory_space<vmem>>, vector<8x640xf32>,
    %c0_5 = arith.constant 0 : index
    %c0_6 = arith.constant 0 : index
    %4 = vector.load %arg0[%c0_5, %c0_6] : memref<8x384xf32, #tpu.memory_space<vmem>>, vector<8x384xf32>
    %c0_7 = arith.constant 0 : index
    %c128 = arith.constant 128 : index
    %5 = vector.load %arg12[%c0_7, %c128] : memref<8x640xf32, #tpu.memory_space<vmem>>, vector<8x384xf32>
    tpu.vector_store %arg12[%c0_7, %c128], %4 {strides = array<i32>} : memref<8x640xf32, #tpu.memory_space<vmem>>, vector<8x384xf32>,
    %c0_8 = arith.constant 0 : index
    %c115 = arith.constant 115 : index
    %6 = vector.load %arg12[%c0_8, %c115] : memref<8x640xf32, #tpu.memory_space<vmem>>, vector<8x384xf32>
    %c1_i32 = arith.constant 1 : i32
    %7 = vector.broadcast %c1_i32 : i32 to vector<1x384xi32>
    %8 = arith.cmpi sge, %0, %7 : vector<1x384xi32>
    %c13_i32 = arith.constant 13 : i32
    %9 = vector.broadcast %c13_i32 : i32 to vector<1x384xi32>
    %10 = arith.cmpi slt, %0, %9 : vector<1x384xi32>
    %11 = arith.andi %8, %10 : vector<1x384xi1>
    %c1_i32_9 = arith.constant 1 : i32
    %12 = vector.broadcast %c1_i32_9 : i32 to vector<1x384xi32>
    %13 = arith.cmpi sge, %1, %12 : vector<1x384xi32>
    %14 = arith.andi %11, %13 : vector<1x384xi1>
    %c13_i32_10 = arith.constant 13 : i32
    %15 = vector.broadcast %c13_i32_10 : i32 to vector<1x384xi32>
    %16 = arith.cmpi slt, %1, %15 : vector<1x384xi32>
    %17 = arith.andi %14, %16 : vector<1x384xi1>
    %cst_11 = arith.constant 0.000000e+00 : f32
    %18 = vector.shape_cast %17 : vector<1x384xi1> to vector<1x384xi1>
    %19 = vector.broadcast %18 : vector<1x384xi1> to vector<8x384xi1>
    %20 = vector.broadcast %cst_11 : f32 to vector<8x384xf32>
    %21 = arith.select %19, %6, %20 : vector<8x384xi1>, vector<8x384xf32>
    %c0_12 = arith.constant 0 : index
    %c116 = arith.constant 116 : index
    %22 = vector.load %arg12[%c0_12, %c116] : memref<8x640xf32, #tpu.memory_space<vmem>>, vector<8x384xf32>
    %c1_i32_13 = arith.constant 1 : i32
    %23 = vector.broadcast %c1_i32_13 : i32 to vector<1x384xi32>
    %24 = arith.cmpi sge, %0, %23 : vector<1x384xi32>
    %c13_i32_14 = arith.constant 13 : i32
    %25 = vector.broadcast %c13_i32_14 : i32 to vector<1x384xi32>
    %26 = arith.cmpi slt, %0, %25 : vector<1x384xi32>
    %27 = arith.andi %24, %26 : vector<1x384xi1>
    %c0_i32 = arith.constant 0 : i32
    %28 = vector.broadcast %c0_i32 : i32 to vector<1x384xi32>
    %29 = arith.cmpi sge, %1, %28 : vector<1x384xi32>
    %30 = arith.andi %27, %29 : vector<1x384xi1>
    %c12_i32 = arith.constant 12 : i32
    %31 = vector.broadcast %c12_i32 : i32 to vector<1x384xi32>
    %32 = arith.cmpi slt, %1, %31 : vector<1x384xi32>
    %33 = arith.andi %30, %32 : vector<1x384xi1>
    %cst_15 = arith.constant 0.000000e+00 : f32
    %34 = vector.shape_cast %33 : vector<1x384xi1> to vector<1x384xi1>
    %35 = vector.broadcast %34 : vector<1x384xi1> to vector<8x384xi1>
    %36 = vector.broadcast %cst_15 : f32 to vector<8x384xf32>
    %37 = arith.select %35, %22, %36 : vector<8x384xi1>, vector<8x384xf32>
    %c0_16 = arith.constant 0 : index
    %c117 = arith.constant 117 : index
    %38 = vector.load %arg12[%c0_16, %c117] : memref<8x640xf32, #tpu.memory_space<vmem>>, vector<8x384xf32>
    %c1_i32_17 = arith.constant 1 : i32
    %39 = vector.broadcast %c1_i32_17 : i32 to vector<1x384xi32>
    %40 = arith.cmpi sge, %0, %39 : vector<1x384xi32>
    %c13_i32_18 = arith.constant 13 : i32
    %41 = vector.broadcast %c13_i32_18 : i32 to vector<1x384xi32>
    %42 = arith.cmpi slt, %0, %41 : vector<1x384xi32>
    %43 = arith.andi %40, %42 : vector<1x384xi1>
    %c-1_i32 = arith.constant -1 : i32
    %44 = vector.broadcast %c-1_i32 : i32 to vector<1x384xi32>
    %45 = arith.cmpi sge, %1, %44 : vector<1x384xi32>
    %46 = arith.andi %43, %45 : vector<1x384xi1>
    %c11_i32 = arith.constant 11 : i32
    %47 = vector.broadcast %c11_i32 : i32 to vector<1x384xi32>
    %48 = arith.cmpi slt, %1, %47 : vector<1x384xi32>
    %49 = arith.andi %46, %48 : vector<1x384xi1>
    %cst_19 = arith.constant 0.000000e+00 : f32
    %50 = vector.shape_cast %49 : vector<1x384xi1> to vector<1x384xi1>
    %51 = vector.broadcast %50 : vector<1x384xi1> to vector<8x384xi1>
    %52 = vector.broadcast %cst_19 : f32 to vector<8x384xf32>
    %53 = arith.select %51, %38, %52 : vector<8x384xi1>, vector<8x384xf32>
    %c0_20 = arith.constant 0 : index
    %c127 = arith.constant 127 : index
    %54 = vector.load %arg12[%c0_20, %c127] : memref<8x640xf32, #tpu.memory_space<vmem>>, vector<8x384xf32>
    %c0_i32_21 = arith.constant 0 : i32
    %55 = vector.broadcast %c0_i32_21 : i32 to vector<1x384xi32>
    %56 = arith.cmpi sge, %0, %55 : vector<1x384xi32>
    %c12_i32_22 = arith.constant 12 : i32
    %57 = vector.broadcast %c12_i32_22 : i32 to vector<1x384xi32>
    %58 = arith.cmpi slt, %0, %57 : vector<1x384xi32>
    %59 = arith.andi %56, %58 : vector<1x384xi1>
    %c1_i32_23 = arith.constant 1 : i32
    %60 = vector.broadcast %c1_i32_23 : i32 to vector<1x384xi32>
    %61 = arith.cmpi sge, %1, %60 : vector<1x384xi32>
    %62 = arith.andi %59, %61 : vector<1x384xi1>
    %c13_i32_24 = arith.constant 13 : i32
    %63 = vector.broadcast %c13_i32_24 : i32 to vector<1x384xi32>
    %64 = arith.cmpi slt, %1, %63 : vector<1x384xi32>
    %65 = arith.andi %62, %64 : vector<1x384xi1>
    %cst_25 = arith.constant 0.000000e+00 : f32
    %66 = vector.shape_cast %65 : vector<1x384xi1> to vector<1x384xi1>
    %67 = vector.broadcast %66 : vector<1x384xi1> to vector<8x384xi1>
    %68 = vector.broadcast %cst_25 : f32 to vector<8x384xf32>
    %69 = arith.select %67, %54, %68 : vector<8x384xi1>, vector<8x384xf32>
    %c0_26 = arith.constant 0 : index
    %c128_27 = arith.constant 128 : index
    %70 = vector.load %arg12[%c0_26, %c128_27] : memref<8x640xf32, #tpu.memory_space<vmem>>, vector<8x384xf32>
    %c0_i32_28 = arith.constant 0 : i32
    %71 = vector.broadcast %c0_i32_28 : i32 to vector<1x384xi32>
    %72 = arith.cmpi sge, %0, %71 : vector<1x384xi32>
    %c12_i32_29 = arith.constant 12 : i32
    %73 = vector.broadcast %c12_i32_29 : i32 to vector<1x384xi32>
    %74 = arith.cmpi slt, %0, %73 : vector<1x384xi32>
    %75 = arith.andi %72, %74 : vector<1x384xi1>
    %c0_i32_30 = arith.constant 0 : i32
    %76 = vector.broadcast %c0_i32_30 : i32 to vector<1x384xi32>
    %77 = arith.cmpi sge, %1, %76 : vector<1x384xi32>
    %78 = arith.andi %75, %77 : vector<1x384xi1>
    %c12_i32_31 = arith.constant 12 : i32
    %79 = vector.broadcast %c12_i32_31 : i32 to vector<1x384xi32>
    %80 = arith.cmpi slt, %1, %79 : vector<1x384xi32>
    %81 = arith.andi %78, %80 : vector<1x384xi1>
    %cst_32 = arith.constant 0.000000e+00 : f32
    %82 = vector.shape_cast %81 : vector<1x384xi1> to vector<1x384xi1>
    %83 = vector.broadcast %82 : vector<1x384xi1> to vector<8x384xi1>
    %84 = vector.broadcast %cst_32 : f32 to vector<8x384xf32>
    %85 = arith.select %83, %70, %84 : vector<8x384xi1>, vector<8x384xf32>
    %c0_33 = arith.constant 0 : index
    %c129 = arith.constant 129 : index
    %86 = vector.load %arg12[%c0_33, %c129] : memref<8x640xf32, #tpu.memory_space<vmem>>, vector<8x384xf32>
    %c0_i32_34 = arith.constant 0 : i32
    %87 = vector.broadcast %c0_i32_34 : i32 to vector<1x384xi32>
    %88 = arith.cmpi sge, %0, %87 : vector<1x384xi32>
    %c12_i32_35 = arith.constant 12 : i32
    %89 = vector.broadcast %c12_i32_35 : i32 to vector<1x384xi32>
    %90 = arith.cmpi slt, %0, %89 : vector<1x384xi32>
    %91 = arith.andi %88, %90 : vector<1x384xi1>
    %c-1_i32_36 = arith.constant -1 : i32
    %92 = vector.broadcast %c-1_i32_36 : i32 to vector<1x384xi32>
    %93 = arith.cmpi sge, %1, %92 : vector<1x384xi32>
    %94 = arith.andi %91, %93 : vector<1x384xi1>
    %c11_i32_37 = arith.constant 11 : i32
    %95 = vector.broadcast %c11_i32_37 : i32 to vector<1x384xi32>
    %96 = arith.cmpi slt, %1, %95 : vector<1x384xi32>
    %97 = arith.andi %94, %96 : vector<1x384xi1>
    %cst_38 = arith.constant 0.000000e+00 : f32
    %98 = vector.shape_cast %97 : vector<1x384xi1> to vector<1x384xi1>
    %99 = vector.broadcast %98 : vector<1x384xi1> to vector<8x384xi1>
    %100 = vector.broadcast %cst_38 : f32 to vector<8x384xf32>
    %101 = arith.select %99, %86, %100 : vector<8x384xi1>, vector<8x384xf32>
    %c0_39 = arith.constant 0 : index
    %c139 = arith.constant 139 : index
    %102 = vector.load %arg12[%c0_39, %c139] : memref<8x640xf32, #tpu.memory_space<vmem>>, vector<8x384xf32>
    %c-1_i32_40 = arith.constant -1 : i32
    %103 = vector.broadcast %c-1_i32_40 : i32 to vector<1x384xi32>
    %104 = arith.cmpi sge, %0, %103 : vector<1x384xi32>
    %c11_i32_41 = arith.constant 11 : i32
    %105 = vector.broadcast %c11_i32_41 : i32 to vector<1x384xi32>
    %106 = arith.cmpi slt, %0, %105 : vector<1x384xi32>
    %107 = arith.andi %104, %106 : vector<1x384xi1>
    %c1_i32_42 = arith.constant 1 : i32
    %108 = vector.broadcast %c1_i32_42 : i32 to vector<1x384xi32>
    %109 = arith.cmpi sge, %1, %108 : vector<1x384xi32>
    %110 = arith.andi %107, %109 : vector<1x384xi1>
    %c13_i32_43 = arith.constant 13 : i32
    %111 = vector.broadcast %c13_i32_43 : i32 to vector<1x384xi32>
    %112 = arith.cmpi slt, %1, %111 : vector<1x384xi32>
    %113 = arith.andi %110, %112 : vector<1x384xi1>
    %cst_44 = arith.constant 0.000000e+00 : f32
    %114 = vector.shape_cast %113 : vector<1x384xi1> to vector<1x384xi1>
    %115 = vector.broadcast %114 : vector<1x384xi1> to vector<8x384xi1>
    %116 = vector.broadcast %cst_44 : f32 to vector<8x384xf32>
    %117 = arith.select %115, %102, %116 : vector<8x384xi1>, vector<8x384xf32>
    %c0_45 = arith.constant 0 : index
    %c140 = arith.constant 140 : index
    %118 = vector.load %arg12[%c0_45, %c140] : memref<8x640xf32, #tpu.memory_space<vmem>>, vector<8x384xf32>
    %c-1_i32_46 = arith.constant -1 : i32
    %119 = vector.broadcast %c-1_i32_46 : i32 to vector<1x384xi32>
    %120 = arith.cmpi sge, %0, %119 : vector<1x384xi32>
    %c11_i32_47 = arith.constant 11 : i32
    %121 = vector.broadcast %c11_i32_47 : i32 to vector<1x384xi32>
    %122 = arith.cmpi slt, %0, %121 : vector<1x384xi32>
    %123 = arith.andi %120, %122 : vector<1x384xi1>
    %c0_i32_48 = arith.constant 0 : i32
    %124 = vector.broadcast %c0_i32_48 : i32 to vector<1x384xi32>
    %125 = arith.cmpi sge, %1, %124 : vector<1x384xi32>
    %126 = arith.andi %123, %125 : vector<1x384xi1>
    %c12_i32_49 = arith.constant 12 : i32
    %127 = vector.broadcast %c12_i32_49 : i32 to vector<1x384xi32>
    %128 = arith.cmpi slt, %1, %127 : vector<1x384xi32>
    %129 = arith.andi %126, %128 : vector<1x384xi1>
    %cst_50 = arith.constant 0.000000e+00 : f32
    %130 = vector.shape_cast %129 : vector<1x384xi1> to vector<1x384xi1>
    %131 = vector.broadcast %130 : vector<1x384xi1> to vector<8x384xi1>
    %132 = vector.broadcast %cst_50 : f32 to vector<8x384xf32>
    %133 = arith.select %131, %118, %132 : vector<8x384xi1>, vector<8x384xf32>
    %c0_51 = arith.constant 0 : index
    %c141 = arith.constant 141 : index
    %134 = vector.load %arg12[%c0_51, %c141] : memref<8x640xf32, #tpu.memory_space<vmem>>, vector<8x384xf32>
    %c-1_i32_52 = arith.constant -1 : i32
    %135 = vector.broadcast %c-1_i32_52 : i32 to vector<1x384xi32>
    %136 = arith.cmpi sge, %0, %135 : vector<1x384xi32>
    %c11_i32_53 = arith.constant 11 : i32
    %137 = vector.broadcast %c11_i32_53 : i32 to vector<1x384xi32>
    %138 = arith.cmpi slt, %0, %137 : vector<1x384xi32>
    %139 = arith.andi %136, %138 : vector<1x384xi1>
    %c-1_i32_54 = arith.constant -1 : i32
    %140 = vector.broadcast %c-1_i32_54 : i32 to vector<1x384xi32>
    %141 = arith.cmpi sge, %1, %140 : vector<1x384xi32>
    %142 = arith.andi %139, %141 : vector<1x384xi1>
    %c11_i32_55 = arith.constant 11 : i32
    %143 = vector.broadcast %c11_i32_55 : i32 to vector<1x384xi32>
    %144 = arith.cmpi slt, %1, %143 : vector<1x384xi32>
    %145 = arith.andi %142, %144 : vector<1x384xi1>
    %cst_56 = arith.constant 0.000000e+00 : f32
    %146 = vector.shape_cast %145 : vector<1x384xi1> to vector<1x384xi1>
    %147 = vector.broadcast %146 : vector<1x384xi1> to vector<8x384xi1>
    %148 = vector.broadcast %cst_56 : f32 to vector<8x384xf32>
    %149 = arith.select %147, %134, %148 : vector<8x384xi1>, vector<8x384xf32>
    %150 = tpu.concatenate %21, %37, %53, %69, %85, %101, %117, %133, %149 in 0 : vector<8x384xf32>, vector<8x384xf32>, vector<8x384xf32>, vector<8x384xf32>, vector<8x384xf32>, vector<8x384xf32>, vector<8x384xf32>, vector<8x384xf32>, vector<8x384xf32> -> vector<72x384xf32>
    %151 = arith.truncf %150 : vector<72x384xf32> to vector<72x384xbf16>
    %c0_57 = arith.constant 0 : index
    %c0_58 = arith.constant 0 : index
    %152 = vector.load %arg3[%c0_57, %c0_58] : memref<8x72xbf16, #tpu.memory_space<vmem>>, vector<8x72xbf16>
    %cst_59 = arith.constant dense<0.000000e+00> : vector<8x384xf32>
    %153 = tpu.matmul %152, %151, %cst_59 {dimension_numbers = #tpu.dot_dimension_numbers<[1], [0], [0], [1], [0, 0, 1, 1], [], []>} : vector<8x72xbf16>, vector<72x384xbf16>, vector<8x384xf32> -> vector<8x384xf32>
    %c0_60 = arith.constant 0 : index
    %c0_61 = arith.constant 0 : index
    %154 = vector.load %arg4[%c0_60, %c0_61] : memref<8x1xf32, #tpu.memory_space<vmem>>, vector<8x1xf32>
    %155 = vector.broadcast %154 : vector<8x1xf32> to vector<8x384xf32>
    %156 = arith.addf %153, %155 : vector<8x384xf32>
    %c0_62 = arith.constant 0 : index
    %c128_63 = arith.constant 128 : index
    %157 = vector.load %arg12[%c0_62, %c128_63] : memref<8x640xf32, #tpu.memory_space<vmem>>, vector<8x384xf32>
    tpu.vector_store %arg12[%c0_62, %c128_63], %4 {strides = array<i32>} : memref<8x640xf32, #tpu.memory_space<vmem>>, vector<8x384xf32>,
    %c0_64 = arith.constant 0 : index
    %c89 = arith.constant 89 : index
    %158 = vector.load %arg12[%c0_64, %c89] : memref<8x640xf32, #tpu.memory_space<vmem>>, vector<8x384xf32>
    %c3_i32 = arith.constant 3 : i32
    %159 = vector.broadcast %c3_i32 : i32 to vector<1x384xi32>
    %160 = arith.cmpi sge, %0, %159 : vector<1x384xi32>
    %c15_i32 = arith.constant 15 : i32
    %161 = vector.broadcast %c15_i32 : i32 to vector<1x384xi32>
    %162 = arith.cmpi slt, %0, %161 : vector<1x384xi32>
    %163 = arith.andi %160, %162 : vector<1x384xi1>
    %c3_i32_65 = arith.constant 3 : i32
    %164 = vector.broadcast %c3_i32_65 : i32 to vector<1x384xi32>
    %165 = arith.cmpi sge, %1, %164 : vector<1x384xi32>
    %166 = arith.andi %163, %165 : vector<1x384xi1>
    %c15_i32_66 = arith.constant 15 : i32
    %167 = vector.broadcast %c15_i32_66 : i32 to vector<1x384xi32>
    %168 = arith.cmpi slt, %1, %167 : vector<1x384xi32>
    %169 = arith.andi %166, %168 : vector<1x384xi1>
    %cst_67 = arith.constant 0.000000e+00 : f32
    %170 = vector.shape_cast %169 : vector<1x384xi1> to vector<1x384xi1>
    %171 = vector.broadcast %170 : vector<1x384xi1> to vector<8x384xi1>
    %172 = vector.broadcast %cst_67 : f32 to vector<8x384xf32>
    %173 = arith.select %171, %158, %172 : vector<8x384xi1>, vector<8x384xf32>
    %c0_68 = arith.constant 0 : index
    %c92 = arith.constant 92 : index
    %174 = vector.load %arg12[%c0_68, %c92] : memref<8x640xf32, #tpu.memory_space<vmem>>, vector<8x384xf32>
    %c3_i32_69 = arith.constant 3 : i32
    %175 = vector.broadcast %c3_i32_69 : i32 to vector<1x384xi32>
    %176 = arith.cmpi sge, %0, %175 : vector<1x384xi32>
    %c15_i32_70 = arith.constant 15 : i32
    %177 = vector.broadcast %c15_i32_70 : i32 to vector<1x384xi32>
    %178 = arith.cmpi slt, %0, %177 : vector<1x384xi32>
    %179 = arith.andi %176, %178 : vector<1x384xi1>
    %c0_i32_71 = arith.constant 0 : i32
    %180 = vector.broadcast %c0_i32_71 : i32 to vector<1x384xi32>
    %181 = arith.cmpi sge, %1, %180 : vector<1x384xi32>
    %182 = arith.andi %179, %181 : vector<1x384xi1>
    %c12_i32_72 = arith.constant 12 : i32
    %183 = vector.broadcast %c12_i32_72 : i32 to vector<1x384xi32>
    %184 = arith.cmpi slt, %1, %183 : vector<1x384xi32>
    %185 = arith.andi %182, %184 : vector<1x384xi1>
    %cst_73 = arith.constant 0.000000e+00 : f32
    %186 = vector.shape_cast %185 : vector<1x384xi1> to vector<1x384xi1>
    %187 = vector.broadcast %186 : vector<1x384xi1> to vector<8x384xi1>
    %188 = vector.broadcast %cst_73 : f32 to vector<8x384xf32>
    %189 = arith.select %187, %174, %188 : vector<8x384xi1>, vector<8x384xf32>
    %c0_74 = arith.constant 0 : index
    %c95 = arith.constant 95 : index
    %190 = vector.load %arg12[%c0_74, %c95] : memref<8x640xf32, #tpu.memory_space<vmem>>, vector<8x384xf32>
    %c3_i32_75 = arith.constant 3 : i32
    %191 = vector.broadcast %c3_i32_75 : i32 to vector<1x384xi32>
    %192 = arith.cmpi sge, %0, %191 : vector<1x384xi32>
    %c15_i32_76 = arith.constant 15 : i32
    %193 = vector.broadcast %c15_i32_76 : i32 to vector<1x384xi32>
    %194 = arith.cmpi slt, %0, %193 : vector<1x384xi32>
    %195 = arith.andi %192, %194 : vector<1x384xi1>
    %c-3_i32 = arith.constant -3 : i32
    %196 = vector.broadcast %c-3_i32 : i32 to vector<1x384xi32>
    %197 = arith.cmpi sge, %1, %196 : vector<1x384xi32>
    %198 = arith.andi %195, %197 : vector<1x384xi1>
    %c9_i32 = arith.constant 9 : i32
    %199 = vector.broadcast %c9_i32 : i32 to vector<1x384xi32>
    %200 = arith.cmpi slt, %1, %199 : vector<1x384xi32>
    %201 = arith.andi %198, %200 : vector<1x384xi1>
    %cst_77 = arith.constant 0.000000e+00 : f32
    %202 = vector.shape_cast %201 : vector<1x384xi1> to vector<1x384xi1>
    %203 = vector.broadcast %202 : vector<1x384xi1> to vector<8x384xi1>
    %204 = vector.broadcast %cst_77 : f32 to vector<8x384xf32>
    %205 = arith.select %203, %190, %204 : vector<8x384xi1>, vector<8x384xf32>
    %c0_78 = arith.constant 0 : index
    %c125 = arith.constant 125 : index
    %206 = vector.load %arg12[%c0_78, %c125] : memref<8x640xf32, #tpu.memory_space<vmem>>, vector<8x384xf32>
    %c0_i32_79 = arith.constant 0 : i32
    %207 = vector.broadcast %c0_i32_79 : i32 to vector<1x384xi32>
    %208 = arith.cmpi sge, %0, %207 : vector<1x384xi32>
    %c12_i32_80 = arith.constant 12 : i32
    %209 = vector.broadcast %c12_i32_80 : i32 to vector<1x384xi32>
    %210 = arith.cmpi slt, %0, %209 : vector<1x384xi32>
    %211 = arith.andi %208, %210 : vector<1x384xi1>
    %c3_i32_81 = arith.constant 3 : i32
    %212 = vector.broadcast %c3_i32_81 : i32 to vector<1x384xi32>
    %213 = arith.cmpi sge, %1, %212 : vector<1x384xi32>
    %214 = arith.andi %211, %213 : vector<1x384xi1>
    %c15_i32_82 = arith.constant 15 : i32
    %215 = vector.broadcast %c15_i32_82 : i32 to vector<1x384xi32>
    %216 = arith.cmpi slt, %1, %215 : vector<1x384xi32>
    %217 = arith.andi %214, %216 : vector<1x384xi1>
    %cst_83 = arith.constant 0.000000e+00 : f32
    %218 = vector.shape_cast %217 : vector<1x384xi1> to vector<1x384xi1>
    %219 = vector.broadcast %218 : vector<1x384xi1> to vector<8x384xi1>
    %220 = vector.broadcast %cst_83 : f32 to vector<8x384xf32>
    %221 = arith.select %219, %206, %220 : vector<8x384xi1>, vector<8x384xf32>
    %c0_84 = arith.constant 0 : index
    %c128_85 = arith.constant 128 : index
    %222 = vector.load %arg12[%c0_84, %c128_85] : memref<8x640xf32, #tpu.memory_space<vmem>>, vector<8x384xf32>
    %c0_i32_86 = arith.constant 0 : i32
    %223 = vector.broadcast %c0_i32_86 : i32 to vector<1x384xi32>
    %224 = arith.cmpi sge, %0, %223 : vector<1x384xi32>
    %c12_i32_87 = arith.constant 12 : i32
    %225 = vector.broadcast %c12_i32_87 : i32 to vector<1x384xi32>
    %226 = arith.cmpi slt, %0, %225 : vector<1x384xi32>
    %227 = arith.andi %224, %226 : vector<1x384xi1>
    %c0_i32_88 = arith.constant 0 : i32
    %228 = vector.broadcast %c0_i32_88 : i32 to vector<1x384xi32>
    %229 = arith.cmpi sge, %1, %228 : vector<1x384xi32>
    %230 = arith.andi %227, %229 : vector<1x384xi1>
    %c12_i32_89 = arith.constant 12 : i32
    %231 = vector.broadcast %c12_i32_89 : i32 to vector<1x384xi32>
    %232 = arith.cmpi slt, %1, %231 : vector<1x384xi32>
    %233 = arith.andi %230, %232 : vector<1x384xi1>
    %cst_90 = arith.constant 0.000000e+00 : f32
    %234 = vector.shape_cast %233 : vector<1x384xi1> to vector<1x384xi1>
    %235 = vector.broadcast %234 : vector<1x384xi1> to vector<8x384xi1>
    %236 = vector.broadcast %cst_90 : f32 to vector<8x384xf32>
    %237 = arith.select %235, %222, %236 : vector<8x384xi1>, vector<8x384xf32>
    %c0_91 = arith.constant 0 : index
    %c131 = arith.constant 131 : index
    %238 = vector.load %arg12[%c0_91, %c131] : memref<8x640xf32, #tpu.memory_space<vmem>>, vector<8x384xf32>
    %c0_i32_92 = arith.constant 0 : i32
    %239 = vector.broadcast %c0_i32_92 : i32 to vector<1x384xi32>
    %240 = arith.cmpi sge, %0, %239 : vector<1x384xi32>
    %c12_i32_93 = arith.constant 12 : i32
    %241 = vector.broadcast %c12_i32_93 : i32 to vector<1x384xi32>
    %242 = arith.cmpi slt, %0, %241 : vector<1x384xi32>
    %243 = arith.andi %240, %242 : vector<1x384xi1>
    %c-3_i32_94 = arith.constant -3 : i32
    %244 = vector.broadcast %c-3_i32_94 : i32 to vector<1x384xi32>
    %245 = arith.cmpi sge, %1, %244 : vector<1x384xi32>
    %246 = arith.andi %243, %245 : vector<1x384xi1>
    %c9_i32_95 = arith.constant 9 : i32
    %247 = vector.broadcast %c9_i32_95 : i32 to vector<1x384xi32>
    %248 = arith.cmpi slt, %1, %247 : vector<1x384xi32>
    %249 = arith.andi %246, %248 : vector<1x384xi1>
    %cst_96 = arith.constant 0.000000e+00 : f32
    %250 = vector.shape_cast %249 : vector<1x384xi1> to vector<1x384xi1>
    %251 = vector.broadcast %250 : vector<1x384xi1> to vector<8x384xi1>
    %252 = vector.broadcast %cst_96 : f32 to vector<8x384xf32>
    %253 = arith.select %251, %238, %252 : vector<8x384xi1>, vector<8x384xf32>
    %c0_97 = arith.constant 0 : index
    %c161 = arith.constant 161 : index
    %254 = vector.load %arg12[%c0_97, %c161] : memref<8x640xf32, #tpu.memory_space<vmem>>, vector<8x384xf32>
    %c-3_i32_98 = arith.constant -3 : i32
    %255 = vector.broadcast %c-3_i32_98 : i32 to vector<1x384xi32>
    %256 = arith.cmpi sge, %0, %255 : vector<1x384xi32>
    %c9_i32_99 = arith.constant 9 : i32
    %257 = vector.broadcast %c9_i32_99 : i32 to vector<1x384xi32>
    %258 = arith.cmpi slt, %0, %257 : vector<1x384xi32>
    %259 = arith.andi %256, %258 : vector<1x384xi1>
    %c3_i32_100 = arith.constant 3 : i32
    %260 = vector.broadcast %c3_i32_100 : i32 to vector<1x384xi32>
    %261 = arith.cmpi sge, %1, %260 : vector<1x384xi32>
    %262 = arith.andi %259, %261 : vector<1x384xi1>
    %c15_i32_101 = arith.constant 15 : i32
    %263 = vector.broadcast %c15_i32_101 : i32 to vector<1x384xi32>
    %264 = arith.cmpi slt, %1, %263 : vector<1x384xi32>
    %265 = arith.andi %262, %264 : vector<1x384xi1>
    %cst_102 = arith.constant 0.000000e+00 : f32
    %266 = vector.shape_cast %265 : vector<1x384xi1> to vector<1x384xi1>
    %267 = vector.broadcast %266 : vector<1x384xi1> to vector<8x384xi1>
    %268 = vector.broadcast %cst_102 : f32 to vector<8x384xf32>
    %269 = arith.select %267, %254, %268 : vector<8x384xi1>, vector<8x384xf32>
    %c0_103 = arith.constant 0 : index
    %c164 = arith.constant 164 : index
    %270 = vector.load %arg12[%c0_103, %c164] : memref<8x640xf32, #tpu.memory_space<vmem>>, vector<8x384xf32>
    %c-3_i32_104 = arith.constant -3 : i32
    %271 = vector.broadcast %c-3_i32_104 : i32 to vector<1x384xi32>
    %272 = arith.cmpi sge, %0, %271 : vector<1x384xi32>
    %c9_i32_105 = arith.constant 9 : i32
    %273 = vector.broadcast %c9_i32_105 : i32 to vector<1x384xi32>
    %274 = arith.cmpi slt, %0, %273 : vector<1x384xi32>
    %275 = arith.andi %272, %274 : vector<1x384xi1>
    %c0_i32_106 = arith.constant 0 : i32
    %276 = vector.broadcast %c0_i32_106 : i32 to vector<1x384xi32>
    %277 = arith.cmpi sge, %1, %276 : vector<1x384xi32>
    %278 = arith.andi %275, %277 : vector<1x384xi1>
    %c12_i32_107 = arith.constant 12 : i32
    %279 = vector.broadcast %c12_i32_107 : i32 to vector<1x384xi32>
    %280 = arith.cmpi slt, %1, %279 : vector<1x384xi32>
    %281 = arith.andi %278, %280 : vector<1x384xi1>
    %cst_108 = arith.constant 0.000000e+00 : f32
    %282 = vector.shape_cast %281 : vector<1x384xi1> to vector<1x384xi1>
    %283 = vector.broadcast %282 : vector<1x384xi1> to vector<8x384xi1>
    %284 = vector.broadcast %cst_108 : f32 to vector<8x384xf32>
    %285 = arith.select %283, %270, %284 : vector<8x384xi1>, vector<8x384xf32>
    %c0_109 = arith.constant 0 : index
    %c167 = arith.constant 167 : index
    %286 = vector.load %arg12[%c0_109, %c167] : memref<8x640xf32, #tpu.memory_space<vmem>>, vector<8x384xf32>
    %c-3_i32_110 = arith.constant -3 : i32
    %287 = vector.broadcast %c-3_i32_110 : i32 to vector<1x384xi32>
    %288 = arith.cmpi sge, %0, %287 : vector<1x384xi32>
    %c9_i32_111 = arith.constant 9 : i32
    %289 = vector.broadcast %c9_i32_111 : i32 to vector<1x384xi32>
    %290 = arith.cmpi slt, %0, %289 : vector<1x384xi32>
    %291 = arith.andi %288, %290 : vector<1x384xi1>
    %c-3_i32_112 = arith.constant -3 : i32
    %292 = vector.broadcast %c-3_i32_112 : i32 to vector<1x384xi32>
    %293 = arith.cmpi sge, %1, %292 : vector<1x384xi32>
    %294 = arith.andi %291, %293 : vector<1x384xi1>
    %c9_i32_113 = arith.constant 9 : i32
    %295 = vector.broadcast %c9_i32_113 : i32 to vector<1x384xi32>
    %296 = arith.cmpi slt, %1, %295 : vector<1x384xi32>
    %297 = arith.andi %294, %296 : vector<1x384xi1>
    %cst_114 = arith.constant 0.000000e+00 : f32
    %298 = vector.shape_cast %297 : vector<1x384xi1> to vector<1x384xi1>
    %299 = vector.broadcast %298 : vector<1x384xi1> to vector<8x384xi1>
    %300 = vector.broadcast %cst_114 : f32 to vector<8x384xf32>
    %301 = arith.select %299, %286, %300 : vector<8x384xi1>, vector<8x384xf32>
    %302 = tpu.concatenate %173, %189, %205, %221, %237, %253, %269, %285, %301 in 0 : vector<8x384xf32>, vector<8x384xf32>, vector<8x384xf32>, vector<8x384xf32>, vector<8x384xf32>, vector<8x384xf32>, vector<8x384xf32>, vector<8x384xf32>, vector<8x384xf32> -> vector<72x384xf32>
    %303 = arith.truncf %302 : vector<72x384xf32> to vector<72x384xbf16>
    %c0_115 = arith.constant 0 : index
    %c0_116 = arith.constant 0 : index
    %304 = vector.load %arg5[%c0_115, %c0_116] : memref<8x72xbf16, #tpu.memory_space<vmem>>, vector<8x72xbf16>
    %cst_117 = arith.constant dense<0.000000e+00> : vector<8x384xf32>
    %305 = tpu.matmul %304, %303, %cst_117 {dimension_numbers = #tpu.dot_dimension_numbers<[1], [0], [0], [1], [0, 0, 1, 1], [], []>} : vector<8x72xbf16>, vector<72x384xbf16>, vector<8x384xf32> -> vector<8x384xf32>
    %c0_118 = arith.constant 0 : index
    %c0_119 = arith.constant 0 : index
    %306 = vector.load %arg6[%c0_118, %c0_119] : memref<8x1xf32, #tpu.memory_space<vmem>>, vector<8x1xf32>
    %307 = vector.broadcast %306 : vector<8x1xf32> to vector<8x384xf32>
    %308 = arith.addf %305, %307 : vector<8x384xf32>
    %c0_120 = arith.constant 0 : index
    %c128_121 = arith.constant 128 : index
    %309 = vector.load %arg12[%c0_120, %c128_121] : memref<8x640xf32, #tpu.memory_space<vmem>>, vector<8x384xf32>
    tpu.vector_store %arg12[%c0_120, %c128_121], %156 {strides = array<i32>} : memref<8x640xf32, #tpu.memory_space<vmem>>, vector<8x384xf32>,
    %c0_122 = arith.constant 0 : index
    %c89_123 = arith.constant 89 : index
    %310 = vector.load %arg12[%c0_122, %c89_123] : memref<8x640xf32, #tpu.memory_space<vmem>>, vector<8x384xf32>
    %c3_i32_124 = arith.constant 3 : i32
    %311 = vector.broadcast %c3_i32_124 : i32 to vector<1x384xi32>
    %312 = arith.cmpi sge, %0, %311 : vector<1x384xi32>
    %c15_i32_125 = arith.constant 15 : i32
    %313 = vector.broadcast %c15_i32_125 : i32 to vector<1x384xi32>
    %314 = arith.cmpi slt, %0, %313 : vector<1x384xi32>
    %315 = arith.andi %312, %314 : vector<1x384xi1>
    %c3_i32_126 = arith.constant 3 : i32
    %316 = vector.broadcast %c3_i32_126 : i32 to vector<1x384xi32>
    %317 = arith.cmpi sge, %1, %316 : vector<1x384xi32>
    %318 = arith.andi %315, %317 : vector<1x384xi1>
    %c15_i32_127 = arith.constant 15 : i32
    %319 = vector.broadcast %c15_i32_127 : i32 to vector<1x384xi32>
    %320 = arith.cmpi slt, %1, %319 : vector<1x384xi32>
    %321 = arith.andi %318, %320 : vector<1x384xi1>
    %cst_128 = arith.constant 0.000000e+00 : f32
    %322 = vector.shape_cast %321 : vector<1x384xi1> to vector<1x384xi1>
    %323 = vector.broadcast %322 : vector<1x384xi1> to vector<8x384xi1>
    %324 = vector.broadcast %cst_128 : f32 to vector<8x384xf32>
    %325 = arith.select %323, %310, %324 : vector<8x384xi1>, vector<8x384xf32>
    %c0_129 = arith.constant 0 : index
    %c92_130 = arith.constant 92 : index
    %326 = vector.load %arg12[%c0_129, %c92_130] : memref<8x640xf32, #tpu.memory_space<vmem>>, vector<8x384xf32>
    %c3_i32_131 = arith.constant 3 : i32
    %327 = vector.broadcast %c3_i32_131 : i32 to vector<1x384xi32>
    %328 = arith.cmpi sge, %0, %327 : vector<1x384xi32>
    %c15_i32_132 = arith.constant 15 : i32
    %329 = vector.broadcast %c15_i32_132 : i32 to vector<1x384xi32>
    %330 = arith.cmpi slt, %0, %329 : vector<1x384xi32>
    %331 = arith.andi %328, %330 : vector<1x384xi1>
    %c0_i32_133 = arith.constant 0 : i32
    %332 = vector.broadcast %c0_i32_133 : i32 to vector<1x384xi32>
    %333 = arith.cmpi sge, %1, %332 : vector<1x384xi32>
    %334 = arith.andi %331, %333 : vector<1x384xi1>
    %c12_i32_134 = arith.constant 12 : i32
    %335 = vector.broadcast %c12_i32_134 : i32 to vector<1x384xi32>
    %336 = arith.cmpi slt, %1, %335 : vector<1x384xi32>
    %337 = arith.andi %334, %336 : vector<1x384xi1>
    %cst_135 = arith.constant 0.000000e+00 : f32
    %338 = vector.shape_cast %337 : vector<1x384xi1> to vector<1x384xi1>
    %339 = vector.broadcast %338 : vector<1x384xi1> to vector<8x384xi1>
    %340 = vector.broadcast %cst_135 : f32 to vector<8x384xf32>
    %341 = arith.select %339, %326, %340 : vector<8x384xi1>, vector<8x384xf32>
    %c0_136 = arith.constant 0 : index
    %c95_137 = arith.constant 95 : index
    %342 = vector.load %arg12[%c0_136, %c95_137] : memref<8x640xf32, #tpu.memory_space<vmem>>, vector<8x384xf32>
    %c3_i32_138 = arith.constant 3 : i32
    %343 = vector.broadcast %c3_i32_138 : i32 to vector<1x384xi32>
    %344 = arith.cmpi sge, %0, %343 : vector<1x384xi32>
    %c15_i32_139 = arith.constant 15 : i32
    %345 = vector.broadcast %c15_i32_139 : i32 to vector<1x384xi32>
    %346 = arith.cmpi slt, %0, %345 : vector<1x384xi32>
    %347 = arith.andi %344, %346 : vector<1x384xi1>
    %c-3_i32_140 = arith.constant -3 : i32
    %348 = vector.broadcast %c-3_i32_140 : i32 to vector<1x384xi32>
    %349 = arith.cmpi sge, %1, %348 : vector<1x384xi32>
    %350 = arith.andi %347, %349 : vector<1x384xi1>
    %c9_i32_141 = arith.constant 9 : i32
    %351 = vector.broadcast %c9_i32_141 : i32 to vector<1x384xi32>
    %352 = arith.cmpi slt, %1, %351 : vector<1x384xi32>
    %353 = arith.andi %350, %352 : vector<1x384xi1>
    %cst_142 = arith.constant 0.000000e+00 : f32
    %354 = vector.shape_cast %353 : vector<1x384xi1> to vector<1x384xi1>
    %355 = vector.broadcast %354 : vector<1x384xi1> to vector<8x384xi1>
    %356 = vector.broadcast %cst_142 : f32 to vector<8x384xf32>
    %357 = arith.select %355, %342, %356 : vector<8x384xi1>, vector<8x384xf32>
    %c0_143 = arith.constant 0 : index
    %c125_144 = arith.constant 125 : index
    %358 = vector.load %arg12[%c0_143, %c125_144] : memref<8x640xf32, #tpu.memory_space<vmem>>, vector<8x384xf32>
    %c0_i32_145 = arith.constant 0 : i32
    %359 = vector.broadcast %c0_i32_145 : i32 to vector<1x384xi32>
    %360 = arith.cmpi sge, %0, %359 : vector<1x384xi32>
    %c12_i32_146 = arith.constant 12 : i32
    %361 = vector.broadcast %c12_i32_146 : i32 to vector<1x384xi32>
    %362 = arith.cmpi slt, %0, %361 : vector<1x384xi32>
    %363 = arith.andi %360, %362 : vector<1x384xi1>
    %c3_i32_147 = arith.constant 3 : i32
    %364 = vector.broadcast %c3_i32_147 : i32 to vector<1x384xi32>
    %365 = arith.cmpi sge, %1, %364 : vector<1x384xi32>
    %366 = arith.andi %363, %365 : vector<1x384xi1>
    %c15_i32_148 = arith.constant 15 : i32
    %367 = vector.broadcast %c15_i32_148 : i32 to vector<1x384xi32>
    %368 = arith.cmpi slt, %1, %367 : vector<1x384xi32>
    %369 = arith.andi %366, %368 : vector<1x384xi1>
    %cst_149 = arith.constant 0.000000e+00 : f32
    %370 = vector.shape_cast %369 : vector<1x384xi1> to vector<1x384xi1>
    %371 = vector.broadcast %370 : vector<1x384xi1> to vector<8x384xi1>
    %372 = vector.broadcast %cst_149 : f32 to vector<8x384xf32>
    %373 = arith.select %371, %358, %372 : vector<8x384xi1>, vector<8x384xf32>
    %c0_150 = arith.constant 0 : index
    %c128_151 = arith.constant 128 : index
    %374 = vector.load %arg12[%c0_150, %c128_151] : memref<8x640xf32, #tpu.memory_space<vmem>>, vector<8x384xf32>
    %c0_i32_152 = arith.constant 0 : i32
    %375 = vector.broadcast %c0_i32_152 : i32 to vector<1x384xi32>
    %376 = arith.cmpi sge, %0, %375 : vector<1x384xi32>
    %c12_i32_153 = arith.constant 12 : i32
    %377 = vector.broadcast %c12_i32_153 : i32 to vector<1x384xi32>
    %378 = arith.cmpi slt, %0, %377 : vector<1x384xi32>
    %379 = arith.andi %376, %378 : vector<1x384xi1>
    %c0_i32_154 = arith.constant 0 : i32
    %380 = vector.broadcast %c0_i32_154 : i32 to vector<1x384xi32>
    %381 = arith.cmpi sge, %1, %380 : vector<1x384xi32>
    %382 = arith.andi %379, %381 : vector<1x384xi1>
    %c12_i32_155 = arith.constant 12 : i32
    %383 = vector.broadcast %c12_i32_155 : i32 to vector<1x384xi32>
    %384 = arith.cmpi slt, %1, %383 : vector<1x384xi32>
    %385 = arith.andi %382, %384 : vector<1x384xi1>
    %cst_156 = arith.constant 0.000000e+00 : f32
    %386 = vector.shape_cast %385 : vector<1x384xi1> to vector<1x384xi1>
    %387 = vector.broadcast %386 : vector<1x384xi1> to vector<8x384xi1>
    %388 = vector.broadcast %cst_156 : f32 to vector<8x384xf32>
    %389 = arith.select %387, %374, %388 : vector<8x384xi1>, vector<8x384xf32>
    %c0_157 = arith.constant 0 : index
    %c131_158 = arith.constant 131 : index
    %390 = vector.load %arg12[%c0_157, %c131_158] : memref<8x640xf32, #tpu.memory_space<vmem>>, vector<8x384xf32>
    %c0_i32_159 = arith.constant 0 : i32
    %391 = vector.broadcast %c0_i32_159 : i32 to vector<1x384xi32>
    %392 = arith.cmpi sge, %0, %391 : vector<1x384xi32>
    %c12_i32_160 = arith.constant 12 : i32
    %393 = vector.broadcast %c12_i32_160 : i32 to vector<1x384xi32>
    %394 = arith.cmpi slt, %0, %393 : vector<1x384xi32>
    %395 = arith.andi %392, %394 : vector<1x384xi1>
    %c-3_i32_161 = arith.constant -3 : i32
    %396 = vector.broadcast %c-3_i32_161 : i32 to vector<1x384xi32>
    %397 = arith.cmpi sge, %1, %396 : vector<1x384xi32>
    %398 = arith.andi %395, %397 : vector<1x384xi1>
    %c9_i32_162 = arith.constant 9 : i32
    %399 = vector.broadcast %c9_i32_162 : i32 to vector<1x384xi32>
    %400 = arith.cmpi slt, %1, %399 : vector<1x384xi32>
    %401 = arith.andi %398, %400 : vector<1x384xi1>
    %cst_163 = arith.constant 0.000000e+00 : f32
    %402 = vector.shape_cast %401 : vector<1x384xi1> to vector<1x384xi1>
    %403 = vector.broadcast %402 : vector<1x384xi1> to vector<8x384xi1>
    %404 = vector.broadcast %cst_163 : f32 to vector<8x384xf32>
    %405 = arith.select %403, %390, %404 : vector<8x384xi1>, vector<8x384xf32>
    %c0_164 = arith.constant 0 : index
    %c161_165 = arith.constant 161 : index
    %406 = vector.load %arg12[%c0_164, %c161_165] : memref<8x640xf32, #tpu.memory_space<vmem>>, vector<8x384xf32>
    %c-3_i32_166 = arith.constant -3 : i32
    %407 = vector.broadcast %c-3_i32_166 : i32 to vector<1x384xi32>
    %408 = arith.cmpi sge, %0, %407 : vector<1x384xi32>
    %c9_i32_167 = arith.constant 9 : i32
    %409 = vector.broadcast %c9_i32_167 : i32 to vector<1x384xi32>
    %410 = arith.cmpi slt, %0, %409 : vector<1x384xi32>
    %411 = arith.andi %408, %410 : vector<1x384xi1>
    %c3_i32_168 = arith.constant 3 : i32
    %412 = vector.broadcast %c3_i32_168 : i32 to vector<1x384xi32>
    %413 = arith.cmpi sge, %1, %412 : vector<1x384xi32>
    %414 = arith.andi %411, %413 : vector<1x384xi1>
    %c15_i32_169 = arith.constant 15 : i32
    %415 = vector.broadcast %c15_i32_169 : i32 to vector<1x384xi32>
    %416 = arith.cmpi slt, %1, %415 : vector<1x384xi32>
    %417 = arith.andi %414, %416 : vector<1x384xi1>
    %cst_170 = arith.constant 0.000000e+00 : f32
    %418 = vector.shape_cast %417 : vector<1x384xi1> to vector<1x384xi1>
    %419 = vector.broadcast %418 : vector<1x384xi1> to vector<8x384xi1>
    %420 = vector.broadcast %cst_170 : f32 to vector<8x384xf32>
    %421 = arith.select %419, %406, %420 : vector<8x384xi1>, vector<8x384xf32>
    %c0_171 = arith.constant 0 : index
    %c164_172 = arith.constant 164 : index
    %422 = vector.load %arg12[%c0_171, %c164_172] : memref<8x640xf32, #tpu.memory_space<vmem>>, vector<8x384xf32>
    %c-3_i32_173 = arith.constant -3 : i32
    %423 = vector.broadcast %c-3_i32_173 : i32 to vector<1x384xi32>
    %424 = arith.cmpi sge, %0, %423 : vector<1x384xi32>
    %c9_i32_174 = arith.constant 9 : i32
    %425 = vector.broadcast %c9_i32_174 : i32 to vector<1x384xi32>
    %426 = arith.cmpi slt, %0, %425 : vector<1x384xi32>
    %427 = arith.andi %424, %426 : vector<1x384xi1>
    %c0_i32_175 = arith.constant 0 : i32
    %428 = vector.broadcast %c0_i32_175 : i32 to vector<1x384xi32>
    %429 = arith.cmpi sge, %1, %428 : vector<1x384xi32>
    %430 = arith.andi %427, %429 : vector<1x384xi1>
    %c12_i32_176 = arith.constant 12 : i32
    %431 = vector.broadcast %c12_i32_176 : i32 to vector<1x384xi32>
    %432 = arith.cmpi slt, %1, %431 : vector<1x384xi32>
    %433 = arith.andi %430, %432 : vector<1x384xi1>
    %cst_177 = arith.constant 0.000000e+00 : f32
    %434 = vector.shape_cast %433 : vector<1x384xi1> to vector<1x384xi1>
    %435 = vector.broadcast %434 : vector<1x384xi1> to vector<8x384xi1>
    %436 = vector.broadcast %cst_177 : f32 to vector<8x384xf32>
    %437 = arith.select %435, %422, %436 : vector<8x384xi1>, vector<8x384xf32>
    %c0_178 = arith.constant 0 : index
    %c167_179 = arith.constant 167 : index
    %438 = vector.load %arg12[%c0_178, %c167_179] : memref<8x640xf32, #tpu.memory_space<vmem>>, vector<8x384xf32>
    %c-3_i32_180 = arith.constant -3 : i32
    %439 = vector.broadcast %c-3_i32_180 : i32 to vector<1x384xi32>
    %440 = arith.cmpi sge, %0, %439 : vector<1x384xi32>
    %c9_i32_181 = arith.constant 9 : i32
    %441 = vector.broadcast %c9_i32_181 : i32 to vector<1x384xi32>
    %442 = arith.cmpi slt, %0, %441 : vector<1x384xi32>
    %443 = arith.andi %440, %442 : vector<1x384xi1>
    %c-3_i32_182 = arith.constant -3 : i32
    %444 = vector.broadcast %c-3_i32_182 : i32 to vector<1x384xi32>
    %445 = arith.cmpi sge, %1, %444 : vector<1x384xi32>
    %446 = arith.andi %443, %445 : vector<1x384xi1>
    %c9_i32_183 = arith.constant 9 : i32
    %447 = vector.broadcast %c9_i32_183 : i32 to vector<1x384xi32>
    %448 = arith.cmpi slt, %1, %447 : vector<1x384xi32>
    %449 = arith.andi %446, %448 : vector<1x384xi1>
    %cst_184 = arith.constant 0.000000e+00 : f32
    %450 = vector.shape_cast %449 : vector<1x384xi1> to vector<1x384xi1>
    %451 = vector.broadcast %450 : vector<1x384xi1> to vector<8x384xi1>
    %452 = vector.broadcast %cst_184 : f32 to vector<8x384xf32>
    %453 = arith.select %451, %438, %452 : vector<8x384xi1>, vector<8x384xf32>
    %454 = tpu.concatenate %325, %341, %357, %373, %389, %405, %421, %437, %453 in 0 : vector<8x384xf32>, vector<8x384xf32>, vector<8x384xf32>, vector<8x384xf32>, vector<8x384xf32>, vector<8x384xf32>, vector<8x384xf32>, vector<8x384xf32>, vector<8x384xf32> -> vector<72x384xf32>
    %455 = arith.truncf %454 : vector<72x384xf32> to vector<72x384xbf16>
    %c0_185 = arith.constant 0 : index
    %c0_186 = arith.constant 0 : index
    %456 = vector.load %arg5[%c0_185, %c0_186] : memref<8x72xbf16, #tpu.memory_space<vmem>>, vector<8x72xbf16>
    %cst_187 = arith.constant dense<0.000000e+00> : vector<8x384xf32>
    %457 = tpu.matmul %456, %455, %cst_187 {dimension_numbers = #tpu.dot_dimension_numbers<[1], [0], [0], [1], [0, 0, 1, 1], [], []>} : vector<8x72xbf16>, vector<72x384xbf16>, vector<8x384xf32> -> vector<8x384xf32>
    %c0_188 = arith.constant 0 : index
    %c0_189 = arith.constant 0 : index
    %458 = vector.load %arg6[%c0_188, %c0_189] : memref<8x1xf32, #tpu.memory_space<vmem>>, vector<8x1xf32>
    %459 = vector.broadcast %458 : vector<8x1xf32> to vector<8x384xf32>
    %460 = arith.addf %457, %459 : vector<8x384xf32>
    %c0_190 = arith.constant 0 : index
    %c128_191 = arith.constant 128 : index
    %461 = vector.load %arg12[%c0_190, %c128_191] : memref<8x640xf32, #tpu.memory_space<vmem>>, vector<8x384xf32>
    tpu.vector_store %arg12[%c0_190, %c128_191], %460 {strides = array<i32>} : memref<8x640xf32, #tpu.memory_space<vmem>>, vector<8x384xf32>,
    %c0_192 = arith.constant 0 : index
    %c63 = arith.constant 63 : index
    %462 = vector.load %arg12[%c0_192, %c63] : memref<8x640xf32, #tpu.memory_space<vmem>>, vector<8x384xf32>
    %c5_i32 = arith.constant 5 : i32
    %463 = vector.broadcast %c5_i32 : i32 to vector<1x384xi32>
    %464 = arith.cmpi sge, %0, %463 : vector<1x384xi32>
    %c17_i32 = arith.constant 17 : i32
    %465 = vector.broadcast %c17_i32 : i32 to vector<1x384xi32>
    %466 = arith.cmpi slt, %0, %465 : vector<1x384xi32>
    %467 = arith.andi %464, %466 : vector<1x384xi1>
    %c5_i32_193 = arith.constant 5 : i32
    %468 = vector.broadcast %c5_i32_193 : i32 to vector<1x384xi32>
    %469 = arith.cmpi sge, %1, %468 : vector<1x384xi32>
    %470 = arith.andi %467, %469 : vector<1x384xi1>
    %c17_i32_194 = arith.constant 17 : i32
    %471 = vector.broadcast %c17_i32_194 : i32 to vector<1x384xi32>
    %472 = arith.cmpi slt, %1, %471 : vector<1x384xi32>
    %473 = arith.andi %470, %472 : vector<1x384xi1>
    %cst_195 = arith.constant 0.000000e+00 : f32
    %474 = vector.shape_cast %473 : vector<1x384xi1> to vector<1x384xi1>
    %475 = vector.broadcast %474 : vector<1x384xi1> to vector<8x384xi1>
    %476 = vector.broadcast %cst_195 : f32 to vector<8x384xf32>
    %477 = arith.select %475, %462, %476 : vector<8x384xi1>, vector<8x384xf32>
    %c0_196 = arith.constant 0 : index
    %c68 = arith.constant 68 : index
    %478 = vector.load %arg12[%c0_196, %c68] : memref<8x640xf32, #tpu.memory_space<vmem>>, vector<8x384xf32>
    %c5_i32_197 = arith.constant 5 : i32
    %479 = vector.broadcast %c5_i32_197 : i32 to vector<1x384xi32>
    %480 = arith.cmpi sge, %0, %479 : vector<1x384xi32>
    %c17_i32_198 = arith.constant 17 : i32
    %481 = vector.broadcast %c17_i32_198 : i32 to vector<1x384xi32>
    %482 = arith.cmpi slt, %0, %481 : vector<1x384xi32>
    %483 = arith.andi %480, %482 : vector<1x384xi1>
    %c0_i32_199 = arith.constant 0 : i32
    %484 = vector.broadcast %c0_i32_199 : i32 to vector<1x384xi32>
    %485 = arith.cmpi sge, %1, %484 : vector<1x384xi32>
    %486 = arith.andi %483, %485 : vector<1x384xi1>
    %c12_i32_200 = arith.constant 12 : i32
    %487 = vector.broadcast %c12_i32_200 : i32 to vector<1x384xi32>
    %488 = arith.cmpi slt, %1, %487 : vector<1x384xi32>
    %489 = arith.andi %486, %488 : vector<1x384xi1>
    %cst_201 = arith.constant 0.000000e+00 : f32
    %490 = vector.shape_cast %489 : vector<1x384xi1> to vector<1x384xi1>
    %491 = vector.broadcast %490 : vector<1x384xi1> to vector<8x384xi1>
    %492 = vector.broadcast %cst_201 : f32 to vector<8x384xf32>
    %493 = arith.select %491, %478, %492 : vector<8x384xi1>, vector<8x384xf32>
    %c0_202 = arith.constant 0 : index
    %c73 = arith.constant 73 : index
    %494 = vector.load %arg12[%c0_202, %c73] : memref<8x640xf32, #tpu.memory_space<vmem>>, vector<8x384xf32>
    %c5_i32_203 = arith.constant 5 : i32
    %495 = vector.broadcast %c5_i32_203 : i32 to vector<1x384xi32>
    %496 = arith.cmpi sge, %0, %495 : vector<1x384xi32>
    %c17_i32_204 = arith.constant 17 : i32
    %497 = vector.broadcast %c17_i32_204 : i32 to vector<1x384xi32>
    %498 = arith.cmpi slt, %0, %497 : vector<1x384xi32>
    %499 = arith.andi %496, %498 : vector<1x384xi1>
    %c-5_i32 = arith.constant -5 : i32
    %500 = vector.broadcast %c-5_i32 : i32 to vector<1x384xi32>
    %501 = arith.cmpi sge, %1, %500 : vector<1x384xi32>
    %502 = arith.andi %499, %501 : vector<1x384xi1>
    %c7_i32 = arith.constant 7 : i32
    %503 = vector.broadcast %c7_i32 : i32 to vector<1x384xi32>
    %504 = arith.cmpi slt, %1, %503 : vector<1x384xi32>
    %505 = arith.andi %502, %504 : vector<1x384xi1>
    %cst_205 = arith.constant 0.000000e+00 : f32
    %506 = vector.shape_cast %505 : vector<1x384xi1> to vector<1x384xi1>
    %507 = vector.broadcast %506 : vector<1x384xi1> to vector<8x384xi1>
    %508 = vector.broadcast %cst_205 : f32 to vector<8x384xf32>
    %509 = arith.select %507, %494, %508 : vector<8x384xi1>, vector<8x384xf32>
    %c0_206 = arith.constant 0 : index
    %c123 = arith.constant 123 : index
    %510 = vector.load %arg12[%c0_206, %c123] : memref<8x640xf32, #tpu.memory_space<vmem>>, vector<8x384xf32>
    %c0_i32_207 = arith.constant 0 : i32
    %511 = vector.broadcast %c0_i32_207 : i32 to vector<1x384xi32>
    %512 = arith.cmpi sge, %0, %511 : vector<1x384xi32>
    %c12_i32_208 = arith.constant 12 : i32
    %513 = vector.broadcast %c12_i32_208 : i32 to vector<1x384xi32>
    %514 = arith.cmpi slt, %0, %513 : vector<1x384xi32>
    %515 = arith.andi %512, %514 : vector<1x384xi1>
    %c5_i32_209 = arith.constant 5 : i32
    %516 = vector.broadcast %c5_i32_209 : i32 to vector<1x384xi32>
    %517 = arith.cmpi sge, %1, %516 : vector<1x384xi32>
    %518 = arith.andi %515, %517 : vector<1x384xi1>
    %c17_i32_210 = arith.constant 17 : i32
    %519 = vector.broadcast %c17_i32_210 : i32 to vector<1x384xi32>
    %520 = arith.cmpi slt, %1, %519 : vector<1x384xi32>
    %521 = arith.andi %518, %520 : vector<1x384xi1>
    %cst_211 = arith.constant 0.000000e+00 : f32
    %522 = vector.shape_cast %521 : vector<1x384xi1> to vector<1x384xi1>
    %523 = vector.broadcast %522 : vector<1x384xi1> to vector<8x384xi1>
    %524 = vector.broadcast %cst_211 : f32 to vector<8x384xf32>
    %525 = arith.select %523, %510, %524 : vector<8x384xi1>, vector<8x384xf32>
    %c0_212 = arith.constant 0 : index
    %c128_213 = arith.constant 128 : index
    %526 = vector.load %arg12[%c0_212, %c128_213] : memref<8x640xf32, #tpu.memory_space<vmem>>, vector<8x384xf32>
    %c0_i32_214 = arith.constant 0 : i32
    %527 = vector.broadcast %c0_i32_214 : i32 to vector<1x384xi32>
    %528 = arith.cmpi sge, %0, %527 : vector<1x384xi32>
    %c12_i32_215 = arith.constant 12 : i32
    %529 = vector.broadcast %c12_i32_215 : i32 to vector<1x384xi32>
    %530 = arith.cmpi slt, %0, %529 : vector<1x384xi32>
    %531 = arith.andi %528, %530 : vector<1x384xi1>
    %c0_i32_216 = arith.constant 0 : i32
    %532 = vector.broadcast %c0_i32_216 : i32 to vector<1x384xi32>
    %533 = arith.cmpi sge, %1, %532 : vector<1x384xi32>
    %534 = arith.andi %531, %533 : vector<1x384xi1>
    %c12_i32_217 = arith.constant 12 : i32
    %535 = vector.broadcast %c12_i32_217 : i32 to vector<1x384xi32>
    %536 = arith.cmpi slt, %1, %535 : vector<1x384xi32>
    %537 = arith.andi %534, %536 : vector<1x384xi1>
    %cst_218 = arith.constant 0.000000e+00 : f32
    %538 = vector.shape_cast %537 : vector<1x384xi1> to vector<1x384xi1>
    %539 = vector.broadcast %538 : vector<1x384xi1> to vector<8x384xi1>
    %540 = vector.broadcast %cst_218 : f32 to vector<8x384xf32>
    %541 = arith.select %539, %526, %540 : vector<8x384xi1>, vector<8x384xf32>
    %c0_219 = arith.constant 0 : index
    %c133 = arith.constant 133 : index
    %542 = vector.load %arg12[%c0_219, %c133] : memref<8x640xf32, #tpu.memory_space<vmem>>, vector<8x384xf32>
    %c0_i32_220 = arith.constant 0 : i32
    %543 = vector.broadcast %c0_i32_220 : i32 to vector<1x384xi32>
    %544 = arith.cmpi sge, %0, %543 : vector<1x384xi32>
    %c12_i32_221 = arith.constant 12 : i32
    %545 = vector.broadcast %c12_i32_221 : i32 to vector<1x384xi32>
    %546 = arith.cmpi slt, %0, %545 : vector<1x384xi32>
    %547 = arith.andi %544, %546 : vector<1x384xi1>
    %c-5_i32_222 = arith.constant -5 : i32
    %548 = vector.broadcast %c-5_i32_222 : i32 to vector<1x384xi32>
    %549 = arith.cmpi sge, %1, %548 : vector<1x384xi32>
    %550 = arith.andi %547, %549 : vector<1x384xi1>
    %c7_i32_223 = arith.constant 7 : i32
    %551 = vector.broadcast %c7_i32_223 : i32 to vector<1x384xi32>
    %552 = arith.cmpi slt, %1, %551 : vector<1x384xi32>
    %553 = arith.andi %550, %552 : vector<1x384xi1>
    %cst_224 = arith.constant 0.000000e+00 : f32
    %554 = vector.shape_cast %553 : vector<1x384xi1> to vector<1x384xi1>
    %555 = vector.broadcast %554 : vector<1x384xi1> to vector<8x384xi1>
    %556 = vector.broadcast %cst_224 : f32 to vector<8x384xf32>
    %557 = arith.select %555, %542, %556 : vector<8x384xi1>, vector<8x384xf32>
    %c0_225 = arith.constant 0 : index
    %c183 = arith.constant 183 : index
    %558 = vector.load %arg12[%c0_225, %c183] : memref<8x640xf32, #tpu.memory_space<vmem>>, vector<8x384xf32>
    %c-5_i32_226 = arith.constant -5 : i32
    %559 = vector.broadcast %c-5_i32_226 : i32 to vector<1x384xi32>
    %560 = arith.cmpi sge, %0, %559 : vector<1x384xi32>
    %c7_i32_227 = arith.constant 7 : i32
    %561 = vector.broadcast %c7_i32_227 : i32 to vector<1x384xi32>
    %562 = arith.cmpi slt, %0, %561 : vector<1x384xi32>
    %563 = arith.andi %560, %562 : vector<1x384xi1>
    %c5_i32_228 = arith.constant 5 : i32
    %564 = vector.broadcast %c5_i32_228 : i32 to vector<1x384xi32>
    %565 = arith.cmpi sge, %1, %564 : vector<1x384xi32>
    %566 = arith.andi %563, %565 : vector<1x384xi1>
    %c17_i32_229 = arith.constant 17 : i32
    %567 = vector.broadcast %c17_i32_229 : i32 to vector<1x384xi32>
    %568 = arith.cmpi slt, %1, %567 : vector<1x384xi32>
    %569 = arith.andi %566, %568 : vector<1x384xi1>
    %cst_230 = arith.constant 0.000000e+00 : f32
    %570 = vector.shape_cast %569 : vector<1x384xi1> to vector<1x384xi1>
    %571 = vector.broadcast %570 : vector<1x384xi1> to vector<8x384xi1>
    %572 = vector.broadcast %cst_230 : f32 to vector<8x384xf32>
    %573 = arith.select %571, %558, %572 : vector<8x384xi1>, vector<8x384xf32>
    %c0_231 = arith.constant 0 : index
    %c188 = arith.constant 188 : index
    %574 = vector.load %arg12[%c0_231, %c188] : memref<8x640xf32, #tpu.memory_space<vmem>>, vector<8x384xf32>
    %c-5_i32_232 = arith.constant -5 : i32
    %575 = vector.broadcast %c-5_i32_232 : i32 to vector<1x384xi32>
    %576 = arith.cmpi sge, %0, %575 : vector<1x384xi32>
    %c7_i32_233 = arith.constant 7 : i32
    %577 = vector.broadcast %c7_i32_233 : i32 to vector<1x384xi32>
    %578 = arith.cmpi slt, %0, %577 : vector<1x384xi32>
    %579 = arith.andi %576, %578 : vector<1x384xi1>
    %c0_i32_234 = arith.constant 0 : i32
    %580 = vector.broadcast %c0_i32_234 : i32 to vector<1x384xi32>
    %581 = arith.cmpi sge, %1, %580 : vector<1x384xi32>
    %582 = arith.andi %579, %581 : vector<1x384xi1>
    %c12_i32_235 = arith.constant 12 : i32
    %583 = vector.broadcast %c12_i32_235 : i32 to vector<1x384xi32>
    %584 = arith.cmpi slt, %1, %583 : vector<1x384xi32>
    %585 = arith.andi %582, %584 : vector<1x384xi1>
    %cst_236 = arith.constant 0.000000e+00 : f32
    %586 = vector.shape_cast %585 : vector<1x384xi1> to vector<1x384xi1>
    %587 = vector.broadcast %586 : vector<1x384xi1> to vector<8x384xi1>
    %588 = vector.broadcast %cst_236 : f32 to vector<8x384xf32>
    %589 = arith.select %587, %574, %588 : vector<8x384xi1>, vector<8x384xf32>
    %c0_237 = arith.constant 0 : index
    %c193 = arith.constant 193 : index
    %590 = vector.load %arg12[%c0_237, %c193] : memref<8x640xf32, #tpu.memory_space<vmem>>, vector<8x384xf32>
    %c-5_i32_238 = arith.constant -5 : i32
    %591 = vector.broadcast %c-5_i32_238 : i32 to vector<1x384xi32>
    %592 = arith.cmpi sge, %0, %591 : vector<1x384xi32>
    %c7_i32_239 = arith.constant 7 : i32
    %593 = vector.broadcast %c7_i32_239 : i32 to vector<1x384xi32>
    %594 = arith.cmpi slt, %0, %593 : vector<1x384xi32>
    %595 = arith.andi %592, %594 : vector<1x384xi1>
    %c-5_i32_240 = arith.constant -5 : i32
    %596 = vector.broadcast %c-5_i32_240 : i32 to vector<1x384xi32>
    %597 = arith.cmpi sge, %1, %596 : vector<1x384xi32>
    %598 = arith.andi %595, %597 : vector<1x384xi1>
    %c7_i32_241 = arith.constant 7 : i32
    %599 = vector.broadcast %c7_i32_241 : i32 to vector<1x384xi32>
    %600 = arith.cmpi slt, %1, %599 : vector<1x384xi32>
    %601 = arith.andi %598, %600 : vector<1x384xi1>
    %cst_242 = arith.constant 0.000000e+00 : f32
    %602 = vector.shape_cast %601 : vector<1x384xi1> to vector<1x384xi1>
    %603 = vector.broadcast %602 : vector<1x384xi1> to vector<8x384xi1>
    %604 = vector.broadcast %cst_242 : f32 to vector<8x384xf32>
    %605 = arith.select %603, %590, %604 : vector<8x384xi1>, vector<8x384xf32>
    %606 = tpu.concatenate %477, %493, %509, %525, %541, %557, %573, %589, %605 in 0 : vector<8x384xf32>, vector<8x384xf32>, vector<8x384xf32>, vector<8x384xf32>, vector<8x384xf32>, vector<8x384xf32>, vector<8x384xf32>, vector<8x384xf32>, vector<8x384xf32> -> vector<72x384xf32>
    %607 = arith.truncf %606 : vector<72x384xf32> to vector<72x384xbf16>
    %c0_243 = arith.constant 0 : index
    %c0_244 = arith.constant 0 : index
    %608 = vector.load %arg7[%c0_243, %c0_244] : memref<8x72xbf16, #tpu.memory_space<vmem>>, vector<8x72xbf16>
    %cst_245 = arith.constant dense<0.000000e+00> : vector<8x384xf32>
    %609 = tpu.matmul %608, %607, %cst_245 {dimension_numbers = #tpu.dot_dimension_numbers<[1], [0], [0], [1], [0, 0, 1, 1], [], []>} : vector<8x72xbf16>, vector<72x384xbf16>, vector<8x384xf32> -> vector<8x384xf32>
    %c0_246 = arith.constant 0 : index
    %c0_247 = arith.constant 0 : index
    %610 = vector.load %arg8[%c0_246, %c0_247] : memref<8x1xf32, #tpu.memory_space<vmem>>, vector<8x1xf32>
    %611 = vector.broadcast %610 : vector<8x1xf32> to vector<8x384xf32>
    %612 = arith.addf %609, %611 : vector<8x384xf32>
    %c0_248 = arith.constant 0 : index
    %c0_249 = arith.constant 0 : index
    %613 = vector.load %arg9[%c0_248, %c0_249] : memref<8x8xbf16, #tpu.memory_space<vmem>>, vector<8x8xbf16>
    %c0_250 = arith.constant 0 : index
    %c0_251 = arith.constant 0 : index
    %614 = vector.load %arg10[%c0_250, %c0_251] : memref<8x1xf32, #tpu.memory_space<vmem>>, vector<8x1xf32>
    %cst_252 = arith.constant 0.000000e+00 : f32
    %615 = vector.broadcast %cst_252 : f32 to vector<8x384xf32>
    %616 = arith.maximumf %156, %615 : vector<8x384xf32>
    %617 = arith.truncf %308 : vector<8x384xf32> to vector<8x384xbf16>
    %cst_253 = arith.constant dense<0.000000e+00> : vector<8x384xf32>
    %618 = tpu.matmul %613, %617, %cst_253 {dimension_numbers = #tpu.dot_dimension_numbers<[1], [0], [0], [1], [0, 0, 1, 1], [], []>} : vector<8x8xbf16>, vector<8x384xbf16>, vector<8x384xf32> -> vector<8x384xf32>
    %619 = vector.broadcast %614 : vector<8x1xf32> to vector<8x384xf32>
    %620 = arith.addf %618, %619 : vector<8x384xf32>
    %cst_254 = arith.constant 0.000000e+00 : f32
    %621 = vector.broadcast %cst_254 : f32 to vector<8x384xf32>
    %622 = arith.maximumf %620, %621 : vector<8x384xf32>
    %623 = arith.addf %616, %622 : vector<8x384xf32>
    %624 = arith.truncf %460 : vector<8x384xf32> to vector<8x384xbf16>
    %cst_255 = arith.constant dense<0.000000e+00> : vector<8x384xf32>
    %625 = tpu.matmul %613, %624, %cst_255 {dimension_numbers = #tpu.dot_dimension_numbers<[1], [0], [0], [1], [0, 0, 1, 1], [], []>} : vector<8x8xbf16>, vector<8x384xbf16>, vector<8x384xf32> -> vector<8x384xf32>
    %626 = vector.broadcast %614 : vector<8x1xf32> to vector<8x384xf32>
    %627 = arith.addf %625, %626 : vector<8x384xf32>
    %cst_256 = arith.constant 0.000000e+00 : f32
    %628 = vector.broadcast %cst_256 : f32 to vector<8x384xf32>
    %629 = arith.maximumf %627, %628 : vector<8x384xf32>
    %630 = arith.addf %623, %629 : vector<8x384xf32>
    %631 = arith.truncf %612 : vector<8x384xf32> to vector<8x384xbf16>
    %cst_257 = arith.constant dense<0.000000e+00> : vector<8x384xf32>
    %632 = tpu.matmul %613, %631, %cst_257 {dimension_numbers = #tpu.dot_dimension_numbers<[1], [0], [0], [1], [0, 0, 1, 1], [], []>} : vector<8x8xbf16>, vector<8x384xbf16>, vector<8x384xf32> -> vector<8x384xf32>
    %633 = vector.broadcast %614 : vector<8x1xf32> to vector<8x384xf32>
    %634 = arith.addf %632, %633 : vector<8x384xf32>
    %cst_258 = arith.constant 0.000000e+00 : f32
    %635 = vector.broadcast %cst_258 : f32 to vector<8x384xf32>
    %636 = arith.maximumf %634, %635 : vector<8x384xf32>
    %637 = arith.addf %630, %636 : vector<8x384xf32>
    %c0_259 = arith.constant 0 : index
    %c0_260 = arith.constant 0 : index
    %638 = vector.load %arg11[%c0_259, %c0_260] : memref<8x384xf32, #tpu.memory_space<vmem>>, vector<8x384xf32>
    tpu.vector_store %arg11[%c0_259, %c0_260], %637 {strides = array<i32>} : memref<8x384xf32, #tpu.memory_space<vmem>>, vector<8x384xf32>,
    return
  }
}

</mosaic_0001>

<bundles_post_ra>
// kernel: nonlocal_spp_inception_block.4
= control target key start
LH: loop header
LB: loop body
LE: loop exit
PB: predicated region body
PF: predicated region fallthrough
CT: control target
= control target key end

     0   :  { %v156_v3 = vmov 0   ;;  %vm39_vm0 = vcmask 130048   ;;  %s246_s0 = inlined_call_operand.vmem [shape: f32[16,384], index: 0, kind: input, shape index: {}]   ;;  %s247_s1 = inlined_call_operand.vmem [shape: bf16[8,16], index: 1, kind: input, shape index: {}]   ;;  %s248_s3 = inlined_call_operand.vmem [shape: bf16[8,16], index: 3, kind: input, shape index: {}]   ;;  %s249_s4 = inlined_call_operand.vmem [shape: f32[8,1], index: 4, kind: input, shape index: {}]   ;;  %s250_s2 = inlined_call_operand.vmem [shape: f32[8,1], index: 2, kind: input, shape index: {}]   ;;  %s251_s5 = inlined_call_operand.vmem [shape: f32[8,384], index: 5, kind: output, shape index: {0}]   ;;  %s252_s6 = inlined_call_operand.vmem [shape: f32[8,384], index: 6, kind: output, shape index: {1}]  }
   0x1   :  { %v23_v0 = vld [vmem:[%s246_s0] sm:$0xff]  ;;  %v26_v1 = vld [vmem:[%s246_s0 + $0x18] sm:$0xff]  ;;  %v24_v2 = vld [vmem:[%s246_s0 + $0x8] sm:$0xff]  ;;  %155 = vset.pattern.permute.xlu0 %v156_v3 }
   0x2   :  { %v29_v4 = vpack.c.bf16 %v26_v1, %v23_v0  ;;  %v27_v5 = vld [vmem:[%s246_s0 + $0x20] sm:$0xff]  ;;  %v25_v6 = vld [vmem:[%s246_s0 + $0x10] sm:$0xff]  ;;  %v28_v7 = vld [vmem:[%s246_s0 + $0x28] sm:$0xff] }
   0x3   :  { %v30_v8 = vpack.c.bf16 %v27_v5, %v24_v2  ;;  %v31_v9 = vpack.c.bf16 %v28_v7, %v25_v6  ;;  %v32_v10 = vld [vmem:[%s247_s1] sm:$0xf] }
   0x4   :  { %50 = vmatpush.bf16.msra.mxu0 %v29_v4  ;;  %99 = vmatpush.bf16.msra.mxu3 %v29_v4  ;;  %v82_v11 = vld [vmem:[%s248_s3] sm:$0xf] }
   0x5   :  { %63 = vmatpush.bf16.msra.mxu1 %v30_v8  ;;  %76 = vmatpush.bf16.msra.mxu2 %v31_v9  ;;  %v83_v12 = vld [vmem:[%s249_s4] sm:$0xff] }
   0x6   :  { %86 = vperm.xlu0 %155, %v83_v12   ;;  %v33_v13 = vld [vmem:[%s250_s2] sm:$0xff] }
   0x7   :  { %148 = vmatmul.msk.bf16.vlgmr.msra.gmra.mxu0 %vm39_vm0, %v32_v10  ;;  %151 = vmatmul.msk.bf16.vlgmr.msra.gmra.mxu3 %vm39_vm0, %v82_v11 }
   0x8   :  { %112 = vmatpush.bf16.msrb.mxu0 %v30_v8  ;;  %149 = vmatmul.msk.bf16.vlgmr.msra.gmra.mxu1 %vm39_vm0, %v32_v10 }
   0x9   :  { %125 = vmatpush.bf16.msrb.mxu1 %v31_v9  ;;  %150 = vmatmul.msk.bf16.vlgmr.msra.gmra.mxu2 %vm39_vm0, %v32_v10 }
   0xe   :  { %36 = vperm.xlu0 %155, %v33_v13  }
  0x17   :  { %152 = vmatmul.msk.bf16.vlgmr.msrb.gmra.mxu0 %vm39_vm0, %v82_v11 }
  0x18   :  { %153 = vmatmul.msk.bf16.vlgmr.msrb.gmra.mxu1 %vm39_vm0, %v82_v11 }
  0x78   :  { %v87_v14 = vpop.permute.xlu0 %86 }
  0x80   :  { %v37_v15 = vpop.permute.xlu0 %36 }
  0x84   :  { %v52_v16 = vpop.f32.mrf.mxu0 }
  0x85   :  { %v53_v17 = vadd.f32 %v52_v16, %v37_v15  ;;  %v65_v18 = vpop.f32.mrf.mxu1 }
  0x86   :  { %v66_v19 = vadd.f32 %v65_v18, %v37_v15 }
  0x87   :  { %131 = vst [vmem:[%s251_s5] sm:$0xff] %v53_v17 }
  0x88   :  { %132 = vst [vmem:[%s251_s5 + $0x8] sm:$0xff] %v66_v19 }
  0x8a   :  { %v101_v20 = vpop.f32.mrf.mxu3 }
  0x8b   :  { %v102_v22 = vadd.f32 %v101_v20, %v87_v14 }
  0x8c   :  { %v78_v21 = vpop.f32.mrf.mxu2  ;;  %v54_v23 = vpop.f32.mrf.mxu0 }
  0x8d   :  { %v79_v24 = vadd.f32 %v78_v21, %v37_v15  ;;  %v67_v25 = vpop.f32.mrf.mxu1  ;;  %v134_v26 = vmax.f32 %v102_v22, 0.0 }
  0x8f   :  { %133 = vst [vmem:[%s251_s5 + $0x10] sm:$0xff] %v79_v24 }
  0x90   :  { %137 = vst [vmem:[%s252_s6] sm:$0xff] %v134_v26 }
  0x92   :  { %v103_v27 = vpop.f32.mrf.mxu3 }
  0x94   :  { %v80_v28 = vpop.f32.mrf.mxu2  ;;  %v114_v29 = vpop.f32.mrf.mxu0 }
  0x95   :  { %v115_v30 = vadd.f32 %v114_v29, %v87_v14  ;;  %v127_v31 = vpop.f32.mrf.mxu1 }
  0x96   :  { %v128_v32 = vadd.f32 %v127_v31, %v87_v14 }
  0x97   :  { %v135_v33 = vmax.f32 %v115_v30, 0.0 }
  0x98   :  { %v136_v34 = vmax.f32 %v128_v32, 0.0 }
  0x99   :  { %138 = vst [vmem:[%s252_s6 + $0x8] sm:$0xff] %v135_v33 }
  0x9a   :  { %139 = vst [vmem:[%s252_s6 + $0x10] sm:$0xff] %v136_v34 }
  0x9c   :  { %v116_v35 = vpop.f32.mrf.mxu0 }
  0x9d   :  { %v129_v36 = vpop.f32.mrf.mxu1 }

// kernel: nonlocal_spp_inception_block.7
= control target key start
LH: loop header
LB: loop body
LE: loop exit
PB: predicated region body
PF: predicated region fallthrough
CT: control target
= control target key end

     0   :  { %vm89_vm0 = vcmask 1043456   ;;  %vm61_vm1 = vcmask 64512   ;;  %vm240_vm2 = vcmask 621568   ;;  %s1841_s26 = smov 112   ;;  %vm810_vm3 = vcmask 916480   ;;  %s2728_s0 = inlined_call_operand.vmem [shape: f32[8,384], index: 0, kind: input, shape index: {}]   ;;  %s2729_s1 = inlined_call_operand.vmem [shape: f32[2,8,204], index: 1, kind: input, shape index: {}]   ;;  %s2730_s2 = inlined_call_operand.vmem [shape: f32[2,8,204], index: 2, kind: input, shape index: {}]   ;;  %s2731_s3 = inlined_call_operand.vmem [shape: bf16[16,8], index: 3, kind: input, shape index: {}]   ;;  %s2732_s4 = inlined_call_operand.vmem [shape: f32[16,1], index: 4, kind: input, shape index: {}]   ;;  %s2733_s5 = inlined_call_operand.vmem [shape: f32[2,16,144], index: 5, kind: output, shape index: {}]  }
   0x1   :  { %v25_v0 = vld [vmem:[%s2728_s0] sm:$0xff]  ;;  %v26_v1 = vld [vmem:[%s2728_s0 + $0x8] sm:$0xff]  ;;  %vm786_vm4 = vcmask 130048  }
   0x2   :  { %v29_v2 = vld [vmem:[%s2729_s1] sm:$0xff]  ;;  %v27_v3 = vpack.c.bf16 %v25_v0, %v25_v0  ;;  %v1882_v4 = vpack.c.bf16 %v26_v1, %v26_v1  ;;  %v30_v6 = vld [vmem:[%s2729_s1 + $0x8] sm:$0xff] }
   0x3   :  { %v31_v5 = vpack.c.bf16 %v29_v2, %v29_v2  ;;  %v32_v7 = vpack.c.bf16 %v30_v6, %v30_v6 }
   0x4   :  { %37 = vxpose.binary.xlu0.c.b16.start.end [1/2] (short) %v1882_v4, %v27_v3, 128 }
   0x5   :  { %v91_v8 = vsel %vm89_vm0, %v31_v5, 0  ;;  %v94_v9 = vsel %vm89_vm0, %v32_v7, 0 }
   0x6   :  { %103 = vmatpush.bf16.msra.mxu0 %v91_v8  ;;  %157 = vmatpush.bf16.msra.mxu1 %v94_v9 }
  0xb0   :  { %v45_v10 = vpop.trf.xlu0 }
  0xb1   :  { %1550 = vmatmul.msk.bf16.vlgmr.msra.gmra.mxu0 %vm61_vm1, %v45_v10  ;;  %1559 = vmatmul.msk.bf16.vlgmr.msra.gmra.mxu1 %vm61_vm1, %v45_v10 }
  0xb8   :  { %v46_v11 = vpop.trf.xlu0 }
  0xc0   :  { %v47_v12 = vpop.trf.xlu0 }
  0xc1   :  { %1551 = vmatmul.msk.bf16.gmra.mxu0 %vm61_vm1, %v47_v12  ;;  %1560 = vmatmul.msk.bf16.gmra.mxu1 %vm61_vm1, %v47_v12 }
  0xc8   :  { %v48_v13 = vpop.trf.xlu0 }
  0xd0   :  { %v49_v14 = vpop.trf.xlu0 }
  0xd1   :  { %1552 = vmatmul.msk.bf16.gmra.mxu0 %vm61_vm1, %v49_v14  ;;  %1561 = vmatmul.msk.bf16.gmra.mxu1 %vm61_vm1, %v49_v14 }
  0xd8   :  { %v50_v15 = vpop.trf.xlu0 }
  0xe0   :  { %v51_v16 = vpop.trf.xlu0 }
  0xe1   :  { %1553 = vmatmul.msk.bf16.gmra.mxu0 %vm61_vm1, %v51_v16  ;;  %1562 = vmatmul.msk.bf16.gmra.mxu1 %vm61_vm1, %v51_v16 }
  0xe8   :  { %v52_v17 = vpop.trf.xlu0 }
  0xf0   :  { %v53_v18 = vpop.trf.xlu0 }
  0xf1   :  { %1554 = vmatmul.msk.bf16.gmra.mxu0 %vm61_vm1, %v53_v18  ;;  %1563 = vmatmul.msk.bf16.gmra.mxu1 %vm61_vm1, %v53_v18 }
  0xf8   :  { %v54_v19 = vpop.trf.xlu0 }
 0x100   :  { %v55_v20 = vpop.trf.xlu0 }
 0x101   :  { %1555 = vmatmul.msk.bf16.gmra.mxu0 %vm61_vm1, %v55_v20  ;;  %1564 = vmatmul.msk.bf16.gmra.mxu1 %vm61_vm1, %v55_v20 }
 0x108   :  { %v56_v21 = vpop.trf.xlu0 }
 0x110   :  { %v57_v22 = vpop.trf.xlu0 }
 0x111   :  { %1556 = vmatmul.msk.bf16.gmra.mxu0 %vm61_vm1, %v57_v22  ;;  %1565 = vmatmul.msk.bf16.gmra.mxu1 %vm61_vm1, %v57_v22 }
 0x118   :  { %v58_v23 = vpop.trf.xlu0 }
 0x120   :  { %v59_v24 = vpop.trf.xlu0 }
 0x121   :  { %1557 = vmatmul.msk.bf16.gmra.mxu0 %vm61_vm1, %v59_v24  ;;  %1566 = vmatmul.msk.bf16.gmra.mxu1 %vm61_vm1, %v59_v24 }
 0x128   :  { %v60_v25 = vpop.trf.xlu0 }
 0x12e   :  { %v105_v26 = vpop.f32.mrf.mxu0  ;;  %v159_v27 = vpop.f32.mrf.mxu1 }
 0x12f   :  { %v1906_v28 = vmul.f32 0.35355338, %v105_v26  ;;  %v1908_v29 = vmul.f32 0.35355338, %v159_v27 }
 0x131   :  { %1558 = vmatmul.msk.bf16.gmra.mxu0 %vm61_vm1, %v46_v11  ;;  %1567 = vmatmul.msk.bf16.gmra.mxu1 %vm61_vm1, %v46_v11  ;;  %v241_v30 = vsel %vm240_vm2, %v1908_v29, -inf }
 0x132   :  { %v242_v31 = vmax.f32 %v1906_v28, %v241_v30 }
 0x134   :  { %243 = vmax.xlane.f32.xlu0 %v242_v31 }
 0x136   :  { %v107_v32 = vpop.f32.mrf.mxu0  ;;  %v161_v33 = vpop.f32.mrf.mxu1 }
 0x137   :  { %v1915_v34 = vmul.f32 0.35355338, %v107_v32  ;;  %v1917_v35 = vmul.f32 0.35355338, %v161_v33 }
 0x139   :  { %v245_v36 = vsel %vm240_vm2, %v1917_v35, -inf }
 0x13a   :  { %v246_v37 = vmax.f32 %v1915_v34, %v245_v36 }
 0x13c   :  { %247 = vmax.xlane.f32.xlu1 %v246_v37 }
 0x13e   :  { %v110_v38 = vpop.f32.mrf.mxu0  ;;  %v164_v39 = vpop.f32.mrf.mxu1 }
 0x13f   :  { %v1922_v40 = vmul.f32 0.35355338, %v110_v38  ;;  %v1924_v41 = vmul.f32 0.35355338, %v164_v39 }
 0x141   :  { %v249_v42 = vsel %vm240_vm2, %v1924_v41, -inf }
 0x142   :  { %v250_v43 = vmax.f32 %v1922_v40, %v249_v42 }
 0x144   :  { %251 = vmax.xlane.f32.xlu1 %v250_v43 }
 0x146   :  { %v112_v44 = vpop.f32.mrf.mxu0  ;;  %v166_v45 = vpop.f32.mrf.mxu1 }
 0x147   :  { %v1929_v46 = vmul.f32 0.35355338, %v112_v44  ;;  %v1931_v47 = vmul.f32 0.35355338, %v166_v45 }
 0x149   :  { %v253_v48 = vsel %vm240_vm2, %v1931_v47, -inf }
 0x14a   :  { %v254_v49 = vmax.f32 %v1929_v46, %v253_v48 }
 0x14c   :  { %255 = vmax.xlane.f32.xlu2 %v254_v49 }
 0x14e   :  { %v115_v50 = vpop.f32.mrf.mxu0  ;;  %v169_v51 = vpop.f32.mrf.mxu1 }
 0x14f   :  { %v1936_v52 = vmul.f32 0.35355338, %v115_v50  ;;  %v1938_v53 = vmul.f32 0.35355338, %v169_v51 }
 0x151   :  { %v257_v54 = vsel %vm240_vm2, %v1938_v53, -inf }
 0x152   :  { %v258_v55 = vmax.f32 %v1936_v52, %v257_v54 }
 0x154   :  { %259 = vmax.xlane.f32.xlu2 %v258_v55 }
 0x156   :  { %v117_v56 = vpop.f32.mrf.mxu0  ;;  %v171_v57 = vpop.f32.mrf.mxu1 }
 0x157   :  { %v1943_v58 = vmul.f32 0.35355338, %v117_v56  ;;  %v1945_v59 = vmul.f32 0.35355338, %v171_v57 }
 0x159   :  { %v261_v60 = vsel %vm240_vm2, %v1945_v59, -inf }
 0x15a   :  { %v262_v61 = vmax.f32 %v1943_v58, %v261_v60 }
 0x15c   :  { %263 = vmax.xlane.f32.xlu1 %v262_v61 }
 0x15e   :  { %v120_v62 = vpop.f32.mrf.mxu0  ;;  %v174_v63 = vpop.f32.mrf.mxu1 }
 0x15f   :  { %v1950_v0 = vmul.f32 0.35355338, %v120_v62  ;;  %v1952_v1 = vmul.f32 0.35355338, %v174_v63 }
 0x161   :  { %v265_v2 = vsel %vm240_vm2, %v1952_v1, -inf }
 0x162   :  { %v266_v3 = vmax.f32 %v1950_v0, %v265_v2 }
 0x164   :  { %267 = vmax.xlane.f32.xlu2 %v266_v3 }
 0x166   :  { %v122_v5 = vpop.f32.mrf.mxu0  ;;  %v176_v6 = vpop.f32.mrf.mxu1 }
 0x167   :  { %v1957_v7 = vmul.f32 0.35355338, %v122_v5  ;;  %v1959_v8 = vmul.f32 0.35355338, %v176_v6 }
 0x169   :  { %v269_v9 = vsel %vm240_vm2, %v1959_v8, -inf }
 0x16a   :  { %v270_v10 = vmax.f32 %v1957_v7, %v269_v9 }
 0x16c   :  { %271 = vmax.xlane.f32.xlu1 %v270_v10 }
 0x16e   :  { %v125_v11 = vpop.f32.mrf.mxu0  ;;  %v179_v12 = vpop.f32.mrf.mxu1 }
 0x16f   :  { %v1964_v13 = vmul.f32 0.35355338, %v125_v11  ;;  %v1966_v14 = vmul.f32 0.35355338, %v179_v12 }
 0x171   :  { %v273_v15 = vsel %vm240_vm2, %v1966_v14, -inf }
 0x172   :  { %v274_v16 = vmax.f32 %v1964_v13, %v273_v15 }
 0x174   :  { %275 = vmax.xlane.f32.xlu2 %v274_v16 }
 0x176   :  { %v127_v17 = vpop.f32.mrf.mxu0  ;;  %v181_v18 = vpop.f32.mrf.mxu1 }
 0x177   :  { %v1971_v19 = vmul.f32 0.35355338, %v127_v17  ;;  %v1973_v20 = vmul.f32 0.35355338, %v181_v18 }
 0x179   :  { %v277_v21 = vsel %vm240_vm2, %v1973_v20, -inf }
 0x17a   :  { %v278_v22 = vmax.f32 %v1971_v19, %v277_v21 }
 0x17c   :  { %279 = vmax.xlane.f32.xlu1 %v278_v22 }
 0x17e   :  { %v130_v23 = vpop.f32.mrf.mxu0  ;;  %v184_v24 = vpop.f32.mrf.mxu1 }
 0x17f   :  { %v1978_v25 = vmul.f32 0.35355338, %v130_v23  ;;  %v1980_v26 = vmul.f32 0.35355338, %v184_v24 }
 0x181   :  { %v281_v27 = vsel %vm240_vm2, %v1980_v26, -inf }
 0x182   :  { %v282_v30 = vmax.f32 %v1978_v25, %v281_v27 }
 0x184   :  { %283 = vmax.xlane.f32.xlu2 %v282_v30 }
 0x186   :  { %v186_v31 = vpop.f32.mrf.mxu1  ;;  %v132_v32 = vpop.f32.mrf.mxu0 }
 0x187   :  { %v2012_v10 = vmul.f32 0.35355338, %v186_v31  ;;  %v2016_v16 = vmul.f32 0.35355338, %v132_v32 }
 0x189   :  { %v285_v23 = vsel %vm240_vm2, %v2012_v10, -inf }
 0x18e   :  { %v189_v42 = vpop.f32.mrf.mxu1  ;;  %v135_v43 = vpop.f32.mrf.mxu0 }
 0x18f   :  { %v1998_v57 = vmul.f32 0.35355338, %v135_v43 }
 0x196   :  { %v191_v55 = vpop.f32.mrf.mxu1 }
 0x1a7   :  { %v244_v33 = vpop.xlane.xlu0 %243 }
 0x1a8   :  { %v313_v36 = vsub.f32 %v1906_v28, %v244_v33  ;;  %v314_v37 = vsub.f32 %v1908_v29, %v244_v33  ;;  %v1993_v28 = vmul.f32 0.35355338, %v189_v42 }
 0x1aa   :  { %v349_v38 = vmul.f32 1.442695, %v313_v36  ;;  %v351_v39 = vmul.f32 1.442695, %v314_v37  ;;  %v289_v62 = vsel %vm240_vm2, %v1993_v28, -inf }
 0x1ab   :  { %v290_v6 = vmax.f32 %v1998_v57, %v289_v62 }
 0x1ac   :  { %1625 = vpow2.f32 %v349_v38 }
 0x1ad   :  { %1627 = vpow2.f32 %v351_v39 }
 0x1af   :  { %v248_v44 = vpop.xlane.xlu1 %247 }
 0x1b0   :  { %v315_v45 = vsub.f32 %v1915_v34, %v248_v44  ;;  %v316_v48 = vsub.f32 %v1917_v35, %v248_v44  ;;  %v137_v35 = vpop.f32.mrf.mxu0 }
 0x1b2   :  { %v1989_v49 = vpop.eup %1625  ;;  %v353_v50 = vmul.f32 1.442695, %v315_v45  ;;  %v355_v51 = vmul.f32 1.442695, %v316_v48 }
 0x1b3   :  { %v1991_v54 = vpop.eup %1627 }
 0x1b4   :  { %1629 = vpow2.f32 %v353_v50  ;;  %v421_v29 = vsel %vm240_vm2, %v1991_v54, 0.0 }
 0x1b5   :  { %1631 = vpow2.f32 %v355_v51  ;;  %v422_v56 = vadd.f32 %v1989_v49, %v421_v29 }
 0x1b7   :  { %423 = vadd.xlane.f32.xlu2 %v422_v56  ;;  %v252_v34 = vpop.xlane.xlu1 %251 }
 0x1b8   :  { %v317_v60 = vsub.f32 %v1922_v40, %v252_v34  ;;  %v318_v61 = vsub.f32 %v1924_v41, %v252_v34  ;;  %v194_v41 = vpop.f32.mrf.mxu1  ;;  %v140_v18 = vpop.f32.mrf.mxu0  ;;  %v2048_v34 = vmul.f32 0.35355338, %v137_v35 }
 0x1b9   :  { %v2024_v27 = vmul.f32 0.35355338, %v194_v41  ;;  %v2030_v31 = vmul.f32 0.35355338, %v140_v18 }
 0x1ba   :  { %v2004_v63 = vpop.eup %1629  ;;  %v357_v2 = vmul.f32 1.442695, %v317_v60  ;;  %v359_v3 = vmul.f32 1.442695, %v318_v61 }
 0x1bb   :  { %v2006_v5 = vpop.eup %1631  ;;  %v297_v37 = vsel %vm240_vm2, %v2024_v27, -inf }
 0x1bc   :  { %1633 = vpow2.f32 %v357_v2  ;;  %v425_v9 = vsel %vm240_vm2, %v2006_v5, 0.0  ;;  %v298_v45 = vmax.f32 %v2030_v31, %v297_v37 }
 0x1bd   :  { %1635 = vpow2.f32 %v359_v3  ;;  %v426_v40 = vadd.f32 %v2004_v63, %v425_v9 }
 0x1bf   :  { %427 = vadd.xlane.f32.xlu1 %v426_v40  ;;  %291 = vmax.xlane.f32.xlu2 %v290_v6  ;;  %v256_v11 = vpop.xlane.xlu2 %255 }
 0x1c0   :  { %v319_v12 = vsub.f32 %v1929_v46, %v256_v11  ;;  %v320_v15 = vsub.f32 %v1931_v47, %v256_v11  ;;  %v286_v47 = vmax.f32 %v2016_v16, %v285_v23  ;;  %v196_v38 = vpop.f32.mrf.mxu1  ;;  %v142_v48 = vpop.f32.mrf.mxu0 }
 0x1c2   :  { %v2018_v17 = vpop.eup %1633  ;;  %v361_v21 = vmul.f32 1.442695, %v319_v12  ;;  %v363_v22 = vmul.f32 1.442695, %v320_v15 }
 0x1c3   :  { %v2022_v24 = vpop.eup %1635 }
 0x1c4   :  { %1637 = vpow2.f32 %v361_v21  ;;  %v429_v46 = vsel %vm240_vm2, %v2022_v24, 0.0 }
 0x1c5   :  { %1639 = vpow2.f32 %v363_v22  ;;  %v430_v30 = vadd.f32 %v2018_v17, %v429_v46 }
 0x1c7   :  { %287 = vmax.xlane.f32.xlu1 %v286_v47  ;;  %431 = vadd.xlane.f32.xlu2 %v430_v30  ;;  %v260_v32 = vpop.xlane.xlu2 %259  ;;  %v2076_v47 = vmul.f32 0.35355338, %v196_v38 }
 0x1c8   :  { %v321_v33 = vsub.f32 %v1936_v52, %v260_v32  ;;  %v322_v36 = vsub.f32 %v1938_v53, %v260_v32  ;;  %v2044_v53 = vmul.f32 0.35355338, %v191_v55  ;;  %v199_v55 = vpop.f32.mrf.mxu1  ;;  %v145_v35 = vpop.f32.mrf.mxu0 }
 0x1c9   :  { %v2060_v9 = vmul.f32 0.35355338, %v199_v55  ;;  %v2064_v12 = vmul.f32 0.35355338, %v145_v35 }
 0x1ca   :  { %v2036_v39 = vpop.eup %1637  ;;  %v365_v42 = vmul.f32 1.442695, %v321_v33  ;;  %v367_v43 = vmul.f32 1.442695, %v322_v36  ;;  %v293_v2 = vsel %vm240_vm2, %v2044_v53, -inf }
 0x1cb   :  { %v2038_v44 = vpop.eup %1639  ;;  %v305_v22 = vsel %vm240_vm2, %v2060_v9, -inf  ;;  %v2080_v36 = vmul.f32 0.35355338, %v142_v48 }
 0x1cc   :  { %1641 = vpow2.f32 %v365_v42  ;;  %v433_v50 = vsel %vm240_vm2, %v2038_v44, 0.0 }
 0x1cd   :  { %1643 = vpow2.f32 %v367_v43  ;;  %v434_v52 = vadd.f32 %v2036_v39, %v433_v50 }
 0x1cf   :  { %435 = vadd.xlane.f32.xlu1 %v434_v52  ;;  %299 = vmax.xlane.f32.xlu2 %v298_v45  ;;  %v264_v51 = vpop.xlane.xlu1 %263  ;;  %v301_v45 = vsel %vm240_vm2, %v2076_v47, -inf }
 0x1d0   :  { %v323_v29 = vsub.f32 %v1943_v58, %v264_v51  ;;  %v324_v56 = vsub.f32 %v1945_v59, %v264_v51  ;;  %v294_v58 = vmax.f32 %v2048_v34, %v293_v2  ;;  %v201_v51 = vpop.f32.mrf.mxu1 }
 0x1d2   :  { %v2050_v60 = vpop.eup %1641  ;;  %v369_v61 = vmul.f32 1.442695, %v323_v29  ;;  %v371_v62 = vmul.f32 1.442695, %v324_v56 }
 0x1d3   :  { %v2054_v3 = vpop.eup %1643 }
 0x1d4   :  { %1645 = vpow2.f32 %v369_v61  ;;  %v437_v6 = vsel %vm240_vm2, %v2054_v3, 0.0  ;;  %v147_v61 = vpop.f32.mrf.mxu0 }
 0x1d5   :  { %1647 = vpow2.f32 %v371_v62  ;;  %v438_v59 = vadd.f32 %v2050_v60, %v437_v6  ;;  %v2099_v62 = vmul.f32 0.35355338, %v201_v51 }
 0x1d7   :  { %295 = vmax.xlane.f32.xlu1 %v294_v58  ;;  %439 = vadd.xlane.f32.xlu2 %v438_v59  ;;  %v268_v40 = vpop.xlane.xlu2 %267  ;;  %v2103_v58 = vmul.f32 0.35355338, %v147_v61 }
 0x1d8   :  { %v325_v41 = vsub.f32 %v1950_v0, %v268_v40  ;;  %v326_v11 = vsub.f32 %v1952_v1, %v268_v40  ;;  %v306_v1 = vmax.f32 %v2064_v12, %v305_v22  ;;  %v309_v40 = vsel %vm240_vm2, %v2099_v62, -inf }
 0x1da   :  { %v2066_v15 = vpop.eup %1645  ;;  %v373_v18 = vmul.f32 1.442695, %v325_v41  ;;  %v375_v21 = vmul.f32 1.442695, %v326_v11  ;;  %v310_v41 = vmax.f32 %v2103_v58, %v309_v40 }
 0x1db   :  { %v2070_v23 = vpop.eup %1647 }
 0x1dc   :  { %1649 = vpow2.f32 %v373_v18  ;;  %v441_v46 = vsel %vm240_vm2, %v2070_v23, 0.0 }
 0x1dd   :  { %1651 = vpow2.f32 %v375_v21  ;;  %v442_v0 = vadd.f32 %v2066_v15, %v441_v46  ;;  %v34_v46 = vld [vmem:[%s2730_s2 + $0x8] sm:$0xff] }
 0x1df   :  { %443 = vadd.xlane.f32.xlu1 %v442_v0  ;;  %307 = vmax.xlane.f32.xlu2 %v306_v1  ;;  %v272_v30 = vpop.xlane.xlu1 %271  ;;  %v33_v1 = vld [vmem:[%s2730_s2] sm:$0xff] }
 0x1e0   :  { %v327_v32 = vsub.f32 %v1957_v7, %v272_v30  ;;  %v328_v33 = vsub.f32 %v1959_v8, %v272_v30  ;;  %v302_v7 = vmax.f32 %v2080_v36, %v301_v45  ;;  %v36_v30 = vpack.c.bf16 %v34_v46, %v34_v46 }
 0x1e2   :  { %v2082_v37 = vpop.eup %1649  ;;  %v377_v42 = vmul.f32 1.442695, %v327_v32  ;;  %v379_v43 = vmul.f32 1.442695, %v328_v33  ;;  %v35_v33 = vpack.c.bf16 %v33_v1, %v33_v1 }
 0x1e3   :  { %v2086_v50 = vpop.eup %1651 }
 0x1e4   :  { %1653 = vpow2.f32 %v377_v42  ;;  %v445_v38 = vsel %vm240_vm2, %v2086_v50, 0.0  ;;  %602 = vmatpush.bf16.xpose.msra.mxu2 %v35_v33 }
 0x1e5   :  { %1655 = vpow2.f32 %v379_v43  ;;  %v446_v8 = vadd.f32 %v2082_v37, %v445_v38  ;;  %v593_v43 = vsel %vm240_vm2, %v36_v30, 0 }
 0x1e6   :  { %656 = vmatpush.bf16.xpose.msra.mxu3 %v593_v43 }
 0x1e7   :  { %303 = vmax.xlane.f32.xlu1 %v302_v7  ;;  %447 = vadd.xlane.f32.xlu2 %v446_v8  ;;  %v276_v21 = vpop.xlane.xlu2 %275 }
 0x1e8   :  { %v330_v22 = vsub.f32 %v1966_v14, %v276_v21  ;;  %v329_v0 = vsub.f32 %v1964_v13, %v276_v21 }
 0x1ea   :  { %v2092_v48 = vpop.eup %1653  ;;  %v383_v32 = vmul.f32 1.442695, %v330_v22 }
 0x1eb   :  { %v2094_v52 = vpop.eup %1655 }
 0x1ec   :  { %v449_v29 = vsel %vm240_vm2, %v2094_v52, 0.0 }
 0x1ed   :  { %v450_v56 = vadd.f32 %v2092_v48, %v449_v29 }
 0x1ef   :  { %451 = vadd.xlane.f32.xlu1 %v450_v56  ;;  %v280_v2 = vpop.xlane.xlu1 %279 }
 0x1f0   :  { %v331_v55 = vsub.f32 %v1971_v19, %v280_v2  ;;  %v332_v6 = vsub.f32 %v1973_v20, %v280_v2 }
 0x1f2   :  { %v385_v59 = vmul.f32 1.442695, %v331_v55  ;;  %v387_v35 = vmul.f32 1.442695, %v332_v6 }
 0x1f4   :  { %1657 = vpow2.f32 %v385_v59 }
 0x1f5   :  { %1659 = vpow2.f32 %v387_v35 }
 0x1f6   :  { %1661 = vpow2.f32 %v383_v32 }
 0x1f7   :  { %311 = vmax.xlane.f32.xlu1 %v310_v41  ;;  %v284_v42 = vpop.xlane.xlu2 %283 }
 0x1f8   :  { %v334_v14 = vsub.f32 %v1980_v26, %v284_v42  ;;  %v333_v45 = vsub.f32 %v1978_v25, %v284_v42 }
 0x1fa   :  { %v2108_v11 = vpop.eup %1657  ;;  %v391_v13 = vmul.f32 1.442695, %v334_v14  ;;  %v389_v7 = vmul.f32 1.442695, %v333_v45 }
 0x1fb   :  { %v2110_v18 = vpop.eup %1659 }
 0x1fc   :  { %v457_v19 = vsel %vm240_vm2, %v2110_v18, 0.0  ;;  %v2128_v38 = vpop.eup %1661 }
 0x1fd   :  { %v458_v20 = vadd.f32 %v2108_v11, %v457_v19  ;;  %v453_v51 = vsel %vm240_vm2, %v2128_v38, 0.0 }
 0x1ff   :  { %459 = vadd.xlane.f32.xlu1 %v458_v20  ;;  %806 = vrot.lane.b32.xlu2 %v1882_v4, %s1841_s26  ;;  %v381_v4 = vmul.f32 1.442695, %v329_v0 }
 0x201   :  { %1663 = vpow2.f32 %v381_v4 }
 0x202   :  { %1665 = vpow2.f32 %v391_v13 }
 0x203   :  { %1667 = vpow2.f32 %v389_v7 }
 0x207   :  { %v2130_v8 = vpop.eup %1663 }
 0x208   :  { %v454_v29 = vadd.f32 %v2130_v8, %v453_v51  ;;  %v2135_v56 = vpop.eup %1665 }
 0x209   :  { %v2137_v61 = vpop.eup %1667  ;;  %v461_v25 = vsel %vm240_vm2, %v2135_v56, 0.0 }
 0x20a   :  { %v462_v2 = vadd.f32 %v2137_v61, %v461_v25 }
 0x228   :  { %455 = vadd.xlane.f32.xlu2 %v454_v29 }
 0x22a   :  { %v424_v26 = vpop.xlane.xlu2 %423 }
 0x22b   :  { %1669 = vrcp.f32 %v424_v26 }
 0x230   :  { %463 = vadd.xlane.f32.xlu2 %v462_v2 }
 0x231   :  { %v1670_v19 = vpop.eup %1669 }
 0x232   :  { %v428_v55 = vpop.xlane.xlu1 %427  ;;  %v292_v6 = vpop.xlane.xlu2 %291  ;;  %v511_v46 = vmul.f32 %v1670_v19, %v1989_v49  ;;  %v512_v1 = vmul.f32 %v1670_v19, %v1991_v54 }
 0x233   :  { %1671 = vrcp.f32 %v428_v55  ;;  %v337_v59 = vsub.f32 %v1998_v57, %v292_v6  ;;  %v338_v35 = vsub.f32 %v1993_v28, %v292_v6 }
 0x235   :  { %v397_v40 = vmul.f32 1.442695, %v337_v59  ;;  %v399_v41 = vmul.f32 1.442695, %v338_v35 }
 0x237   :  { %1673 = vpow2.f32 %v397_v40 }
 0x238   :  { %1675 = vpow2.f32 %v399_v41 }
 0x239   :  { %v1672_v20 = vpop.eup %1671 }
 0x23a   :  { %v288_v21 = vpop.xlane.xlu1 %287  ;;  %v432_v22 = vpop.xlane.xlu2 %431  ;;  %v513_v0 = vmul.f32 %v1672_v20, %v2004_v63  ;;  %v514_v30 = vmul.f32 %v1672_v20, %v2006_v5 }
 0x23b   :  { %v335_v57 = vsub.f32 %v2016_v16, %v288_v21  ;;  %v336_v28 = vsub.f32 %v2012_v10, %v288_v21 }
 0x23c   :  { %v547_v32 = vpack.c.bf16 %v513_v0, %v511_v46  ;;  %v548_v33 = vpack.c.bf16 %v514_v30, %v512_v1 }
 0x23d   :  { %v2150_v42 = vpop.eup %1673  ;;  %v393_v43 = vmul.f32 1.442695, %v335_v57  ;;  %v395_v4 = vmul.f32 1.442695, %v336_v28 }
 0x23e   :  { %v2152_v14 = vpop.eup %1675  ;;  %603 = vmatmul.bf16.vlgmr.msra.gmra.mxu2 %v547_v32  ;;  %1568 = vmatmul.msk.bf16.vlgmr.msra.gmra.mxu3 %vm240_vm2, %v548_v33 }
 0x23f   :  { %1677 = vpow2.f32 %v393_v43  ;;  %v469_v49 = vsel %vm240_vm2, %v2152_v14, 0.0 }
 0x240   :  { %1679 = vpow2.f32 %v395_v4  ;;  %v470_v54 = vadd.f32 %v2150_v42, %v469_v49 }
 0x241   :  { %1681 = vrcp.f32 %v432_v22 }
 0x242   :  { %471 = vadd.xlane.f32.xlu2 %v470_v54  ;;  %v436_v63 = vpop.xlane.xlu1 %435  ;;  %v300_v5 = vpop.xlane.xlu2 %299 }
 0x243   :  { %1683 = vrcp.f32 %v436_v63  ;;  %v341_v10 = vsub.f32 %v2030_v31, %v300_v5  ;;  %v342_v16 = vsub.f32 %v2024_v27, %v300_v5 }
 0x245   :  { %v2160_v45 = vpop.eup %1677  ;;  %v405_v13 = vmul.f32 1.442695, %v341_v10  ;;  %v407_v7 = vmul.f32 1.442695, %v342_v16 }
 0x246   :  { %v2162_v51 = vpop.eup %1679 }
 0x247   :  { %v1682_v29 = vpop.eup %1681  ;;  %1685 = vpow2.f32 %v405_v13  ;;  %v465_v26 = vsel %vm240_vm2, %v2162_v51, 0.0 }
 0x248   :  { %1687 = vpow2.f32 %v407_v7  ;;  %v466_v25 = vadd.f32 %v2160_v45, %v465_v26  ;;  %v515_v27 = vmul.f32 %v1682_v29, %v2018_v17  ;;  %v516_v59 = vmul.f32 %v1682_v29, %v2022_v24 }
 0x249   :  { %v1684_v2 = vpop.eup %1683 }
 0x24a   :  { %467 = vadd.xlane.f32.xlu1 %v466_v25  ;;  %v296_v55 = vpop.xlane.xlu1 %295  ;;  %v440_v31 = vpop.xlane.xlu2 %439  ;;  %v517_v6 = vmul.f32 %v1684_v2, %v2036_v39  ;;  %v518_v35 = vmul.f32 %v1684_v2, %v2038_v44 }
 0x24b   :  { %v339_v40 = vsub.f32 %v2048_v34, %v296_v55  ;;  %v340_v41 = vsub.f32 %v2044_v53, %v296_v55 }
 0x24c   :  { %v549_v19 = vpack.c.bf16 %v517_v6, %v515_v27  ;;  %v550_v20 = vpack.c.bf16 %v518_v35, %v516_v59 }
 0x24d   :  { %v2173_v21 = vpop.eup %1685  ;;  %v401_v22 = vmul.f32 1.442695, %v339_v40  ;;  %v403_v46 = vmul.f32 1.442695, %v340_v41 }
 0x24e   :  { %v2175_v0 = vpop.eup %1687  ;;  %608 = vmatmul.bf16.gmra.mxu2 %v549_v19  ;;  %1569 = vmatmul.msk.bf16.gmra.mxu3 %vm240_vm2, %v550_v20 }
 0x24f   :  { %1689 = vpow2.f32 %v401_v22  ;;  %v477_v17 = vsel %vm240_vm2, %v2175_v0, 0.0 }
 0x250   :  { %1691 = vpow2.f32 %v403_v46  ;;  %v478_v24 = vadd.f32 %v2173_v21, %v477_v17 }
 0x251   :  { %1693 = vrcp.f32 %v440_v31 }
 0x252   :  { %479 = vadd.xlane.f32.xlu2 %v478_v24  ;;  %v444_v39 = vpop.xlane.xlu1 %443  ;;  %v308_v44 = vpop.xlane.xlu2 %307 }
 0x253   :  { %1695 = vrcp.f32 %v444_v39  ;;  %v345_v53 = vsub.f32 %v2064_v12, %v308_v44  ;;  %v346_v34 = vsub.f32 %v2060_v9, %v308_v44 }
 0x255   :  { %v2183_v1 = vpop.eup %1689  ;;  %v413_v30 = vmul.f32 1.442695, %v345_v53  ;;  %v415_v57 = vmul.f32 1.442695, %v346_v34 }
 0x256   :  { %v2185_v28 = vpop.eup %1691 }
 0x257   :  { %v1694_v32 = vpop.eup %1693  ;;  %1697 = vpow2.f32 %v413_v30  ;;  %v473_v33 = vsel %vm240_vm2, %v2185_v28, 0.0 }
 0x258   :  { %1699 = vpow2.f32 %v415_v57  ;;  %v474_v43 = vadd.f32 %v2183_v1, %v473_v33  ;;  %v519_v12 = vmul.f32 %v1694_v32, %v2050_v60  ;;  %v520_v54 = vmul.f32 %v1694_v32, %v2054_v3 }
 0x259   :  { %v1696_v4 = vpop.eup %1695 }
 0x25a   :  { %475 = vadd.xlane.f32.xlu1 %v474_v43  ;;  %v304_v49 = vpop.xlane.xlu1 %303  ;;  %v521_v9 = vmul.f32 %v1696_v4, %v2066_v15  ;;  %v522_v63 = vmul.f32 %v1696_v4, %v2070_v23  ;;  %v448_v2 = vpop.xlane.xlu2 %447 }
 0x25b   :  { %v343_v5 = vsub.f32 %v2080_v36, %v304_v49  ;;  %v344_v10 = vsub.f32 %v2076_v47, %v304_v49 }
 0x25c   :  { %v551_v16 = vpack.c.bf16 %v521_v9, %v519_v12  ;;  %v552_v13 = vpack.c.bf16 %v522_v63, %v520_v54 }
 0x25d   :  { %v2196_v7 = vpop.eup %1697  ;;  %v409_v29 = vmul.f32 1.442695, %v343_v5  ;;  %v411_v26 = vmul.f32 1.442695, %v344_v10 }
 0x25e   :  { %v2198_v25 = vpop.eup %1699  ;;  %613 = vmatmul.bf16.gmra.mxu2 %v551_v16  ;;  %1570 = vmatmul.msk.bf16.gmra.mxu3 %vm240_vm2, %v552_v13 }
 0x25f   :  { %1701 = vpow2.f32 %v409_v29  ;;  %v485_v60 = vsel %vm240_vm2, %v2198_v25, 0.0 }
 0x260   :  { %1703 = vpow2.f32 %v411_v26  ;;  %v486_v3 = vadd.f32 %v2196_v7, %v485_v60 }
 0x261   :  { %1705 = vrcp.f32 %v448_v2 }
 0x262   :  { %487 = vadd.xlane.f32.xlu2 %v486_v3  ;;  %v452_v15 = vpop.xlane.xlu1 %451  ;;  %v2228_v39 = vpop.permute.xlu2 %806 }
 0x263   :  { %1707 = vrcp.f32 %v452_v15 }
 0x265   :  { %v2204_v23 = vpop.eup %1701 }
 0x266   :  { %v2206_v47 = vpop.eup %1703 }
 0x267   :  { %v1706_v36 = vpop.eup %1705  ;;  %v481_v55 = vsel %vm240_vm2, %v2206_v47, 0.0 }
 0x268   :  { %v482_v31 = vadd.f32 %v2204_v23, %v481_v55  ;;  %v523_v59 = vmul.f32 %v1706_v36, %v2082_v37  ;;  %v524_v40 = vmul.f32 %v1706_v36, %v2086_v50 }
 0x269   :  { %v1708_v27 = vpop.eup %1707 }
 0x26a   :  { %483 = vadd.xlane.f32.xlu1 %v482_v31  ;;  %v312_v6 = vpop.xlane.xlu1 %311  ;;  %v525_v35 = vmul.f32 %v1708_v27, %v2092_v48  ;;  %v526_v41 = vmul.f32 %v1708_v27, %v2094_v52 }
 0x26b   :  { %v347_v19 = vsub.f32 %v2103_v58, %v312_v6  ;;  %v348_v20 = vsub.f32 %v2099_v62, %v312_v6  ;;  %v791_v62 = vld [vmem:[%s2728_s0 + $0x10] sm:$0xff] }
 0x26c   :  { %v553_v22 = vpack.c.bf16 %v525_v35, %v523_v59  ;;  %v554_v46 = vpack.c.bf16 %v526_v41, %v524_v40  ;;  %v793_v58 = vpack.c.bf16 %v791_v62, %v791_v62 }
 0x26d   :  { %v417_v17 = vmul.f32 1.442695, %v347_v19  ;;  %v419_v24 = vmul.f32 1.442695, %v348_v20 }
 0x26e   :  { %618 = vmatmul.bf16.gmra.mxu2 %v553_v22  ;;  %1571 = vmatmul.msk.bf16.gmra.mxu3 %vm240_vm2, %v554_v46 }
 0x26f   :  { %1709 = vpow2.f32 %v417_v17 }
 0x270   :  { %1711 = vpow2.f32 %v419_v24 }
 0x272   :  { %v460_v44 = vpop.xlane.xlu1 %459 }
 0x273   :  { %1713 = vrcp.f32 %v460_v44 }
 0x275   :  { %v2218_v37 = vpop.eup %1709 }
 0x276   :  { %v2220_v48 = vpop.eup %1711 }
 0x277   :  { %v489_v50 = vsel %vm240_vm2, %v2220_v48, 0.0 }
 0x278   :  { %v490_v52 = vadd.f32 %v2218_v37, %v489_v50 }
 0x279   :  { %v1714_v34 = vpop.eup %1713 }
 0x27a   :  { %491 = vadd.xlane.f32.xlu1 %v490_v52  ;;  %v529_v32 = vmul.f32 %v1714_v34, %v2108_v11  ;;  %v530_v43 = vmul.f32 %v1714_v34, %v2110_v18 }
 0x293   :  { %808 = vrot.lane.b32.xlu1 %v793_v58, %s1841_s26 }
 0x29b   :  { %v456_v53 = vpop.xlane.xlu2 %455 }
 0x29c   :  { %1715 = vrcp.f32 %v456_v53 }
 0x2a2   :  { %v1716_v30 = vpop.eup %1715 }
 0x2a3   :  { %v527_v57 = vmul.f32 %v1716_v30, %v2130_v8  ;;  %v528_v33 = vmul.f32 %v1716_v30, %v2128_v38  ;;  %v464_v12 = vpop.xlane.xlu2 %463 }
 0x2a4   :  { %1717 = vrcp.f32 %v464_v12 }
 0x2a5   :  { %v555_v4 = vpack.c.bf16 %v529_v32, %v527_v57  ;;  %v556_v49 = vpack.c.bf16 %v530_v43, %v528_v33 }
 0x2a7   :  { %623 = vmatmul.bf16.gmra.mxu2 %v555_v4  ;;  %1572 = vmatmul.msk.bf16.gmra.mxu3 %vm240_vm2, %v556_v49 }
 0x2aa   :  { %v1718_v5 = vpop.eup %1717 }
 0x2ab   :  { %v531_v11 = vmul.f32 %v1718_v5, %v2137_v61  ;;  %v532_v18 = vmul.f32 %v1718_v5, %v2135_v56 }
 0x2b5   :  { %v472_v26 = vpop.xlane.xlu2 %471 }
 0x2bd   :  { %v468_v9 = vpop.xlane.xlu1 %467 }
 0x2be   :  { %1719 = vrcp.f32 %v468_v9 }
 0x2bf   :  { %1721 = vrcp.f32 %v472_v26 }
 0x2c1   :  { %v604_v54 = vpop.f32.mrf.mxu2  ;;  %v658_v63 = vpop.f32.mrf.mxu3 }
 0x2c2   :  { %v2236_v10 = vadd.f32 %v658_v63, %v604_v54 }
 0x2c4   :  { %v1720_v8 = vpop.eup %1719 }
 0x2c5   :  { %v533_v38 = vmul.f32 %v1720_v8, %v2160_v45  ;;  %v534_v16 = vmul.f32 %v1720_v8, %v2162_v51  ;;  %v1722_v45 = vpop.eup %1721  ;;  %v480_v35 = vpop.xlane.xlu2 %479 }
 0x2c6   :  { %v535_v51 = vmul.f32 %v1722_v45, %v2150_v42  ;;  %v536_v31 = vmul.f32 %v1722_v45, %v2152_v14 }
 0x2c7   :  { %v557_v13 = vpack.c.bf16 %v533_v38, %v531_v11  ;;  %v558_v29 = vpack.c.bf16 %v534_v16, %v532_v18 }
 0x2c9   :  { %628 = vmatmul.bf16.gmra.mxu2 %v557_v13  ;;  %1573 = vmatmul.msk.bf16.gmra.mxu3 %vm240_vm2, %v558_v29  ;;  %v2243_v2 = vpop.f32.mrf.mxu2  ;;  %v2245_v60 = vpop.f32.mrf.mxu3 }
 0x2cd   :  { %v476_v3 = vpop.xlane.xlu1 %475 }
 0x2ce   :  { %1723 = vrcp.f32 %v476_v3 }
 0x2cf   :  { %1725 = vrcp.f32 %v480_v35 }
 0x2d1   :  { %v609_v61 = vpop.f32.mrf.mxu2  ;;  %v663_v15 = vpop.f32.mrf.mxu3 }
 0x2d2   :  { %v2247_v36 = vadd.f32 %v663_v15, %v609_v61 }
 0x2d4   :  { %v1724_v56 = vpop.eup %1723 }
 0x2d5   :  { %v537_v55 = vmul.f32 %v1724_v56, %v2183_v1  ;;  %v538_v27 = vmul.f32 %v1724_v56, %v2185_v28  ;;  %v1726_v1 = vpop.eup %1725  ;;  %v488_v62 = vpop.xlane.xlu2 %487 }
 0x2d6   :  { %v539_v28 = vmul.f32 %v1726_v1, %v2173_v21  ;;  %v540_v17 = vmul.f32 %v1726_v1, %v2175_v0  ;;  %v1583_v1 = vld [vmem:[%s2729_s1 + $0x10] sm:$0xff] }
 0x2d7   :  { %v559_v6 = vpack.c.bf16 %v537_v55, %v535_v51  ;;  %v560_v59 = vpack.c.bf16 %v538_v27, %v536_v31 }
 0x2d9   :  { %633 = vmatmul.bf16.gmra.mxu2 %v559_v6  ;;  %1574 = vmatmul.msk.bf16.gmra.mxu3 %vm240_vm2, %v560_v59  ;;  %v2254_v40 = vpop.f32.mrf.mxu2  ;;  %v2256_v41 = vpop.f32.mrf.mxu3 }
 0x2dd   :  { %v484_v19 = vpop.xlane.xlu1 %483 }
 0x2de   :  { %1727 = vrcp.f32 %v484_v19 }
 0x2df   :  { %1729 = vrcp.f32 %v488_v62 }
 0x2e1   :  { %v614_v42 = vpop.f32.mrf.mxu2  ;;  %v668_v20 = vpop.f32.mrf.mxu3 }
 0x2e2   :  { %v2258_v22 = vadd.f32 %v668_v20, %v614_v42  ;;  %v1584_v20 = vld [vmem:[%s2729_s1 + $0x18] sm:$0xff] }
 0x2e4   :  { %v1728_v14 = vpop.eup %1727 }
 0x2e5   :  { %v541_v46 = vmul.f32 %v1728_v14, %v2204_v23  ;;  %v542_v24 = vmul.f32 %v1728_v14, %v2206_v47  ;;  %v1730_v23 = vpop.eup %1729  ;;  %v798_v14 = vpack.c.bf16 %v1584_v20, %v1584_v20 }
 0x2e6   :  { %v543_v47 = vmul.f32 %v1730_v23, %v2196_v7  ;;  %v544_v32 = vmul.f32 %v1730_v23, %v2198_v25 }
 0x2e7   :  { %v561_v50 = vpack.c.bf16 %v541_v46, %v539_v28  ;;  %v562_v52 = vpack.c.bf16 %v542_v24, %v540_v17  ;;  %v797_v28 = vpack.c.bf16 %v1583_v1, %v1583_v1  ;;  %v869_v62 = vsel %vm89_vm0, %v798_v14, 0 }
 0x2e8   :  { %932 = vmatpush.bf16.msrb.mxu3 %v869_v62 }
 0x2e9   :  { %638 = vmatmul.bf16.gmra.mxu2 %v561_v50  ;;  %1575 = vmatmul.msk.bf16.gmra.mxu3 %vm240_vm2, %v562_v52  ;;  %v2265_v58 = vpop.f32.mrf.mxu2  ;;  %v2267_v44 = vpop.f32.mrf.mxu3 }
 0x2ed   :  { %v492_v53 = vpop.xlane.xlu1 %491 }
 0x2ee   :  { %1731 = vrcp.f32 %v492_v53  ;;  %v866_v53 = vsel %vm89_vm0, %v797_v28, 0 }
 0x2ef   :  { %878 = vmatpush.bf16.msrb.mxu2 %v866_v53 }
 0x2f1   :  { %v619_v21 = vpop.f32.mrf.mxu2  ;;  %v673_v34 = vpop.f32.mrf.mxu3 }
 0x2f2   :  { %v2269_v30 = vadd.f32 %v673_v34, %v619_v21 }
 0x2f4   :  { %v1732_v0 = vpop.eup %1731 }
 0x2f5   :  { %v545_v57 = vmul.f32 %v1732_v0, %v2218_v37  ;;  %v546_v33 = vmul.f32 %v1732_v0, %v2220_v48 }
 0x2f7   :  { %v563_v43 = vpack.c.bf16 %v545_v57, %v543_v47  ;;  %v564_v4 = vpack.c.bf16 %v546_v33, %v544_v32 }
 0x2f9   :  { %643 = vmatmul.bf16.gmra.mxu2 %v563_v43  ;;  %1576 = vmatmul.msk.bf16.gmra.mxu3 %vm240_vm2, %v564_v4  ;;  %v621_v9 = vpop.f32.mrf.mxu2  ;;  %v675_v54 = vpop.f32.mrf.mxu3  ;;  %v671_v43 = vadd.f32 %v2267_v44, %v2265_v58 }
 0x2fa   :  { %v676_v57 = vadd.f32 %v675_v54, %v621_v9 }
 0x2fc   :  { %v706_v33 = vpack.c.bf16 %v676_v57, %v2269_v30  ;;  %v661_v30 = vadd.f32 %v2245_v60, %v2243_v2 }
 0x2fe   :  { %v740_v4 = vsel %vm61_vm1, %v706_v33, 0 }
 0x305   :  { %v809_v49 = vpop.permute.xlu1 %808 }
 0x306   :  { %v811_v12 = vsel %vm810_vm3, %v2228_v39, %v809_v49 }
 0x307   :  { %814 = vxpose.binary.xlu2.c.b16.start.end [1/2] (short) %v809_v49, %v811_v12, 128  ;;  %v705_v49 = vpack.c.bf16 %v671_v43, %v2258_v22  ;;  %v666_v12 = vadd.f32 %v2256_v41, %v2254_v40  ;;  %v703_v22 = vpack.c.bf16 %v661_v30, %v2236_v10 }
 0x309   :  { %v704_v9 = vpack.c.bf16 %v666_v12, %v2247_v36  ;;  %v731_v40 = vsel %vm61_vm1, %v703_v22, 0 }
 0x30b   :  { %v734_v58 = vsel %vm61_vm1, %v704_v9, 0 }
 0x32a   :  { %v624_v63 = vpop.f32.mrf.mxu2  ;;  %v678_v7 = vpop.f32.mrf.mxu3 }
 0x32b   :  { %v679_v5 = vadd.f32 %v678_v7, %v624_v63  ;;  %v737_v63 = vsel %vm61_vm1, %v705_v49, 0 }
 0x332   :  { %v626_v37 = vpop.f32.mrf.mxu2  ;;  %v680_v8 = vpop.f32.mrf.mxu3 }
 0x333   :  { %v681_v34 = vadd.f32 %v680_v8, %v626_v37 }
 0x335   :  { %v707_v47 = vpack.c.bf16 %v681_v34, %v679_v5 }
 0x337   :  { %v743_v32 = vsel %vm61_vm1, %v707_v47, 0 }
 0x34c   :  { %v629_v25 = vpop.f32.mrf.mxu2  ;;  %v683_v11 = vpop.f32.mrf.mxu3 }
 0x34d   :  { %v684_v42 = vadd.f32 %v683_v11, %v629_v25 }
 0x354   :  { %v631_v48 = vpop.f32.mrf.mxu2  ;;  %v685_v38 = vpop.f32.mrf.mxu3 }
 0x355   :  { %v686_v35 = vadd.f32 %v685_v38, %v631_v48 }
 0x357   :  { %v708_v24 = vpack.c.bf16 %v686_v35, %v684_v42 }
 0x359   :  { %v746_v23 = vsel %vm61_vm1, %v708_v24, 0 }
 0x35c   :  { %v634_v18 = vpop.f32.mrf.mxu2  ;;  %v688_v16 = vpop.f32.mrf.mxu3 }
 0x35d   :  { %v689_v31 = vadd.f32 %v688_v16, %v634_v18 }
 0x364   :  { %v636_v13 = vpop.f32.mrf.mxu2  ;;  %v690_v29 = vpop.f32.mrf.mxu3 }
 0x365   :  { %v691_v51 = vadd.f32 %v690_v29, %v636_v13 }
 0x367   :  { %v709_v59 = vpack.c.bf16 %v691_v51, %v689_v31 }
 0x369   :  { %v749_v19 = vsel %vm61_vm1, %v709_v59, 0 }
 0x36c   :  { %v639_v26 = vpop.f32.mrf.mxu2  ;;  %v693_v3 = vpop.f32.mrf.mxu3 }
 0x36d   :  { %v694_v15 = vadd.f32 %v693_v3, %v639_v26 }
 0x374   :  { %v641_v61 = vpop.f32.mrf.mxu2  ;;  %v695_v39 = vpop.f32.mrf.mxu3 }
 0x375   :  { %v696_v45 = vadd.f32 %v695_v39, %v641_v61 }
 0x377   :  { %v710_v56 = vpack.c.bf16 %v696_v45, %v694_v15 }
 0x379   :  { %v752_v55 = vsel %vm61_vm1, %v710_v56, 0 }
 0x37a   :  { %757 = vmatpush.bf16.xpose.msrb.mxu0 %v752_v55 }
 0x37c   :  { %v644_v27 = vpop.f32.mrf.mxu2  ;;  %v698_v6 = vpop.f32.mrf.mxu3 }
 0x37d   :  { %v699_v50 = vadd.f32 %v698_v6, %v644_v27 }
 0x382   :  { %758 = vmatpush.bf16.xpose.msrb.mxu0 %v749_v19 }
 0x384   :  { %v646_v46 = vpop.f32.mrf.mxu2  ;;  %v700_v17 = vpop.f32.mrf.mxu3 }
 0x385   :  { %v701_v52 = vadd.f32 %v700_v17, %v646_v46 }
 0x387   :  { %v711_v21 = vpack.c.bf16 %v701_v52, %v699_v50 }
 0x389   :  { %v755_v0 = vsel %vm61_vm1, %v711_v21, 0 }
 0x38a   :  { %759 = vmatpush.bf16.xpose.msrb.mxu0 %v746_v23  ;;  %778 = vmatpush.bf16.xpose.msrb.mxu1 %v755_v0 }
 0x392   :  { %760 = vmatpush.bf16.xpose.msrb.mxu0 %v743_v32 }
 0x39a   :  { %761 = vmatpush.bf16.xpose.msrb.mxu0 %v740_v4 }
 0x3a2   :  { %762 = vmatpush.bf16.xpose.msrb.mxu0 %v737_v63 }
 0x3a8   :  { %v822_v54 = vpop.trf.xlu2 }
 0x3a9   :  { %1587 = vmatmul.msk.bf16.vlgmr.msrb.gmra.mxu2 %vm61_vm1, %v822_v54  ;;  %1596 = vmatmul.msk.bf16.vlgmr.msrb.gmra.mxu3 %vm61_vm1, %v822_v54 }
 0x3aa   :  { %763 = vmatpush.bf16.xpose.msrb.mxu0 %v734_v58 }
 0x3b0   :  { %v823_v44 = vpop.trf.xlu2 }
 0x3b2   :  { %764 = vmatpush.bf16.xpose.msrb.mxu0 %v731_v40 }
 0x3b8   :  { %v824_v41 = vpop.trf.xlu2 }
 0x3b9   :  { %1588 = vmatmul.msk.bf16.gmra.mxu2 %vm61_vm1, %v824_v41  ;;  %1597 = vmatmul.msk.bf16.gmra.mxu3 %vm61_vm1, %v824_v41 }
 0x3c0   :  { %v825_v36 = vpop.trf.xlu2 }
 0x3c8   :  { %v826_v2 = vpop.trf.xlu2 }
 0x3c9   :  { %1589 = vmatmul.msk.bf16.gmra.mxu2 %vm61_vm1, %v826_v2  ;;  %1598 = vmatmul.msk.bf16.gmra.mxu3 %vm61_vm1, %v826_v2 }
 0x3d0   :  { %v827_v60 = vpop.trf.xlu2 }
 0x3d8   :  { %v828_v7 = vpop.trf.xlu2 }
 0x3d9   :  { %1590 = vmatmul.msk.bf16.gmra.mxu2 %vm61_vm1, %v828_v7  ;;  %1599 = vmatmul.msk.bf16.gmra.mxu3 %vm61_vm1, %v828_v7 }
 0x3e0   :  { %v829_v10 = vpop.trf.xlu2 }
 0x3e8   :  { %v830_v5 = vpop.trf.xlu2 }
 0x3e9   :  { %1591 = vmatmul.msk.bf16.gmra.mxu2 %vm61_vm1, %v830_v5  ;;  %1600 = vmatmul.msk.bf16.gmra.mxu3 %vm61_vm1, %v830_v5 }
 0x3f0   :  { %v831_v37 = vpop.trf.xlu2 }
 0x3f8   :  { %v832_v8 = vpop.trf.xlu2 }
 0x3f9   :  { %1592 = vmatmul.msk.bf16.gmra.mxu2 %vm61_vm1, %v832_v8  ;;  %1601 = vmatmul.msk.bf16.gmra.mxu3 %vm61_vm1, %v832_v8 }
 0x400   :  { %v833_v25 = vpop.trf.xlu2 }
 0x408   :  { %v834_v11 = vpop.trf.xlu2 }
 0x409   :  { %1593 = vmatmul.msk.bf16.gmra.mxu2 %vm61_vm1, %v834_v11  ;;  %1602 = vmatmul.msk.bf16.gmra.mxu3 %vm61_vm1, %v834_v11 }
 0x410   :  { %v835_v48 = vpop.trf.xlu2 }
 0x418   :  { %v836_v38 = vpop.trf.xlu2 }
 0x419   :  { %1594 = vmatmul.msk.bf16.gmra.mxu2 %vm61_vm1, %v836_v38  ;;  %1603 = vmatmul.msk.bf16.gmra.mxu3 %vm61_vm1, %v836_v38 }
 0x420   :  { %v837_v18 = vpop.trf.xlu2 }
 0x429   :  { %1595 = vmatmul.msk.bf16.gmra.mxu2 %vm61_vm1, %v823_v44  ;;  %1604 = vmatmul.msk.bf16.gmra.mxu3 %vm61_vm1, %v823_v44 }
 0x42c   :  { %v880_v16 = vpop.f32.mrf.mxu2  ;;  %v934_v13 = vpop.f32.mrf.mxu3 }
 0x42d   :  { %v979_v29 = vmul.f32 0.35355338, %v880_v16  ;;  %v980_v26 = vmul.f32 0.35355338, %v934_v13 }
 0x42f   :  { %v1015_v3 = vsel %vm240_vm2, %v980_v26, -inf }
 0x430   :  { %v1016_v61 = vmax.f32 %v979_v29, %v1015_v3 }
 0x432   :  { %1017 = vmax.xlane.f32.xlu1 %v1016_v61 }
 0x434   :  { %v882_v39 = vpop.f32.mrf.mxu2  ;;  %v936_v15 = vpop.f32.mrf.mxu3 }
 0x435   :  { %v981_v45 = vmul.f32 0.35355338, %v882_v39  ;;  %v982_v56 = vmul.f32 0.35355338, %v936_v15 }
 0x437   :  { %v1019_v51 = vsel %vm240_vm2, %v982_v56, -inf }
 0x438   :  { %v1020_v55 = vmax.f32 %v981_v45, %v1019_v51 }
 0x43a   :  { %1021 = vmax.xlane.f32.xlu2 %v1020_v55 }
 0x43c   :  { %v885_v31 = vpop.f32.mrf.mxu2  ;;  %v939_v27 = vpop.f32.mrf.mxu3 }
 0x43d   :  { %v2324_v6 = vmul.f32 0.35355338, %v885_v31  ;;  %v2326_v59 = vmul.f32 0.35355338, %v939_v27 }
 0x43f   :  { %v1023_v35 = vsel %vm240_vm2, %v2326_v59, -inf }
 0x440   :  { %v1024_v19 = vmax.f32 %v2324_v6, %v1023_v35 }
 0x442   :  { %1025 = vmax.xlane.f32.xlu1 %v1024_v19 }
 0x444   :  { %v887_v42 = vpop.f32.mrf.mxu2  ;;  %v941_v20 = vpop.f32.mrf.mxu3 }
 0x445   :  { %v2331_v1 = vmul.f32 0.35355338, %v887_v42  ;;  %v2333_v14 = vmul.f32 0.35355338, %v941_v20 }
 0x447   :  { %v1027_v28 = vsel %vm240_vm2, %v2333_v14, -inf }
 0x448   :  { %v1028_v46 = vmax.f32 %v2331_v1, %v1027_v28 }
 0x44a   :  { %1029 = vmax.xlane.f32.xlu1 %v1028_v46 }
 0x44c   :  { %v890_v17 = vpop.f32.mrf.mxu2  ;;  %v944_v24 = vpop.f32.mrf.mxu3 }
 0x44d   :  { %v2338_v50 = vmul.f32 0.35355338, %v890_v17  ;;  %v2340_v52 = vmul.f32 0.35355338, %v944_v24 }
 0x44f   :  { %v1031_v62 = vsel %vm240_vm2, %v2340_v52, -inf }
 0x450   :  { %v1032_v53 = vmax.f32 %v2338_v50, %v1031_v62 }
 0x452   :  { %1033 = vmax.xlane.f32.xlu1 %v1032_v53 }
 0x454   :  { %v892_v21 = vpop.f32.mrf.mxu2  ;;  %v946_v34 = vpop.f32.mrf.mxu3 }
 0x455   :  { %v2345_v23 = vmul.f32 0.35355338, %v892_v21  ;;  %v2347_v0 = vmul.f32 0.35355338, %v946_v34 }
 0x457   :  { %v1035_v47 = vsel %vm240_vm2, %v2347_v0, -inf }
 0x458   :  { %v1036_v57 = vmax.f32 %v2345_v23, %v1035_v47 }
 0x45a   :  { %1037 = vmax.xlane.f32.xlu0 %v1036_v57 }
 0x45c   :  { %v895_v32 = vpop.f32.mrf.mxu2  ;;  %v949_v33 = vpop.f32.mrf.mxu3 }
 0x45d   :  { %v2352_v43 = vmul.f32 0.35355338, %v895_v32  ;;  %v2354_v4 = vmul.f32 0.35355338, %v949_v33 }
 0x45f   :  { %v1039_v49 = vsel %vm240_vm2, %v2354_v4, -inf }
 0x460   :  { %v1040_v12 = vmax.f32 %v2352_v43, %v1039_v49 }
 0x462   :  { %1041 = vmax.xlane.f32.xlu1 %v1040_v12 }
 0x464   :  { %v897_v63 = vpop.f32.mrf.mxu2  ;;  %v951_v9 = vpop.f32.mrf.mxu3 }
 0x465   :  { %v2359_v54 = vmul.f32 0.35355338, %v897_v63  ;;  %v2361_v30 = vmul.f32 0.35355338, %v951_v9 }
 0x467   :  { %v1043_v58 = vsel %vm240_vm2, %v2361_v30, -inf }
 0x468   :  { %v1044_v22 = vmax.f32 %v2359_v54, %v1043_v58 }
 0x46a   :  { %1045 = vmax.xlane.f32.xlu0 %v1044_v22 }
 0x46c   :  { %v954_v44 = vpop.f32.mrf.mxu3  ;;  %v900_v2 = vpop.f32.mrf.mxu2 }
 0x46d   :  { %v2370_v18 = vmul.f32 0.35355338, %v954_v44 }
 0x46f   :  { %v1047_v15 = vsel %vm240_vm2, %v2370_v18, -inf }
 0x474   :  { %v956_v8 = vpop.f32.mrf.mxu3  ;;  %v902_v16 = vpop.f32.mrf.mxu2 }
 0x475   :  { %v2393_v46 = vmul.f32 0.35355338, %v902_v16 }
 0x47c   :  { %v959_v31 = vpop.f32.mrf.mxu3  ;;  %v905_v19 = vpop.f32.mrf.mxu2 }
 0x47d   :  { %v2401_v34 = vmul.f32 0.35355338, %v959_v31  ;;  %v2407_v32 = vmul.f32 0.35355338, %v905_v19 }
 0x47f   :  { %v1055_v9 = vsel %vm240_vm2, %v2401_v34, -inf }
 0x484   :  { %v907_v49 = vpop.f32.mrf.mxu2 }
 0x4a5   :  { %v1018_v40 = vpop.xlane.xlu1 %1017 }
 0x4a6   :  { %v1087_v41 = vsub.f32 %v979_v29, %v1018_v40  ;;  %v1088_v36 = vsub.f32 %v980_v26, %v1018_v40  ;;  %v2375_v26 = vmul.f32 0.35355338, %v900_v2 }
 0x4a8   :  { %v1123_v60 = vmul.f32 1.442695, %v1087_v41  ;;  %v1125_v7 = vmul.f32 1.442695, %v1088_v36  ;;  %v1048_v27 = vmax.f32 %v2375_v26, %v1047_v15  ;;  %v1056_v41 = vmax.f32 %v2407_v32, %v1055_v9 }
 0x4aa   :  { %1733 = vpow2.f32 %v1123_v60 }
 0x4ab   :  { %1735 = vpow2.f32 %v1125_v7 }
 0x4ad   :  { %v1022_v10 = vpop.xlane.xlu2 %1021 }
 0x4ae   :  { %v1089_v5 = vsub.f32 %v981_v45, %v1022_v10  ;;  %v1090_v37 = vsub.f32 %v982_v56, %v1022_v10 }
 0x4b0   :  { %v2366_v25 = vpop.eup %1733  ;;  %v1127_v11 = vmul.f32 1.442695, %v1089_v5  ;;  %v1129_v48 = vmul.f32 1.442695, %v1090_v37  ;;  %v2425_v5 = vmul.f32 0.35355338, %v907_v49 }
 0x4b1   :  { %v2368_v38 = vpop.eup %1735 }
 0x4b2   :  { %1737 = vpow2.f32 %v1127_v11  ;;  %v1195_v13 = vsel %vm240_vm2, %v2368_v38, 0.0 }
 0x4b3   :  { %1739 = vpow2.f32 %v1129_v48  ;;  %v1196_v29 = vadd.f32 %v2366_v25, %v1195_v13 }
 0x4b5   :  { %1197 = vadd.xlane.f32.xlu1 %v1196_v29  ;;  %v1026_v3 = vpop.xlane.xlu1 %1025 }
 0x4b6   :  { %v1091_v61 = vsub.f32 %v2324_v6, %v1026_v3  ;;  %v1092_v39 = vsub.f32 %v2326_v59, %v1026_v3  ;;  %v2389_v59 = vmul.f32 0.35355338, %v956_v8  ;;  %v910_v8 = vpop.f32.mrf.mxu2 }
 0x4b8   :  { %v2381_v45 = vpop.eup %1737  ;;  %v1131_v56 = vmul.f32 1.442695, %v1091_v61  ;;  %v1133_v51 = vmul.f32 1.442695, %v1092_v39  ;;  %v1051_v53 = vsel %vm240_vm2, %v2389_v59, -inf }
 0x4b9   :  { %v2383_v55 = vpop.eup %1739  ;;  %v1052_v57 = vmax.f32 %v2393_v46, %v1051_v53  ;;  %v2439_v61 = vmul.f32 0.35355338, %v910_v8 }
 0x4ba   :  { %1741 = vpow2.f32 %v1131_v56  ;;  %v1199_v35 = vsel %vm240_vm2, %v2383_v55, 0.0 }
 0x4bb   :  { %1743 = vpow2.f32 %v1133_v51  ;;  %v1200_v6 = vadd.f32 %v2381_v45, %v1199_v35 }
 0x4bd   :  { %1049 = vmax.xlane.f32.xlu1 %v1048_v27  ;;  %1201 = vadd.xlane.f32.xlu0 %v1200_v6  ;;  %v1030_v42 = vpop.xlane.xlu1 %1029 }
 0x4be   :  { %v1093_v20 = vsub.f32 %v2331_v1, %v1030_v42  ;;  %v1094_v28 = vsub.f32 %v2333_v14, %v1030_v42  ;;  %v961_v1 = vpop.f32.mrf.mxu3 }
 0x4bf   :  { %v2421_v2 = vmul.f32 0.35355338, %v961_v1 }
 0x4c0   :  { %v2395_v17 = vpop.eup %1741  ;;  %v1135_v24 = vmul.f32 1.442695, %v1093_v20  ;;  %v1137_v62 = vmul.f32 1.442695, %v1094_v28  ;;  %v912_v20 = vpop.f32.mrf.mxu2 }
 0x4c1   :  { %v2399_v21 = vpop.eup %1743  ;;  %v1059_v16 = vsel %vm240_vm2, %v2421_v2, -inf }
 0x4c2   :  { %1745 = vpow2.f32 %v1135_v24  ;;  %v1203_v47 = vsel %vm240_vm2, %v2399_v21, 0.0  ;;  %v1060_v3 = vmax.f32 %v2425_v5, %v1059_v16 }
 0x4c3   :  { %1747 = vpow2.f32 %v1137_v62  ;;  %v1204_v14 = vadd.f32 %v2395_v17, %v1203_v47  ;;  %v2457_v47 = vmul.f32 0.35355338, %v912_v20 }
 0x4c5   :  { %1205 = vadd.xlane.f32.xlu1 %v1204_v14  ;;  %1053 = vmax.xlane.f32.xlu0 %v1052_v57  ;;  %v1034_v33 = vpop.xlane.xlu1 %1033 }
 0x4c6   :  { %v1095_v12 = vsub.f32 %v2338_v50, %v1034_v33  ;;  %v1096_v63 = vsub.f32 %v2340_v52, %v1034_v33  ;;  %v964_v52 = vpop.f32.mrf.mxu3 }
 0x4c7   :  { %v2433_v29 = vmul.f32 0.35355338, %v964_v52 }
 0x4c8   :  { %v2413_v58 = vpop.eup %1745  ;;  %v1139_v22 = vmul.f32 1.442695, %v1095_v12  ;;  %v1141_v44 = vmul.f32 1.442695, %v1096_v63 }
 0x4c9   :  { %v2415_v40 = vpop.eup %1747  ;;  %v1063_v51 = vsel %vm240_vm2, %v2433_v29, -inf }
 0x4ca   :  { %1749 = vpow2.f32 %v1139_v22  ;;  %v1207_v36 = vsel %vm240_vm2, %v2415_v40, 0.0  ;;  %v1064_v42 = vmax.f32 %v2439_v61, %v1063_v51  ;;  %v915_v22 = vpop.f32.mrf.mxu2 }
 0x4cb   :  { %1751 = vpow2.f32 %v1141_v44  ;;  %v1208_v50 = vadd.f32 %v2413_v58, %v1207_v36  ;;  %v2471_v44 = vmul.f32 0.35355338, %v915_v22 }
 0x4cd   :  { %1057 = vmax.xlane.f32.xlu1 %v1056_v41  ;;  %1209 = vadd.xlane.f32.xlu0 %v1208_v50  ;;  %v1038_v60 = vpop.xlane.xlu0 %1037 }
 0x4ce   :  { %v1097_v7 = vsub.f32 %v2345_v23, %v1038_v60  ;;  %v1098_v10 = vsub.f32 %v2347_v0, %v1038_v60  ;;  %v966_v31 = vpop.f32.mrf.mxu3 }
 0x4d0   :  { %v2427_v37 = vpop.eup %1749  ;;  %v1143_v11 = vmul.f32 1.442695, %v1097_v7  ;;  %v1145_v48 = vmul.f32 1.442695, %v1098_v10 }
 0x4d1   :  { %v2431_v13 = vpop.eup %1751 }
 0x4d2   :  { %1753 = vpow2.f32 %v1143_v11  ;;  %v1211_v23 = vsel %vm240_vm2, %v2431_v13, 0.0  ;;  %v917_v11 = vpop.f32.mrf.mxu2 }
 0x4d3   :  { %1755 = vpow2.f32 %v1145_v48  ;;  %v1212_v0 = vadd.f32 %v2427_v37, %v1211_v23  ;;  %v2485_v48 = vmul.f32 0.35355338, %v917_v11 }
 0x4d5   :  { %1213 = vadd.xlane.f32.xlu1 %v1212_v0  ;;  %1061 = vmax.xlane.f32.xlu0 %v1060_v3  ;;  %v1042_v39 = vpop.xlane.xlu1 %1041  ;;  %v2493_v0 = vld [vmem:[%s2731_s3] sm:$0xff]  ;;  %v1586_v3 = vld [vmem:[%s2730_s2 + $0x18] sm:$0xff] }
 0x4d6   :  { %v1099_v15 = vsub.f32 %v2352_v43, %v1042_v39  ;;  %v1100_v56 = vsub.f32 %v2354_v4, %v1042_v39  ;;  %v2453_v4 = vmul.f32 0.35355338, %v966_v31  ;;  %v969_v12 = vpop.f32.mrf.mxu3  ;;  %1581 = vmatmul.msk.bf16.vlgmr.msrb.gmra.mxu0 %vm61_vm1, %v2493_v0  ;;  %1582 = vmatmul.msk.bf16.vlgmr.msrb.gmra.mxu1 %vm61_vm1, %v2493_v0  ;;  %v1585_v39 = vld [vmem:[%s2730_s2 + $0x10] sm:$0xff] }
 0x4d7   :  { %v2465_v63 = vmul.f32 0.35355338, %v969_v12 }
 0x4d8   :  { %v2445_v27 = vpop.eup %1753  ;;  %v1147_v35 = vmul.f32 1.442695, %v1099_v15  ;;  %v1149_v6 = vmul.f32 1.442695, %v1100_v56  ;;  %v1067_v33 = vsel %vm240_vm2, %v2453_v4, -inf  ;;  %v803_v15 = vpack.c.bf16 %v1586_v3, %v1586_v3 }
 0x4d9   :  { %v2447_v19 = vpop.eup %1755  ;;  %v1068_v9 = vmax.f32 %v2457_v47, %v1067_v33  ;;  %v1071_v41 = vsel %vm240_vm2, %v2465_v63, -inf  ;;  %v802_v56 = vpack.c.bf16 %v1585_v39, %v1585_v39 }
 0x4da   :  { %1757 = vpow2.f32 %v1147_v35  ;;  %v1215_v28 = vsel %vm240_vm2, %v2447_v19, 0.0  ;;  %v1072_v52 = vmax.f32 %v2471_v44, %v1071_v41  ;;  %v1367_v51 = vsel %vm240_vm2, %v803_v15, 0 }
 0x4db   :  { %1759 = vpow2.f32 %v1149_v6  ;;  %v1216_v43 = vadd.f32 %v2445_v27, %v1215_v28  ;;  %1376 = vmatpush.bf16.xpose.msra.mxu0 %v802_v56  ;;  %1430 = vmatpush.bf16.xpose.msra.mxu1 %v1367_v51 }
 0x4dd   :  { %1065 = vmax.xlane.f32.xlu1 %v1064_v42  ;;  %1217 = vadd.xlane.f32.xlu0 %v1216_v43  ;;  %v1046_v24 = vpop.xlane.xlu0 %1045 }
 0x4de   :  { %v1101_v62 = vsub.f32 %v2359_v54, %v1046_v24  ;;  %v1102_v53 = vsub.f32 %v2361_v30, %v1046_v24  ;;  %v971_v7 = vpop.f32.mrf.mxu3 }
 0x4df   :  { %v2483_v8 = vmul.f32 0.35355338, %v971_v7 }
 0x4e0   :  { %v2459_v1 = vpop.eup %1757  ;;  %v1151_v14 = vmul.f32 1.442695, %v1101_v62  ;;  %v1153_v57 = vmul.f32 1.442695, %v1102_v53 }
 0x4e1   :  { %v2463_v49 = vpop.eup %1759  ;;  %v1075_v16 = vsel %vm240_vm2, %v2483_v8, -inf }
 0x4e2   :  { %1761 = vpow2.f32 %v1151_v14  ;;  %v1219_v54 = vsel %vm240_vm2, %v2463_v49, 0.0  ;;  %v1076_v23 = vmax.f32 %v2485_v48, %v1075_v16 }
 0x4e3   :  { %1763 = vpow2.f32 %v1153_v57  ;;  %v1220_v30 = vadd.f32 %v2459_v1, %v1219_v54 }
 0x4e5   :  { %1221 = vadd.xlane.f32.xlu1 %v1220_v30  ;;  %1069 = vmax.xlane.f32.xlu0 %v1068_v9 }
 0x4e8   :  { %v2475_v36 = vpop.eup %1761 }
 0x4e9   :  { %v2477_v50 = vpop.eup %1763 }
 0x4ea   :  { %v1223_v60 = vsel %vm240_vm2, %v2477_v50, 0.0 }
 0x4eb   :  { %v1224_v10 = vadd.f32 %v2475_v36, %v1223_v60 }
 0x4ed   :  { %1073 = vmax.xlane.f32.xlu1 %v1072_v52  ;;  %1225 = vadd.xlane.f32.xlu0 %v1224_v10 }
 0x4f5   :  { %1077 = vmax.xlane.f32.xlu0 %v1076_v23 }
 0x528   :  { %v1198_v31 = vpop.xlane.xlu1 %1197 }
 0x529   :  { %1765 = vrcp.f32 %v1198_v31 }
 0x52f   :  { %v1766_v24 = vpop.eup %1765 }
 0x530   :  { %v1050_v35 = vpop.xlane.xlu1 %1049  ;;  %v1202_v6 = vpop.xlane.xlu0 %1201  ;;  %v1285_v53 = vmul.f32 %v1766_v24, %v2366_v25  ;;  %v1286_v14 = vmul.f32 %v1766_v24, %v2368_v38 }
 0x531   :  { %v1103_v42 = vsub.f32 %v2375_v26, %v1050_v35  ;;  %v1104_v20 = vsub.f32 %v2370_v18, %v1050_v35  ;;  %1767 = vrcp.f32 %v1202_v6 }
 0x533   :  { %v1155_v28 = vmul.f32 1.442695, %v1103_v42  ;;  %v1157_v43 = vmul.f32 1.442695, %v1104_v20 }
 0x535   :  { %1769 = vpow2.f32 %v1155_v28 }
 0x536   :  { %1771 = vpow2.f32 %v1157_v43 }
 0x537   :  { %v1768_v62 = vpop.eup %1767 }
 0x538   :  { %v1287_v57 = vmul.f32 %v1768_v62, %v2381_v45  ;;  %v1288_v33 = vmul.f32 %v1768_v62, %v2383_v55  ;;  %v1206_v12 = vpop.xlane.xlu1 %1205  ;;  %v1054_v54 = vpop.xlane.xlu0 %1053 }
 0x539   :  { %v1105_v26 = vsub.f32 %v2393_v46, %v1054_v54  ;;  %v1106_v18 = vsub.f32 %v2389_v59, %v1054_v54 }
 0x53a   :  { %v1322_v30 = vpack.c.bf16 %v1288_v33, %v1286_v14  ;;  %v1321_v9 = vpack.c.bf16 %v1287_v57, %v1285_v53 }
 0x53b   :  { %v2514_v22 = vpop.eup %1769  ;;  %v1159_v41 = vmul.f32 1.442695, %v1105_v26  ;;  %v1161_v52 = vmul.f32 1.442695, %v1106_v18 }
 0x53c   :  { %v2516_v60 = vpop.eup %1771  ;;  %1377 = vmatmul.bf16.vlgmr.msra.gmra.mxu0 %v1321_v9  ;;  %1605 = vmatmul.msk.bf16.vlgmr.msra.gmra.mxu1 %vm240_vm2, %v1322_v30 }
 0x53d   :  { %1773 = vpow2.f32 %v1159_v41  ;;  %v1227_v25 = vsel %vm240_vm2, %v2516_v60, 0.0 }
 0x53e   :  { %1775 = vpow2.f32 %v1161_v52  ;;  %v1228_v38 = vadd.f32 %v2514_v22, %v1227_v25 }
 0x53f   :  { %1777 = vrcp.f32 %v1206_v12 }
 0x540   :  { %1229 = vadd.xlane.f32.xlu1 %v1228_v38  ;;  %v1058_v45 = vpop.xlane.xlu1 %1057  ;;  %v1210_v55 = vpop.xlane.xlu0 %1209 }
 0x541   :  { %v1107_v59 = vsub.f32 %v2407_v32, %v1058_v45  ;;  %v1108_v46 = vsub.f32 %v2401_v34, %v1058_v45  ;;  %1779 = vrcp.f32 %v1210_v55 }
 0x543   :  { %v2524_v7 = vpop.eup %1773  ;;  %v1163_v10 = vmul.f32 1.442695, %v1107_v59  ;;  %v1165_v11 = vmul.f32 1.442695, %v1108_v46 }
 0x544   :  { %v2526_v16 = vpop.eup %1775 }
 0x545   :  { %v1778_v23 = vpop.eup %1777  ;;  %1781 = vpow2.f32 %v1163_v10  ;;  %v1231_v3 = vsel %vm240_vm2, %v2526_v16, 0.0 }
 0x546   :  { %1783 = vpow2.f32 %v1165_v11  ;;  %v1232_v39 = vadd.f32 %v2524_v7, %v1231_v3  ;;  %v1289_v34 = vmul.f32 %v1778_v23, %v2395_v17  ;;  %v1290_v31 = vmul.f32 %v1778_v23, %v2399_v21 }
 0x547   :  { %v1780_v15 = vpop.eup %1779 }
 0x548   :  { %1233 = vadd.xlane.f32.xlu0 %v1232_v39  ;;  %v1214_v32 = vpop.xlane.xlu1 %1213  ;;  %v1062_v56 = vpop.xlane.xlu0 %1061  ;;  %v1291_v51 = vmul.f32 %v1780_v15, %v2413_v58  ;;  %v1292_v35 = vmul.f32 %v1780_v15, %v2415_v40 }
 0x549   :  { %v1109_v6 = vsub.f32 %v2425_v5, %v1062_v56  ;;  %v1110_v42 = vsub.f32 %v2421_v2, %v1062_v56 }
 0x54a   :  { %v1323_v20 = vpack.c.bf16 %v1291_v51, %v1289_v34  ;;  %v1324_v28 = vpack.c.bf16 %v1292_v35, %v1290_v31 }
 0x54b   :  { %v2537_v43 = vpop.eup %1781  ;;  %v1167_v24 = vmul.f32 1.442695, %v1109_v6  ;;  %v1169_v62 = vmul.f32 1.442695, %v1110_v42 }
 0x54c   :  { %v2539_v53 = vpop.eup %1783  ;;  %1382 = vmatmul.bf16.gmra.mxu0 %v1323_v20  ;;  %1606 = vmatmul.msk.bf16.gmra.mxu1 %vm240_vm2, %v1324_v28 }
 0x54d   :  { %1785 = vpow2.f32 %v1167_v24  ;;  %v1235_v17 = vsel %vm240_vm2, %v2539_v53, 0.0  ;;  %v974_v24 = vpop.f32.mrf.mxu3 }
 0x54e   :  { %1787 = vpow2.f32 %v1169_v62  ;;  %v1236_v21 = vadd.f32 %v2537_v43, %v1235_v17 }
 0x54f   :  { %1789 = vrcp.f32 %v1214_v32 }
 0x550   :  { %1237 = vadd.xlane.f32.xlu1 %v1236_v21  ;;  %v1066_v58 = vpop.xlane.xlu1 %1065  ;;  %v1218_v40 = vpop.xlane.xlu0 %1217 }
 0x551   :  { %v1111_v2 = vsub.f32 %v2439_v61, %v1066_v58  ;;  %v1112_v5 = vsub.f32 %v2433_v29, %v1066_v58  ;;  %1791 = vrcp.f32 %v1218_v40 }
 0x553   :  { %v2547_v14 = vpop.eup %1785  ;;  %v1171_v57 = vmul.f32 1.442695, %v1111_v2  ;;  %v1173_v33 = vmul.f32 1.442695, %v1112_v5 }
 0x554   :  { %v2549_v12 = vpop.eup %1787 }
 0x555   :  { %v1790_v54 = vpop.eup %1789  ;;  %1793 = vpow2.f32 %v1171_v57  ;;  %v1239_v26 = vsel %vm240_vm2, %v2549_v12, 0.0 }
 0x556   :  { %1795 = vpow2.f32 %v1173_v33  ;;  %v1240_v18 = vadd.f32 %v2547_v14, %v1239_v26  ;;  %v1294_v61 = vmul.f32 %v1790_v54, %v2431_v13  ;;  %v1293_v52 = vmul.f32 %v1790_v54, %v2427_v37  ;;  %v976_v33 = vpop.f32.mrf.mxu3 }
 0x557   :  { %v1792_v30 = vpop.eup %1791 }
 0x558   :  { %v1296_v29 = vmul.f32 %v1792_v30, %v2447_v19  ;;  %1241 = vadd.xlane.f32.xlu0 %v1240_v18  ;;  %v1222_v9 = vpop.xlane.xlu1 %1221  ;;  %v1070_v41 = vpop.xlane.xlu0 %1069  ;;  %v1295_v25 = vmul.f32 %v1792_v30, %v2445_v27 }
 0x559   :  { %v1113_v38 = vsub.f32 %v2457_v47, %v1070_v41  ;;  %v1114_v45 = vsub.f32 %v2453_v4, %v1070_v41 }
 0x55a   :  { %v1325_v55 = vpack.c.bf16 %v1295_v25, %v1293_v52  ;;  %v1326_v59 = vpack.c.bf16 %v1296_v29, %v1294_v61  ;;  %v2605_v61 = vmul.f32 0.35355338, %v976_v33  ;;  %v2612_v52 = vpop.f32.mrf.mxu0  ;;  %v2614_v25 = vpop.f32.mrf.mxu1 }
 0x55b   :  { %v2560_v46 = vpop.eup %1793  ;;  %v1175_v10 = vmul.f32 1.442695, %v1113_v38  ;;  %v1177_v11 = vmul.f32 1.442695, %v1114_v45 }
 0x55c   :  { %v2562_v13 = vpop.eup %1795  ;;  %1387 = vmatmul.bf16.gmra.mxu0 %v1325_v55  ;;  %1607 = vmatmul.msk.bf16.gmra.mxu1 %vm240_vm2, %v1326_v59 }
 0x55d   :  { %1797 = vpow2.f32 %v1175_v10  ;;  %v1243_v37 = vsel %vm240_vm2, %v2562_v13, 0.0 }
 0x55e   :  { %1799 = vpow2.f32 %v1177_v11  ;;  %v1244_v27 = vadd.f32 %v2560_v46, %v1243_v37 }
 0x55f   :  { %1801 = vrcp.f32 %v1222_v9  ;;  %v1083_v9 = vsel %vm240_vm2, %v2605_v61, -inf }
 0x560   :  { %1245 = vadd.xlane.f32.xlu1 %v1244_v27  ;;  %v1074_v19 = vpop.xlane.xlu1 %1073  ;;  %v1226_v4 = vpop.xlane.xlu0 %1225 }
 0x561   :  { %v1115_v47 = vsub.f32 %v2471_v44, %v1074_v19  ;;  %v1116_v23 = vsub.f32 %v2465_v63, %v1074_v19  ;;  %1803 = vrcp.f32 %v1226_v4 }
 0x562   :  { %v2616_v38 = vpop.f32.mrf.mxu0  ;;  %v2618_v45 = vpop.f32.mrf.mxu1 }
 0x563   :  { %v2570_v3 = vpop.eup %1797  ;;  %v1179_v39 = vmul.f32 1.442695, %v1115_v47  ;;  %v1181_v15 = vmul.f32 1.442695, %v1116_v23 }
 0x564   :  { %v2572_v32 = vpop.eup %1799 }
 0x565   :  { %v1802_v56 = vpop.eup %1801  ;;  %1805 = vpow2.f32 %v1179_v39  ;;  %v1247_v34 = vsel %vm240_vm2, %v2572_v32, 0.0 }
 0x566   :  { %1807 = vpow2.f32 %v1181_v15  ;;  %v1248_v51 = vadd.f32 %v2570_v3, %v1247_v34  ;;  %v1298_v44 = vmul.f32 %v1802_v56, %v2463_v49  ;;  %v1297_v6 = vmul.f32 %v1802_v56, %v2459_v1 }
 0x567   :  { %v1804_v31 = vpop.eup %1803 }
 0x568   :  { %v1300_v63 = vmul.f32 %v1804_v31, %v2477_v50  ;;  %1249 = vadd.xlane.f32.xlu0 %v1248_v51  ;;  %v1078_v35 = vpop.xlane.xlu0 %1077  ;;  %v1299_v42 = vmul.f32 %v1804_v31, %v2475_v36  ;;  %v920_v50 = vpop.f32.mrf.mxu2 }
 0x569   :  { %v1117_v20 = vsub.f32 %v2485_v48, %v1078_v35  ;;  %v1118_v28 = vsub.f32 %v2483_v8, %v1078_v35  ;;  %v2591_v8 = vmul.f32 0.35355338, %v974_v24  ;;  %v2593_v48 = vmul.f32 0.35355338, %v920_v50 }
 0x56a   :  { %v1327_v62 = vpack.c.bf16 %v1299_v42, %v1297_v6  ;;  %v1328_v17 = vpack.c.bf16 %v1300_v63, %v1298_v44 }
 0x56b   :  { %v2583_v21 = vpop.eup %1805  ;;  %v1183_v58 = vmul.f32 1.442695, %v1117_v20  ;;  %v1185_v40 = vmul.f32 1.442695, %v1118_v28  ;;  %v1079_v5 = vsel %vm240_vm2, %v2591_v8, -inf }
 0x56c   :  { %v2585_v49 = vpop.eup %1807  ;;  %1392 = vmatmul.bf16.gmra.mxu0 %v1327_v62  ;;  %1608 = vmatmul.msk.bf16.gmra.mxu1 %vm240_vm2, %v1328_v17  ;;  %v1080_v26 = vmax.f32 %v2593_v48, %v1079_v5 }
 0x56d   :  { %1809 = vpow2.f32 %v1183_v58  ;;  %v1251_v1 = vsel %vm240_vm2, %v2585_v49, 0.0 }
 0x56e   :  { %1811 = vpow2.f32 %v1185_v40  ;;  %v1252_v36 = vadd.f32 %v2583_v21, %v1251_v1 }
 0x570   :  { %1253 = vadd.xlane.f32.xlu1 %v1252_v36  ;;  %v922_v30 = vpop.f32.mrf.mxu2 }
 0x571   :  { %v2607_v29 = vmul.f32 0.35355338, %v922_v30 }
 0x573   :  { %v2595_v2 = vpop.eup %1809  ;;  %v1084_v41 = vmax.f32 %v2607_v29, %v1083_v9 }
 0x574   :  { %v2599_v57 = vpop.eup %1811 }
 0x575   :  { %v1255_v54 = vsel %vm240_vm2, %v2599_v57, 0.0 }
 0x576   :  { %v1256_v18 = vadd.f32 %v2595_v2, %v1255_v54 }
 0x578   :  { %1081 = vmax.xlane.f32.xlu1 %v1080_v26  ;;  %1257 = vadd.xlane.f32.xlu0 %v1256_v18 }
 0x580   :  { %1085 = vmax.xlane.f32.xlu0 %v1084_v41 }
 0x5b3   :  { %v1230_v55 = vpop.xlane.xlu1 %1229 }
 0x5b4   :  { %1813 = vrcp.f32 %v1230_v55 }
 0x5b9   :  { %v1378_v59 = vpop.f32.mrf.mxu0  ;;  %v1432_v10 = vpop.f32.mrf.mxu1 }
 0x5ba   :  { %v2620_v11 = vadd.f32 %v1432_v10, %v1378_v59  ;;  %v1814_v27 = vpop.eup %1813 }
 0x5bb   :  { %v1234_v37 = vpop.xlane.xlu0 %1233  ;;  %v1302_v39 = vmul.f32 %v1814_v27, %v2516_v60  ;;  %v1301_v56 = vmul.f32 %v1814_v27, %v2514_v22 }
 0x5bc   :  { %1815 = vrcp.f32 %v1234_v37  ;;  %v1842_v37 = vmov 0  }
 0x5bd   :  { %1623 = vset.pattern.permute.xlu1 %v1842_v37  ;;  %1624 = vset.pattern.permute.xlu0 %v1842_v37 }
 0x5c1   :  { %v1380_v19 = vpop.f32.mrf.mxu0  ;;  %v1434_v4 = vpop.f32.mrf.mxu1 }
 0x5c2   :  { %v1816_v47 = vpop.eup %1815  ;;  %v2622_v23 = vadd.f32 %v1434_v4, %v1380_v19 }
 0x5c3   :  { %v1304_v15 = vmul.f32 %v1816_v47, %v2526_v16  ;;  %v1303_v34 = vmul.f32 %v1816_v47, %v2524_v7  ;;  %v1238_v63 = vpop.xlane.xlu1 %1237 }
 0x5c4   :  { %v1477_v51 = vpack.c.bf16 %v2622_v23, %v2620_v11  ;;  %1817 = vrcp.f32 %v1238_v63 }
 0x5c5   :  { %v1329_v31 = vpack.c.bf16 %v1303_v34, %v1301_v56  ;;  %v1330_v44 = vpack.c.bf16 %v1304_v15, %v1302_v39 }
 0x5c7   :  { %1397 = vmatmul.bf16.gmra.mxu0 %v1329_v31  ;;  %1609 = vmatmul.msk.bf16.gmra.mxu1 %vm240_vm2, %v1330_v44 }
 0x5c9   :  { %v1383_v35 = vpop.f32.mrf.mxu0  ;;  %v1437_v6 = vpop.f32.mrf.mxu1 }
 0x5ca   :  { %v2631_v42 = vadd.f32 %v1437_v6, %v1383_v35  ;;  %v1818_v16 = vpop.eup %1817 }
 0x5cb   :  { %v1242_v60 = vpop.xlane.xlu0 %1241  ;;  %v1306_v24 = vmul.f32 %v1818_v16, %v2539_v53  ;;  %v1305_v17 = vmul.f32 %v1818_v16, %v2537_v43 }
 0x5cc   :  { %1819 = vrcp.f32 %v1242_v60 }
 0x5d1   :  { %v1385_v22 = vpop.f32.mrf.mxu0  ;;  %v1439_v20 = vpop.f32.mrf.mxu1 }
 0x5d2   :  { %v1820_v7 = vpop.eup %1819  ;;  %v2633_v28 = vadd.f32 %v1439_v20, %v1385_v22 }
 0x5d3   :  { %v1308_v62 = vmul.f32 %v1820_v7, %v2549_v12  ;;  %v1307_v58 = vmul.f32 %v1820_v7, %v2547_v14  ;;  %v1246_v36 = vpop.xlane.xlu1 %1245 }
 0x5d4   :  { %v1478_v40 = vpack.c.bf16 %v2633_v28, %v2631_v42  ;;  %1821 = vrcp.f32 %v1246_v36 }
 0x5d5   :  { %v1331_v50 = vpack.c.bf16 %v1307_v58, %v1305_v17  ;;  %v1332_v1 = vpack.c.bf16 %v1308_v62, %v1306_v24  ;;  %v23_v17 = vld [vmem:[%s2732_s4] sm:$0xff]  ;;  %v24_v58 = vld [vmem:[%s2732_s4 + $0x8] sm:$0xff] }
 0x5d7   :  { %1402 = vmatmul.bf16.gmra.mxu0 %v1331_v50  ;;  %1610 = vmatmul.msk.bf16.gmra.mxu1 %vm240_vm2, %v1332_v1 }
 0x5d9   :  { %v1388_v5 = vpop.f32.mrf.mxu0  ;;  %v1442_v33 = vpop.f32.mrf.mxu1 }
 0x5da   :  { %v2642_v54 = vadd.f32 %v1442_v33, %v1388_v5  ;;  %v1822_v12 = vpop.eup %1821 }
 0x5db   :  { %v1250_v53 = vpop.xlane.xlu0 %1249  ;;  %v1310_v18 = vmul.f32 %v1822_v12, %v2562_v13  ;;  %v1309_v55 = vmul.f32 %v1822_v12, %v2560_v46 }
 0x5dc   :  { %1823 = vrcp.f32 %v1250_v53 }
 0x5e1   :  { %v1390_v43 = vpop.f32.mrf.mxu0  ;;  %v1444_v26 = vpop.f32.mrf.mxu1 }
 0x5e2   :  { %v1824_v14 = vpop.eup %1823  ;;  %v2645_v30 = vadd.f32 %v1444_v26, %v1390_v43 }
 0x5e3   :  { %v1312_v9 = vmul.f32 %v1824_v14, %v2572_v32  ;;  %v1254_v41 = vpop.xlane.xlu1 %1253  ;;  %v1311_v59 = vmul.f32 %v1824_v14, %v2570_v3 }
 0x5e4   :  { %v1479_v10 = vpack.c.bf16 %v2645_v30, %v2642_v54  ;;  %1825 = vrcp.f32 %v1254_v41 }
 0x5e5   :  { %v1333_v27 = vpack.c.bf16 %v1311_v59, %v1309_v55  ;;  %v1334_v19 = vpack.c.bf16 %v1312_v9, %v1310_v18 }
 0x5e7   :  { %1407 = vmatmul.bf16.gmra.mxu0 %v1333_v27  ;;  %1611 = vmatmul.msk.bf16.gmra.mxu1 %vm240_vm2, %v1334_v19 }
 0x5e9   :  { %v1393_v13 = vpop.f32.mrf.mxu0  ;;  %v1447_v4 = vpop.f32.mrf.mxu1 }
 0x5ea   :  { %v2653_v32 = vadd.f32 %v1447_v4, %v1393_v13  ;;  %v1826_v34 = vpop.eup %1825 }
 0x5eb   :  { %v1082_v47 = vpop.xlane.xlu1 %1081  ;;  %v1258_v46 = vpop.xlane.xlu0 %1257  ;;  %v1314_v44 = vmul.f32 %v1826_v34, %v2585_v49  ;;  %v1313_v6 = vmul.f32 %v1826_v34, %v2583_v21 }
 0x5ec   :  { %v1119_v3 = vsub.f32 %v2593_v48, %v1082_v47  ;;  %v1120_v39 = vsub.f32 %v2591_v8, %v1082_v47  ;;  %1827 = vrcp.f32 %v1258_v46 }
 0x5ee   :  { %v1187_v15 = vmul.f32 1.442695, %v1119_v3  ;;  %v1189_v56 = vmul.f32 1.442695, %v1120_v39 }
 0x5f0   :  { %1829 = vpow2.f32 %v1187_v15 }
 0x5f1   :  { %1831 = vpow2.f32 %v1189_v56  ;;  %v1395_v50 = vpop.f32.mrf.mxu0  ;;  %v1449_v1 = vpop.f32.mrf.mxu1 }
 0x5f2   :  { %v1828_v31 = vpop.eup %1827 }
 0x5f3   :  { %v1316_v63 = vmul.f32 %v1828_v31, %v2599_v57  ;;  %v1086_v35 = vpop.xlane.xlu0 %1085  ;;  %v1315_v60 = vmul.f32 %v1828_v31, %v2595_v2 }
 0x5f4   :  { %v1121_v48 = vsub.f32 %v2607_v29, %v1086_v35  ;;  %v1122_v8 = vsub.f32 %v2605_v61, %v1086_v35 }
 0x5f5   :  { %v1335_v16 = vpack.c.bf16 %v1315_v60, %v1313_v6  ;;  %v1336_v22 = vpack.c.bf16 %v1316_v63, %v1314_v44 }
 0x5f6   :  { %v1830_v20 = vpop.eup %1829  ;;  %v1191_v7 = vmul.f32 1.442695, %v1121_v48  ;;  %v1193_v24 = vmul.f32 1.442695, %v1122_v8 }
 0x5f7   :  { %v1832_v62 = vpop.eup %1831  ;;  %1412 = vmatmul.bf16.gmra.mxu0 %v1335_v16  ;;  %1612 = vmatmul.msk.bf16.gmra.mxu1 %vm240_vm2, %v1336_v22 }
 0x5f8   :  { %1833 = vpow2.f32 %v1191_v7  ;;  %v1259_v49 = vsel %vm240_vm2, %v1832_v62, 0.0 }
 0x5f9   :  { %1835 = vpow2.f32 %v1193_v24  ;;  %v1260_v21 = vadd.f32 %v1830_v20, %v1259_v49 }
 0x5fb   :  { %1261 = vadd.xlane.f32.xlu1 %v1260_v21 }
 0x5fe   :  { %v1834_v2 = vpop.eup %1833 }
 0x5ff   :  { %v1836_v57 = vpop.eup %1835 }
 0x600   :  { %v1263_v29 = vsel %vm240_vm2, %v1836_v57, 0.0 }
 0x601   :  { %v1264_v61 = vadd.f32 %v1834_v2, %v1263_v29 }
 0x603   :  { %1265 = vadd.xlane.f32.xlu0 %v1264_v61 }
 0x614   :  { %714 = vperm.xlu1 %1623, %v23_v17  }
 0x617   :  { %719 = vperm.xlu0 %1624, %v24_v58  }
 0x644   :  { %v1398_v36 = vpop.f32.mrf.mxu0  ;;  %v1452_v5 = vpop.f32.mrf.mxu1 }
 0x645   :  { %v1453_v33 = vadd.f32 %v1452_v5, %v1398_v36  ;;  %v1493_v36 = vsel %vm61_vm1, %v1479_v10, 0  ;;  %v1490_v5 = vsel %vm61_vm1, %v1478_v40, 0 }
 0x64c   :  { %v1400_v53 = vpop.f32.mrf.mxu0  ;;  %v1454_v12 = vpop.f32.mrf.mxu1 }
 0x64d   :  { %v1455_v43 = vadd.f32 %v1454_v12, %v1400_v53 }
 0x64f   :  { %v1481_v26 = vpack.c.bf16 %v1455_v43, %v1453_v33 }
 0x654   :  { %v1403_v14 = vpop.f32.mrf.mxu0  ;;  %v1457_v18 = vpop.f32.mrf.mxu1 }
 0x65c   :  { %v1405_v9 = vpop.f32.mrf.mxu0  ;;  %v1459_v41 = vpop.f32.mrf.mxu1 }
 0x65d   :  { %v1460_v21 = vadd.f32 %v1459_v41, %v1405_v9 }
 0x664   :  { %v1408_v55 = vpop.f32.mrf.mxu0  ;;  %v1462_v59 = vpop.f32.mrf.mxu1 }
 0x665   :  { %v1463_v22 = vadd.f32 %v1462_v59, %v1408_v55 }
 0x66c   :  { %v1410_v37 = vpop.f32.mrf.mxu0  ;;  %v1464_v27 = vpop.f32.mrf.mxu1 }
 0x66d   :  { %v1465_v16 = vadd.f32 %v1464_v27, %v1410_v37 }
 0x66e   :  { %v1262_v19 = vpop.xlane.xlu1 %1261 }
 0x66f   :  { %1837 = vrcp.f32 %v1262_v19  ;;  %v1483_v7 = vpack.c.bf16 %v1465_v16, %v1463_v22 }
 0x671   :  { %v1505_v29 = vsel %vm61_vm1, %v1483_v7, 0 }
 0x674   :  { %v1413_v13 = vpop.f32.mrf.mxu0  ;;  %v1467_v4 = vpop.f32.mrf.mxu1 }
 0x675   :  { %v1838_v46 = vpop.eup %1837  ;;  %v1468_v56 = vadd.f32 %v1467_v4, %v1413_v13 }
 0x676   :  { %v1266_v47 = vpop.xlane.xlu0 %1265  ;;  %v1318_v31 = vmul.f32 %v1838_v46, %v1832_v62  ;;  %v1317_v63 = vmul.f32 %v1838_v46, %v1830_v20 }
 0x677   :  { %1839 = vrcp.f32 %v1266_v47 }
 0x67c   :  { %v1415_v3 = vpop.f32.mrf.mxu0  ;;  %v1469_v39 = vpop.f32.mrf.mxu1 }
 0x67d   :  { %v1840_v15 = vpop.eup %1839  ;;  %v1470_v34 = vadd.f32 %v1469_v39, %v1415_v3 }
 0x67e   :  { %v1320_v44 = vmul.f32 %v1840_v15, %v1836_v57  ;;  %v1319_v35 = vmul.f32 %v1840_v15, %v1834_v2 }
 0x67f   :  { %v1484_v6 = vpack.c.bf16 %v1470_v34, %v1468_v56 }
 0x680   :  { %v1337_v60 = vpack.c.bf16 %v1319_v35, %v1317_v63  ;;  %v1338_v48 = vpack.c.bf16 %v1320_v44, %v1318_v31 }
 0x681   :  { %v1508_v8 = vsel %vm61_vm1, %v1484_v6, 0 }
 0x682   :  { %1417 = vmatmul.bf16.gmra.mxu0 %v1337_v60  ;;  %1613 = vmatmul.msk.bf16.gmra.mxu1 %vm240_vm2, %v1338_v48 }
 0x683   :  { %1513 = vmatpush.bf16.xpose.msra.mxu2 %v1508_v8 }
 0x686   :  { %v715_v24 = vpop.permute.xlu1 %714 }
 0x687   :  { %v767_v49 = vadd.f32 %v2612_v52, %v715_v24  ;;  %v781_v62 = vadd.f32 %v2614_v25, %v715_v24  ;;  %v1458_v52 = vadd.f32 %v1457_v18, %v1403_v14 }
 0x689   :  { %785 = vst [vmem:[%s2733_s5] sm:$0xff] %v767_v49  ;;  %v720_v20 = vpop.permute.xlu0 %719  ;;  %v1482_v25 = vpack.c.bf16 %v1460_v21, %v1458_v52 }
 0x68a   :  { %787 = vst.msk [vmem:[%s2733_s5 + $0x8] sm:$0xff] %vm786_vm4, %v781_v62  ;;  %v769_v2 = vadd.f32 %v2616_v38, %v720_v20  ;;  %v783_v57 = vadd.f32 %v2618_v45, %v720_v20  ;;  %v1450_v38 = vadd.f32 %v1449_v1, %v1395_v50  ;;  %v1499_v45 = vsel %vm61_vm1, %v1481_v26, 0 }
 0x68b   :  { %1514 = vmatpush.bf16.xpose.msra.mxu2 %v1505_v29  ;;  %v1502_v61 = vsel %vm61_vm1, %v1482_v25, 0 }
 0x68c   :  { %788 = vst [vmem:[%s2733_s5 + $0x10] sm:$0xff] %v769_v2  ;;  %v1480_v17 = vpack.c.bf16 %v1450_v38, %v2653_v32  ;;  %v1487_v32 = vsel %vm61_vm1, %v1477_v51, 0 }
 0x68d   :  { %789 = vst.msk [vmem:[%s2733_s5 + $0x18] sm:$0xff] %vm786_vm4, %v783_v57 }
 0x68e   :  { %v1496_v58 = vsel %vm61_vm1, %v1480_v17, 0 }
 0x693   :  { %1515 = vmatpush.bf16.xpose.msra.mxu2 %v1502_v61 }
 0x69b   :  { %1516 = vmatpush.bf16.xpose.msra.mxu2 %v1499_v45 }
 0x6a3   :  { %1517 = vmatpush.bf16.xpose.msra.mxu2 %v1496_v58 }
 0x6ab   :  { %1518 = vmatpush.bf16.xpose.msra.mxu2 %v1493_v36 }
 0x6b3   :  { %1519 = vmatpush.bf16.xpose.msra.mxu2 %v1490_v5 }
 0x6bb   :  { %1520 = vmatpush.bf16.xpose.msra.mxu2 %v1487_v32 }
 0x6c2   :  { %1614 = vmatmul.msk.bf16.vlgmr.msra.gmra.mxu2 %vm61_vm1, %v2493_v0 }
 0x6ff   :  { %v1418_v50 = vpop.f32.mrf.mxu0  ;;  %v1472_v54 = vpop.f32.mrf.mxu1 }
 0x700   :  { %v1473_v1 = vadd.f32 %v1472_v54, %v1418_v50 }
 0x707   :  { %v1420_v30 = vpop.f32.mrf.mxu0  ;;  %v1474_v10 = vpop.f32.mrf.mxu1 }
 0x708   :  { %v1475_v33 = vadd.f32 %v1474_v10, %v1420_v30 }
 0x70a   :  { %v1485_v53 = vpack.c.bf16 %v1475_v33, %v1473_v1 }
 0x70c   :  { %v1511_v42 = vsel %vm61_vm1, %v1485_v53, 0 }
 0x70d   :  { %1534 = vmatpush.bf16.xpose.msra.mxu3 %v1511_v42 }
 0x714   :  { %1615 = vmatmul.msk.bf16.vlgmr.msra.gmra.mxu3 %vm61_vm1, %v2493_v0 }
 0x745   :  { %v1522_v11 = vpop.f32.mrf.mxu2 }
 0x746   :  { %v1523_v23 = vadd.f32 %v1522_v11, %v715_v24 }
 0x748   :  { %1616 = vst [vmem:[%s2733_s5 + $0x20] sm:$0xff] %v1523_v23 }
 0x74d   :  { %v1524_v51 = vpop.f32.mrf.mxu2 }
 0x74e   :  { %v1525_v28 = vadd.f32 %v1524_v51, %v720_v20 }
 0x750   :  { %1618 = vst [vmem:[%s2733_s5 + $0x30] sm:$0xff] %v1525_v28 }
 0x797   :  { %v1536_v40 = vpop.f32.mrf.mxu3 }
 0x798   :  { %v1537_v12 = vadd.f32 %v1536_v40, %v715_v24 }
 0x79a   :  { %1617 = vst.msk [vmem:[%s2733_s5 + $0x28] sm:$0xff] %vm786_vm4, %v1537_v12 }
 0x79f   :  { %v1538_v0 = vpop.f32.mrf.mxu3 }
 0x7a0   :  { %v1539_v43 = vadd.f32 %v1538_v0, %v720_v20 }
 0x7a2   :  { %1619 = vst.msk [vmem:[%s2733_s5 + $0x38] sm:$0xff] %vm786_vm4, %v1539_v43 }

// kernel: nonlocal_spp_inception_block.6
= control target key start
LH: loop header
LB: loop body
LE: loop exit
PB: predicated region body
PF: predicated region fallthrough
CT: control target
= control target key end

     0   :  { %s1913_s19 = smov 116   ;;  %s1914_s20 = smov 115   ;;  %v3695_v7 = vmov 0.0   ;;  %v3693_v8 = vmov 0   ;;  %v3734_v12 = vmov 0  ;;  %v3751_v45 = vmov 0  ;;  %s3646_s0 = inlined_call_operand.vmem [shape: f32[8,384], index: 0, kind: input, shape index: {}]   ;;  %s3647_s1 = inlined_call_operand.vmem [shape: s32[1,384], index: 1, kind: input, shape index: {}]   ;;  %s3648_s2 = inlined_call_operand.vmem [shape: s32[1,384], index: 2, kind: input, shape index: {}]   ;;  %s3649_s4 = inlined_call_operand.vmem [shape: f32[8,1], index: 4, kind: input, shape index: {}]   ;;  %s3650_s3 = inlined_call_operand.vmem [shape: bf16[8,72], index: 3, kind: input, shape index: {}]   ;;  %s3651_s6 = inlined_call_operand.vmem [shape: f32[8,1], index: 6, kind: input, shape index: {}]   ;;  %s3652_s5 = inlined_call_operand.vmem [shape: bf16[8,72], index: 5, kind: input, shape index: {}]   ;;  %s3653_s10 = inlined_call_operand.vmem [shape: f32[8,1], index: 10, kind: input, shape index: {}]   ;;  %s3654_s9 = inlined_call_operand.vmem [shape: bf16[8,8], index: 9, kind: input, shape index: {}]   ;;  %s3655_s8 = inlined_call_operand.vmem [shape: f32[8,1], index: 8, kind: input, shape index: {}]   ;;  %s3656_s7 = inlined_call_operand.vmem [shape: bf16[8,72], index: 7, kind: input, shape index: {}]   ;;  %s3657_s11 = inlined_call_operand.vmem [shape: f32[8,384], index: 11, kind: output, shape index: {}]  }
   0x1   :  { %v2002_v0 = vld [vmem:[%s3646_s0 + $0x10] sm:$0xff]  ;;  %v2008_v2 = vld [vmem:[%s3646_s0] sm:$0xff]  ;;  %v2013_v3 = vld [vmem:[%s3646_s0 + $0x8] sm:$0xff]  ;;  %s1915_s25 = smov 127   ;;  %s1916_s26 = smov 117   ;;  %1707 = vset.pattern.permute.xlu1 %v3693_v8  ;;  %1908 = vset.pattern.permute.xlu2 %v3693_v8 }
   0x2   :  { %v1652_v1 = vpack.i.bf16 0.0, %v2002_v0  ;;  %v1657_v4 = vpack.i.bf16 %v2008_v2, %v2013_v3  ;;  %v1677_v5 = vpack.i.bf16 %v2002_v0, %v2013_v3  ;;  %s1917_s27 = smov 11   ;;  %s1918_s28 = smov 1   ;;  %v1702_v6 = vpack.i.bf16 0.0, %v2008_v2  ;;  %1909 = vset.pattern.permute.xlu0 %v3693_v8  ;;  %v2032_v9 = vld [vmem:[%s3647_s1] sm:$0x7] }
   0x3   :  { %s1919_s29 = smov 13   ;;  %s1920_s30 = smov 12   ;;  %v2037_v10 = vld [vmem:[%s3648_s2] sm:$0x7]  ;;  %vm227_vm0 = vcmp.ge.s32.totalorder %v2032_v9, 4294967295  ;;  %vm228_vm1 = vcmp.lt.s32.totalorder %v2032_v9, 11 }
   0x4   :  { %1653 = vrot.lane.b32.xlu1 %v1652_v1, %s1913_s19  ;;  %1643 = vrot.lane.b32.xlu0 %v1652_v1, %s1914_s20  ;;  %3733 = vst [vmem:[#allocation3_spill] sm:$0xff] %v2037_v10  ;;  %vm121_vm2 = vcmp.ge.s32.totalorder %v2037_v10, 4294967295  ;;  %vm229_vm3 = vmand %vm227_vm0, %vm228_vm1  ;;  %vm123_vm4 = vcmp.lt.s32.totalorder %v2037_v10, 11  ;;  %vm59_vm6 = vcmp.ge.s32.totalorder %v2037_v10, 1  ;;  %vm150_vm7 = vcmp.ge.s32.totalorder %v2032_v9, 0  ;;  %s1924_s18 = smov 89  }
   0x5   :  { %1663 = vrot.lane.b32.xlu2 %v1652_v1, %s1915_s25  ;;  %vm284_vm5 = vmand %vm229_vm3, %vm121_vm2  ;;  %vm151_vm8 = vcmp.lt.s32.totalorder %v2032_v9, 12  ;;  %vm3661_vm10 = vcmp.ge.s32.totalorder %v2037_v10, 0  ;;  %vm3663_vm11 = vcmp.lt.s32.totalorder %v2037_v10, 13  ;;  %vm3658_vm14 = vcmp.lt.s32.totalorder %v2037_v10, 12  ;;  %s1926_s22 = smov 125   ;;  %s1927_s23 = smov 36  }
   0x6   :  { %vm285_vm9 = vmand %vm284_vm5, %vm123_vm4  ;;  %s1929_s24 = smov 33   ;;  %s1932_s13 = smov 73  }
   0x7   :  { %vm230_vm12 = vmand %vm229_vm3, %vm59_vm6  ;;  %v286_v13 = vsel %vm285_vm9, 1, %v3693_v8  ;;  %s1933_s14 = smov 63   ;;  %s1934_s15 = smov 123  }
   0x8   :  { %vm2056_vm13 = vmand %vm150_vm7, %vm151_vm8  ;;  %vm56_vm8 = vcmp.ge.s32.totalorder %v2032_v9, 1  ;;  %v289_v14 = vperm.slane %v286_v13, 2  ;;  %v288_v24 = vperm.slane %v286_v13, 1  ;;  %v287_v25 = vperm.slane %v286_v13, 0  ;;  %s1935_s16 = smov 55   ;;  %s1936_s17 = smov 5  }
   0x9   :  { %v3735_v12 = vsel %vm2056_vm13, 4294967295, %v3734_v12  ;;  %vm257_vm15 = vmand %vm229_vm3, %vm3661_vm10 }
   0xa   :  { %3736 = vst [vmem:[#allocation4_spill] sm:$0xff] %v3735_v12  ;;  %vm231_vm0 = vmand %vm230_vm12, %vm3663_vm11  ;;  %vm57_vm12 = vcmp.lt.s32.totalorder %v2032_v9, 13 }
   0xb   :  { %vm180_vm1 = vmand %vm2056_vm13, %vm3661_vm10  ;;  %v2081_v15 = vsel %vm231_vm0, 1, %v3693_v8  ;;  %vm3659_vm0 = vcmask 1039360  }
   0xc   :  { %1648 = vrot.lane.b32.xlu0 %v1652_v1, %s1916_s26  ;;  %1658 = vrot.lane.b32.xlu1 %v1657_v4, %s1914_s20  ;;  %vm258_vm5 = vmand %vm257_vm15, %vm3658_vm14  ;;  %v235_v23 = vperm.slane %v2081_v15, 2  ;;  %v233_v42 = vperm.slane %v2081_v15, 0  ;;  %v234_v50 = vperm.slane %v2081_v15, 1  ;;  %v3761_v15 = vmov 0 }
   0xd   :  { %1668 = vrot.lane.b32.xlu2 %v1657_v4, %s1916_s26  ;;  %vm196_vm7 = vmand %vm2056_vm13, %vm121_vm2  ;;  %v2086_v17 = vsel %vm258_vm5, 1, %v3693_v8  ;;  %vm3660_vm5 = vcmask 941056  }
   0xe   :  { %vm181_vm3 = vmand %vm180_vm1, %vm3658_vm14  ;;  %vm2106_vm1 = vcmp.eq.s32.totalorder %v289_v14, 1  ;;  %v262_v29 = vperm.slane %v2086_v17, 2  ;;  %v260_v49 = vperm.slane %v2086_v17, 0  ;;  %v261_v51 = vperm.slane %v2086_v17, 1 }
   0xf   :  { %vm2090_vm9 = vmand %vm196_vm7, %vm123_vm4  ;;  %v2097_v21 = vsel %vm181_vm3, 1, %v3693_v8  ;;  %vm3662_vm3 = vcmask 1043456  }
  0x10   :  { %vm2099_vm15 = vmand %vm56_vm8, %vm57_vm12  ;;  %v185_v32 = vperm.slane %v2097_v21, 2  ;;  %v2115_v33 = vsel %vm2090_vm9, 1, %v3693_v8  ;;  %vm247_vm8 = vcmask 957440   ;;  %vm2131_vm9 = vcmp.eq.s32.totalorder %v235_v23, 1 }
  0x11   :  { %vm122_vm7 = vmand %vm2099_vm15, %vm121_vm2  ;;  %vm2135_vm2 = vcmp.eq.s32.totalorder %v288_v24, 1  ;;  %vm2139_vm12 = vcmp.eq.s32.totalorder %v287_v25, 1  ;;  %v201_v41 = vperm.slane %v2115_v33, 2  ;;  %v183_v38 = vperm.slane %v2097_v21, 0 }
  0x12   :  { %vm153_vm14 = vmand %vm2056_vm13, %vm59_vm6  ;;  %vm2154_vm10 = vcmp.eq.s32.totalorder %v185_v32, 1  ;;  %vm3767_vm13 = vcmask 941056  }
  0x13   :  { %v3752_v45 = vsel %vm2154_vm10, 4294967295, %v3751_v45 }
  0x14   :  { %1673 = vrot.lane.b32.xlu0 %v1657_v4, %s1913_s19  ;;  %1678 = vrot.lane.b32.xlu1 %v1677_v5, %s1917_s27  ;;  %s1925_s19 = smov 92  }
  0x15   :  { %1683 = vrot.lane.b32.xlu2 %v1677_v5, %s1918_s28 }
  0x1c   :  { %1688 = vrot.lane.b32.xlu0 %v1657_v4, %s1915_s25  ;;  %1693 = vrot.lane.b32.xlu1 %v1677_v5, %s1919_s29  ;;  %s1930_s25 = smov 39  }
  0x1d   :  { %1698 = vrot.lane.b32.xlu2 %v1677_v5, %s1920_s30 }
  0x24   :  { %1703 = vrot.lane.b32.xlu0 %v1702_v6, %s1917_s27  ;;  %164 = vrot.lane.b32.xlu1 %v2008_v2, %s1918_s28 }
  0x25   :  { %76 = vrot.lane.b32.xlu2 %v2008_v2, %s1919_s29 }
  0x2c   :  { %105 = vrot.lane.b32.xlu0 %v2008_v2, %s1920_s30  ;;  %162 = vrot.lane.b32.xlu1 %v3695_v7, %s1918_s28 }
  0x2d   :  { %74 = vrot.lane.b32.xlu2 %v3695_v7, %s1919_s29 }
  0x34   :  { %103 = vrot.lane.b32.xlu0 %v3695_v7, %s1920_s30 }
  0x5f   :  { %v2048_v11 = vpop.permute.xlu2 %1663 }
  0x60   :  { %v1666_v19 = vunpack.i.h.bf16 %v2048_v11  ;;  %v1665_v20 = vunpack.i.l.bf16 %v2048_v11 }
  0x62   :  { %v2124_v34 = vsel %vm3659_vm0, %v1665_v20, %v1666_v19  ;;  %vm124_vm0 = vmand %vm122_vm7, %vm123_vm4  ;;  %vm2180_vm4 = vcmp.eq.s32.totalorder %v201_v41, 1  ;;  %vm2210_vm7 = vcmp.eq.s32.totalorder %v260_v49, 1  ;;  %v199_v41 = vperm.slane %v2115_v33, 0 }
  0x63   :  { %v1481_v46 = vpack.c.bf16 %v2124_v34, %v2002_v0  ;;  %v2176_v56 = vsel %vm124_vm0, 1, %v3693_v8  ;;  %vm2204_vm0 = vmand %vm2099_vm15, %vm59_vm6  ;;  %v3762_v15 = vsel %vm2210_vm7, 4294967295, %v3761_v15  ;;  %vm3766_vm6 = vcmask 949248  }
  0x64   :  { %v128_v17 = vperm.slane %v2176_v56, 2  ;;  %vm3768_vm7 = vmmov %vm3767_vm13 }
  0x67   :  { %v2083_v16 = vpop.permute.xlu2 %1668 }
  0x68   :  { %v1671_v39 = vunpack.i.h.bf16 %v2083_v16  ;;  %v1670_v48 = vunpack.i.l.bf16 %v2083_v16 }
  0x6a   :  { %v2191_v61 = vsel %vm247_vm8, %v1671_v39, %v1670_v48 }
  0x6f   :  { %v2173_v55 = vpop.permute.xlu2 %1683 }
  0x70   :  { %v1686_v13 = vunpack.i.h.bf16 %v2173_v55  ;;  %v1685_v14 = vunpack.i.l.bf16 %v2173_v55 }
  0x76   :  { %v2104_v26 = vpop.permute.xlu1 %1653  ;;  %v1644_v27 = vpop.permute.xlu0 %1643 }
  0x77   :  { %v1646_v30 = vunpack.i.h.bf16 %v1644_v27  ;;  %v1645_v31 = vunpack.i.l.bf16 %v1644_v27  ;;  %v1656_v52 = vunpack.i.h.bf16 %v2104_v26  ;;  %v1655_v53 = vunpack.i.l.bf16 %v2104_v26 }
  0x79   :  { %v304_v35 = vsel %vm3660_vm5, %v1645_v31, %v1646_v30  ;;  %vm2150_vm5 = vcmp.eq.s32.totalorder %v262_v29, 1  ;;  %v277_v23 = vsel %vm3766_vm6, %v1655_v53, %v1656_v52  ;;  %vm3779_vm6 = vcmask 1043456  }
  0x7a   :  { %v310_v40 = vsel %vm2106_vm1, %v304_v35, 0.0  ;;  %vm2162_vm1 = vmand %vm153_vm14, %vm3663_vm11  ;;  %vm2184_vm14 = vcmp.eq.s32.totalorder %v233_v42, 1 }
  0x7b   :  { %v325_v43 = vpack.c.bf16 %v310_v40, %v310_v40  ;;  %v2196_v62 = vsel %vm2162_vm1, 1, %v3693_v8  ;;  %vm3763_vm1 = vcmp.ge.s32.totalorder %v2037_v10, 0  ;;  %vm1477_vm11 = vmpackc.low %vm2150_vm5, %vm2131_vm9  ;;  %vm2242_vm5 = vcmp.eq.s32.totalorder %v234_v50, 1 }
  0x7c   :  { %v158_v29 = vperm.slane %v2196_v62, 2  ;;  %vm3772_vm9 = vcmp.lt.s32.totalorder %v2037_v10, 12  ;;  %v184_v50 = vperm.slane %v2097_v21, 1  ;;  %v157_v36 = vperm.slane %v2196_v62, 1 }
  0x7d   :  { %v345_v54 = vsel %vm3662_vm3, %v325_v43, 0  ;;  %vm2219_vm3 = vmand %vm2099_vm15, %vm3763_vm1  ;;  %vm3769_vm15 = vcmp.lt.s32.totalorder %v2037_v10, 13 }
  0x7e   :  { %v2178_v57 = vpop.permute.xlu0 %1648  ;;  %376 = vmatpush.bf16.msra.mxu2 %v345_v54  ;;  %v1659_v58 = vpop.permute.xlu1 %1658  ;;  %vm62_vm1 = vmand %vm2204_vm0, %vm3769_vm15  ;;  %vm2258_vm0 = vcmp.eq.s32.totalorder %v128_v17, 1 }
  0x7f   :  { %v1651_v63 = vunpack.i.h.bf16 %v2178_v57  ;;  %v1650_v1 = vunpack.i.l.bf16 %v2178_v57  ;;  %v1661_v4 = vunpack.i.h.bf16 %v1659_v58  ;;  %v1660_v5 = vunpack.i.l.bf16 %v1659_v58  ;;  %vm3780_vm15 = vmmov %vm3779_vm6 }
  0x80   :  { %v2271_v42 = vsel %vm62_vm1, 1, %v3693_v8  ;;  %vm3783_vm1 = vnez %v3762_v15  ;;  %v1713_v15 = vpack.i.bf16 %v2013_v3, %v2008_v2 }
  0x81   :  { %v250_v19 = vsel %vm247_vm8, %v1650_v1, %v1651_v63  ;;  %v303_v24 = vsel %vm3767_vm13, %v1660_v5, %v1645_v31  ;;  %v302_v25 = vsel %vm3768_vm7, %v1661_v4, %v1660_v5  ;;  %vm170_vm13 = vcmask 7168   ;;  %v2290_v63 = vpop.permute.xlu2 %1698 }
  0x82   :  { %v1478_v22 = vpack.c.bf16 %v277_v23, %v250_v19  ;;  %v309_v27 = vsel %vm2135_vm2, %v303_v24, 0.0  ;;  %v308_v28 = vsel %vm2139_vm12, %v302_v25, 0.0  ;;  %vm2250_vm2 = vmand %vm2219_vm3, %vm3772_vm9  ;;  %vm2254_vm12 = vcmp.eq.s32.totalorder %v261_v51, 1  ;;  %1709 = vrot.lane.b32.xlu2 %v1713_v15, %s1924_s18 }
  0x83   :  { %v324_v30 = vpack.c.bf16 %v309_v27, %v309_v27  ;;  %v323_v32 = vpack.c.bf16 %v308_v28, %v308_v28  ;;  %vm140_vm7 = vcmask 89088   ;;  %vm2275_vm3 = vcmp.eq.s32.totalorder %v158_v29, 1  ;;  %vm1451_vm9 = vmpackc.low %vm3783_vm1, %vm2184_vm14 }
  0x84   :  { %1479 = vmatpush.bf16.msk.msra.mxu2 %vm1477_vm11, %v1478_v22  ;;  %vm1480_vm11 = vmpackc.low %vm2180_vm4, %vm2154_vm10  ;;  %v173_v49 = vsel %vm170_vm13, %v1685_v14, %v1686_v13  ;;  %v2286_v51 = vsel %vm2250_vm2, 1, %v3693_v8  ;;  %v1701_v21 = vunpack.i.h.bf16 %v2290_v63  ;;  %v1700_v4 = vunpack.i.l.bf16 %v2290_v63 }
  0x85   :  { %v342_v39 = vsel %vm3779_vm6, %v324_v30, 0  ;;  %v339_v40 = vsel %vm3780_vm15, %v323_v32, 0  ;;  %v200_v5 = vperm.slane %v2115_v33, 1  ;;  %v66_v6 = vperm.slane %v2271_v42, 2  ;;  %vm1464_vm6 = vmpackc.low %vm2254_vm12, %vm2242_vm5 }
  0x86   :  { %v1674_v43 = vpop.permute.xlu0 %1673  ;;  %v2273_v44 = vpop.permute.xlu1 %1678  ;;  %363 = vmatpush.bf16.msra.mxu1 %v342_v39  ;;  %350 = vmatpush.bf16.msra.mxu0 %v339_v40  ;;  %vm3784_vm2 = vcmask 949248   ;;  %v249_v59 = vsel %vm247_vm8, %v1670_v48, %v1650_v1  ;;  %vm1483_vm8 = vmpackc.low %vm2275_vm3, %vm2258_vm0  ;;  %v99_v26 = vperm.slane %v2286_v51, 2  ;;  %vm111_vm14 = vcmask 97280   ;;  %v327_v1 = vld [vmem:[%s3649_s4] sm:$0xff]  ;;  %s1923_s4 = smov 95  }
  0x87   :  { %v1676_v52 = vunpack.i.h.bf16 %v1674_v43  ;;  %v1675_v54 = vunpack.i.l.bf16 %v1674_v43  ;;  %v1681_v57 = vunpack.i.h.bf16 %v2273_v44  ;;  %v1680_v58 = vunpack.i.l.bf16 %v2273_v44  ;;  %vm3785_vm4 = vmmov %vm3784_vm2  ;;  %330 = vperm.xlu1 %1707, %v327_v1   ;;  %1714 = vrot.lane.b32.xlu0 %v1713_v15, %s1923_s4 }
  0x88   :  { %1482 = vmatpush.bf16.msk.msra.mxu2 %vm1480_vm11, %v1481_v46  ;;  %vm82_vm15 = vcmask 105472   ;;  %vm2328_vm5 = vcmp.eq.s32.totalorder %v183_v38, 1  ;;  %v3786_v48 = vmov 0  ;;  %vm2332_vm12 = vcmp.eq.s32.totalorder %v199_v41, 1 }
  0x89   :  { %v275_v34 = vsel %vm3784_vm2, %v1676_v52, %v1675_v54  ;;  %v276_v46 = vsel %vm3785_vm4, %v1675_v54, %v1655_v53  ;;  %v143_v33 = vsel %vm140_vm7, %v1680_v58, %v1681_v57  ;;  %v3787_v48 = vsel %vm2328_vm5, 4294967295, %v3786_v48  ;;  %v326_v52 = vld [vmem:[%s3650_s3] sm:$0xf]  ;;  %s1928_s3 = smov 3  }
  0x8a   :  { %v1452_v60 = vpack.c.bf16 %v275_v34, %v2191_v61  ;;  %v1465_v13 = vpack.c.bf16 %v276_v46, %v249_v59  ;;  %v1484_v16 = vpack.c.bf16 %v173_v49, %v143_v33  ;;  %vm2336_vm11 = vcmp.eq.s32.totalorder %v184_v50, 1 }
  0x8b   :  { %v3790_v61 = vmov 0  ;;  %vm2345_vm0 = vcmp.eq.s32.totalorder %v200_v5, 1  ;;  %vm2349_vm3 = vcmp.eq.s32.totalorder %v66_v6, 1  ;;  %vm2353_vm1 = vcmp.eq.s32.totalorder %v99_v26, 1  ;;  %v77_v5 = vpop.permute.xlu2 %76 }
  0x8c   :  { %1453 = vmatpush.bf16.msk.msra.mxu0 %vm1451_vm9, %v1452_v60  ;;  %1466 = vmatpush.bf16.msk.msra.mxu1 %vm1464_vm6, %v1465_v13  ;;  %v3791_v61 = vsel %vm2336_vm11, 4294967295, %v3790_v61  ;;  %v114_v25 = vsel %vm111_vm14, %v1700_v4, %v1701_v21  ;;  %vm1454_vm9 = vmpackc.low %vm2332_vm12, %vm2328_vm5  ;;  %v127_v30 = vperm.slane %v2176_v56, 1  ;;  %vm3798_vm2 = vcmask 1039360  }
  0x8d   :  { %1485 = vmatpush.bf16.msk.msra.mxu2 %vm1483_vm8, %v1484_v16  ;;  %vm3799_vm4 = vmmov %vm3798_vm2  ;;  %v126_v49 = vperm.slane %v2176_v56, 0  ;;  %v156_v50 = vperm.slane %v2196_v62, 0  ;;  %v65_v54 = vperm.slane %v2271_v42, 1  ;;  %v98_v57 = vperm.slane %v2286_v51, 1 }
  0x8e   :  { %v1689_v17 = vpop.permute.xlu0 %1688  ;;  %v1694_v18 = vpop.permute.xlu1 %1693  ;;  %vm1467_vm6 = vmpackc.low %vm2345_vm0, %vm2336_vm11  ;;  %vm2385_vm12 = vcmp.eq.s32.totalorder %v127_v30, 1  ;;  %vm2389_vm0 = vcmp.eq.s32.totalorder %v157_v36, 1  ;;  %v64_v63 = vperm.slane %v2271_v42, 0  ;;  %v2494_v36 = vld [vmem:[%s3651_s6] sm:$0xff]  ;;  %vm3829_vm10 = vcmp.lt.s32.totalorder %v2037_v10, 9 }
  0x8f   :  { %v1691_v22 = vunpack.i.h.bf16 %v1689_v17  ;;  %v1690_v27 = vunpack.i.l.bf16 %v1689_v17  ;;  %v1696_v28 = vunpack.i.h.bf16 %v1694_v18  ;;  %v1695_v29 = vunpack.i.l.bf16 %v1694_v18  ;;  %vm1486_vm8 = vmpackc.low %vm2353_vm1, %vm2349_vm3  ;;  %1719 = vrot.lane.b32.xlu1 %v1713_v15, %s1925_s19  ;;  %1724 = vrot.lane.b32.xlu0 %v1713_v15, %s1926_s22  ;;  %3812 = vst [vmem:[#allocation5_spill] sm:$0xff] %v2494_v36 }
  0x90   :  { %vm3666_vm3 = vcmask 588800   ;;  %vm1470_vm1 = vmpackc.low %vm2389_vm0, %vm2385_vm12 }
  0x91   :  { %v218_v32 = vsel %vm3798_vm2, %v1691_v22, %v1690_v27  ;;  %v219_v31 = vsel %vm3799_vm4, %v1690_v27, %v1665_v20  ;;  %v85_v35 = vsel %vm82_vm15, %v1695_v29, %v1696_v28  ;;  %v1743_v20 = vpack.i.bf16 %v2008_v2, %v3695_v7 }
  0x92   :  { %v1455_v37 = vpack.c.bf16 %v218_v32, %v2008_v2  ;;  %v1468_v38 = vpack.c.bf16 %v219_v31, %v2013_v3  ;;  %v1487_v11 = vpack.c.bf16 %v114_v25, %v85_v35  ;;  %vm2418_vm2 = vcmp.eq.s32.totalorder %v156_v50, 1 }
  0x93   :  { %1744 = vrot.lane.b32.xlu2 %v1743_v20, %s1927_s23  ;;  %vm2422_vm4 = vcmp.eq.s32.totalorder %v65_v54, 1  ;;  %v75_v53 = vpop.permute.xlu2 %74 }
  0x94   :  { %1456 = vmatpush.bf16.msk.msra.mxu0 %vm1454_vm9, %v1455_v37  ;;  %1469 = vmatpush.bf16.msk.msra.mxu1 %vm1467_vm6, %v1468_v38  ;;  %vm2414_vm9 = vcmp.eq.s32.totalorder %v126_v49, 1  ;;  %vm2426_vm6 = vcmp.eq.s32.totalorder %v98_v57, 1  ;;  %v83_v15 = vsel %vm82_vm15, %v75_v53, %v77_v5 }
  0x95   :  { %1488 = vmatpush.bf16.msk.msra.mxu2 %vm1486_vm8, %v1487_v11  ;;  %vm1457_vm8 = vmpackc.low %vm2418_vm2, %vm2414_vm9  ;;  %vm3674_vm9 = vcmp.lt.s32.totalorder %v2037_v10, 9 }
  0x96   :  { %v1704_v39 = vpop.permute.xlu0 %1703  ;;  %v165_v40 = vpop.permute.xlu1 %164  ;;  %vm1473_vm12 = vmpackc.low %vm2426_vm6, %vm2422_vm4 }
  0x97   :  { %v1705_v47 = vunpack.i.l.bf16 %v1704_v39  ;;  %v172_v62 = vsel %vm170_vm13, %v165_v40, %v1685_v14  ;;  %v1706_v6 = vunpack.i.h.bf16 %v1704_v39  ;;  %1734 = vrot.lane.b32.xlu1 %v1743_v20, %s1928_s3  ;;  %1729 = vrot.lane.b32.xlu0 %v1743_v20, %s1929_s24 }
  0x98   :  { %1489 = vmatmul.msk.bf16.vlgmr.msra.gmra.mxu2 %vm3666_vm3, %v326_v52 }
  0x99   :  { %v142_v56 = vsel %vm140_vm7, %v1705_v47, %v1680_v58  ;;  %v84_v58 = vsel %vm82_vm15, %v77_v5, %v1695_v29  ;;  %v141_v60 = vsel %vm140_vm7, %v1706_v6, %v1705_v47  ;;  %vm550_vm15 = vcmp.ge.s32.totalorder %v2032_v9, 4294967293 }
  0x9a   :  { %v1471_v21 = vpack.c.bf16 %v172_v62, %v142_v56 }
  0x9b   :  { %820 = vrot.lane.b32.xlu2 %v3695_v7, %s1923_s4 }
  0x9c   :  { %1472 = vmatpush.bf16.msk.msra.mxu1 %vm1470_vm1, %v1471_v21  ;;  %vm551_vm1 = vcmp.lt.s32.totalorder %v2032_v9, 9 }
  0x9d   :  { %vm2509_vm2 = vmand %vm550_vm15, %vm551_vm1  ;;  %vm3668_vm1 = vcmask 777216  }
  0x9e   :  { %v106_v59 = vpop.permute.xlu0 %105  ;;  %v163_v46 = vpop.permute.xlu1 %162 }
  0x9f   :  { %v113_v33 = vsel %vm111_vm14, %v106_v59, %v1700_v4  ;;  %v171_v13 = vsel %vm170_vm13, %v163_v46, %v165_v40  ;;  %v97_v4 = vperm.slane %v2286_v51, 0  ;;  %vm67_vm13 = vcmp.eq.s32.totalorder %v64_v63, 1  ;;  %1739 = vrot.lane.b32.xlu1 %v1743_v20, %s1930_s25  ;;  %837 = vrot.lane.b32.xlu0 %v3695_v7, %s1925_s19 }
  0xa0   :  { %v1474_v16 = vpack.c.bf16 %v113_v33, %v84_v58  ;;  %v1458_v26 = vpack.c.bf16 %v171_v13, %v141_v60 }
  0xa1   :  { %vm100_vm7 = vcmp.eq.s32.totalorder %v97_v4, 1 }
  0xa2   :  { %1459 = vmatpush.bf16.msk.msra.mxu0 %vm1457_vm8, %v1458_v26  ;;  %1475 = vmatpush.bf16.msk.msra.mxu1 %vm1473_vm12, %v1474_v16  ;;  %vm1460_vm0 = vmpackc.low %vm100_vm7, %vm67_vm13  ;;  %vm3667_vm8 = vcmask 728064   ;;  %vm3673_vm13 = vcmp.ge.s32.totalorder %v2037_v10, 3  ;;  %vm3672_vm7 = vcmp.lt.s32.totalorder %v2037_v10, 15 }
  0xa5   :  { %1476 = vmatmul.msk.bf16.vlgmr.msra.gmra.mxu1 %vm3666_vm3, %v326_v52 }
  0xa6   :  { %v104_v1 = vpop.permute.xlu0 %103 }
  0xa7   :  { %v112_v17 = vsel %vm111_vm14, %v104_v1, %v106_v59  ;;  %854 = vrot.lane.b32.xlu1 %v3695_v7, %s1924_s18  ;;  %vm456_vm14 = vcmp.ge.s32.totalorder %v2037_v10, 4294967293  ;;  %v3820_v59 = vmov 0 }
  0xa8   :  { %v1461_v42 = vpack.c.bf16 %v112_v17, %v83_v15  ;;  %vm607_vm4 = vmand %vm2509_vm2, %vm456_vm14 }
  0xa9   :  { %vm608_vm6 = vmand %vm607_vm4, %vm3674_vm9  ;;  %vm3671_vm4 = vcmask 752640  }
  0xaa   :  { %1462 = vmatpush.bf16.msk.msra.mxu0 %vm1460_vm0, %v1461_v42  ;;  %v2524_v41 = vsel %vm608_vm6, 1, %v3693_v8  ;;  %vm553_vm0 = vmand %vm2509_vm2, %vm3673_vm13  ;;  %vm3817_vm6 = vcmp.ge.s32.totalorder %v2037_v10, 0  ;;  %vm3679_vm13 = vcmask 269312  }
  0xab   :  { %v610_v49 = vperm.slane %v2524_v41, 0  ;;  %vm554_vm15 = vmand %vm553_vm0, %vm3672_vm7  ;;  %vm3818_vm0 = vcmask 1043456  }
  0xac   :  { %v2556_v5 = vsel %vm554_vm15, 1, %v3693_v8  ;;  %vm3819_vm15 = vcmp.lt.s32.totalorder %v2037_v10, 12 }
  0xad   :  { %1463 = vmatmul.msk.bf16.vlgmr.msra.gmra.mxu0 %vm3666_vm3, %v326_v52  ;;  %vm2541_vm12 = vcmp.eq.s32.totalorder %v610_v49, 1  ;;  %vm580_vm3 = vmand %vm2509_vm2, %vm3817_vm6  ;;  %v556_v14 = vperm.slane %v2556_v5, 0  ;;  %v3833_v49 = vmov 0 }
  0xdc   :  { %v2506_v38 = vpop.permute.xlu2 %1709 }
  0xdd   :  { %v1712_v20 = vunpack.i.h.bf16 %v2506_v38  ;;  %v1711_v39 = vunpack.i.l.bf16 %v2506_v38 }
  0xdf   :  { %v625_v57 = vsel %vm3667_vm8, %v1711_v39, %v1712_v20  ;;  %vm581_vm8 = vmand %vm580_vm3, %vm3819_vm15 }
  0xe0   :  { %v631_v62 = vsel %vm2541_vm12, %v625_v57, 0.0  ;;  %v2575_v58 = vsel %vm581_vm8, 1, %v3693_v8  ;;  %vm3824_vm8 = vnez %v3735_v12 }
  0xe1   :  { %v646_v21 = vpack.c.bf16 %v631_v62, %v631_v62  ;;  %v583_v46 = vperm.slane %v2575_v58, 0  ;;  %vm519_vm6 = vmand %vm3824_vm8, %vm456_vm14 }
  0xe2   :  { %vm520_vm15 = vmand %vm519_vm6, %vm3674_vm9  ;;  %vm3680_vm9 = vcmask 23552  }
  0xe3   :  { %v660_v55 = vsel %vm3818_vm0, %v646_v21, 0  ;;  %vm2590_vm3 = vcmp.eq.s32.totalorder %v583_v46, 1  ;;  %vm3670_vm0 = vcmask 1022976   ;;  %v2615_v4 = vsel %vm520_vm15, 1, %v3693_v8 }
  0xe4   :  { %671 = vmatpush.bf16.msra.mxu3 %v660_v55  ;;  %v522_v1 = vperm.slane %v2615_v4, 0  ;;  %vm393_vm15 = vcmp.ge.s32.totalorder %v2032_v9, 3  ;;  %v3840_v55 = vmov 0 }
  0xe6   :  { %vm2627_vm6 = vcmp.eq.s32.totalorder %v522_v1, 1 }
  0xed   :  { %v2617_v53 = vpop.permute.xlu2 %1744 }
  0xf9   :  { %v331_v18 = vpop.permute.xlu1 %330  ;;  %v2501_v37 = vpop.permute.xlu0 %1714 }
  0xfa   :  { %v1717_v52 = vunpack.i.h.bf16 %v2501_v37  ;;  %v1716_v54 = vunpack.i.l.bf16 %v2501_v37  ;;  %v558_v37 = vperm.slane %v2556_v5, 2 }
  0xfc   :  { %v571_v6 = vsel %vm3668_vm1, %v1716_v54, %v1717_v52  ;;  %vm2577_vm1 = vcmp.eq.s32.totalorder %v556_v14, 1 }
  0xfd   :  { %v3821_v59 = vsel %vm2577_vm1, 4294967295, %v3820_v59  ;;  %vm3669_vm2 = vmpackc.low %vm2590_vm3, %vm2577_vm1 }
 0x101   :  { %v2521_v40 = vpop.permute.xlu1 %1719  ;;  %v2568_v44 = vpop.permute.xlu0 %1724 }
 0x102   :  { %v1722_v47 = vunpack.i.h.bf16 %v2521_v40  ;;  %v1721_v50 = vunpack.i.l.bf16 %v2521_v40  ;;  %v1727_v60 = vunpack.i.h.bf16 %v2568_v44  ;;  %v1726_v13 = vunpack.i.l.bf16 %v2568_v44 }
 0x104   :  { %v598_v34 = vsel %vm3671_vm4, %v1721_v50, %v1722_v47  ;;  %v541_v63 = vsel %vm3670_vm0, %v1726_v13, %v1727_v60  ;;  %vm3678_vm0 = vmpackc.low %vm2627_vm6, %vm2328_vm5  ;;  %v611_v13 = vperm.slane %v2524_v41, 1 }
 0x105   :  { %v1491_v33 = vpack.c.bf16 %v598_v34, %v571_v6  ;;  %v1494_v15 = vpack.c.bf16 %v541_v63, %v2008_v2 }
 0x107   :  { %1492 = vmatpush.bf16.msk.msra.mxu3 %vm3669_vm2, %v1491_v33  ;;  %vm394_vm2 = vcmp.lt.s32.totalorder %v2032_v9, 15  ;;  %v3842_v33 = vmov 0 }
 0x108   :  { %vm2648_vm4 = vmand %vm393_vm15, %vm394_vm2  ;;  %vm3830_vm2 = vcmp.ge.s32.totalorder %v2037_v10, 3 }
 0x109   :  { %v2598_v26 = vpop.permute.xlu1 %1734  ;;  %v2621_v17 = vpop.permute.xlu0 %1729  ;;  %vm457_vm7 = vmand %vm2648_vm4, %vm456_vm14 }
 0x10a   :  { %v1737_v2 = vunpack.i.h.bf16 %v2598_v26  ;;  %vm459_vm1 = vmand %vm457_vm7, %vm3829_vm10  ;;  %vm3831_vm10 = vcmp.lt.s32.totalorder %v2037_v10, 15 }
 0x10b   :  { %1495 = vmatpush.bf16.msk.msra.mxu3 %vm3678_vm0, %v1494_v15  ;;  %vm485_vm14 = vmand %vm3824_vm8, %vm3830_vm2 }
 0x10c   :  { %vm486_vm7 = vmand %vm485_vm14, %vm3831_vm10 }
 0x10d   :  { %v2681_v39 = vsel %vm486_vm7, 1, %v3693_v8  ;;  %vm3835_vm14 = vmmov %vm3831_vm10  ;;  %vm3684_vm7 = vcmask 318464  }
 0x10e   :  { %v488_v50 = vperm.slane %v2681_v39, 0 }
 0x11b   :  { %v382_v51 = vpop.f32.mrf.mxu2 }
 0x11c   :  { %v2476_v31 = vadd.f32 %v382_v51, %v331_v18  ;;  %v1736_v51 = vunpack.i.l.bf16 %v2598_v26 }
 0x11e   :  { %v1823_v43 = vpack.i.bf16 %v2476_v31, %v3695_v7 }
 0x122   :  { %v369_v19 = vpop.f32.mrf.mxu1 }
 0x123   :  { %v2459_v23 = vadd.f32 %v369_v19, %v331_v18  ;;  %v384_v24 = vpop.f32.mrf.mxu2  ;;  %v1731_v19 = vunpack.i.l.bf16 %v2621_v17 }
 0x124   :  { %v1747_v24 = vunpack.i.h.bf16 %v2617_v53 }
 0x125   :  { %v1753_v25 = vpack.i.bf16 %v2459_v23, %v2002_v0  ;;  %v1788_v32 = vpack.i.bf16 0.0, %v2459_v23 }
 0x127   :  { %1754 = vrot.lane.b32.xlu1 %v1753_v25, %s1923_s4  ;;  %1749 = vrot.lane.b32.xlu2 %v1753_v25, %s1924_s18 }
 0x12a   :  { %v356_v22 = vpop.f32.mrf.mxu0  ;;  %v371_v27 = vpop.f32.mrf.mxu1 }
 0x12b   :  { %v2465_v28 = vadd.f32 %v356_v22, %v331_v18  ;;  %v1732_v18 = vunpack.i.h.bf16 %v2621_v17  ;;  %v2662_v22 = vsel %vm459_vm1, 1, %v3693_v8  ;;  %vm3832_vm1 = vmmov %vm3830_vm2 }
 0x12c   :  { %v461_v11 = vperm.slane %v2662_v22, 0  ;;  %vm397_vm15 = vmand %vm2648_vm4, %vm3832_vm1  ;;  %vm3836_vm1 = vcmp.ge.s32.totalorder %v2037_v10, 0 }
 0x12d   :  { %v1773_v29 = vpack.i.bf16 %v2465_v28, %v2013_v3  ;;  %v1813_v35 = vpack.i.bf16 %v2465_v28, %v2476_v31  ;;  %v476_v27 = vsel %vm3679_vm13, %v1731_v19, %v1732_v18  ;;  %vm399_vm10 = vmand %vm397_vm15, %vm3835_vm14  ;;  %vm3683_vm13 = vcmask 293888  }
 0x12e   :  { %vm2691_vm2 = vcmp.eq.s32.totalorder %v461_v11, 1  ;;  %v2699_v57 = vsel %vm399_vm10, 1, %v3693_v8  ;;  %vm429_vm0 = vmand %vm2648_vm4, %vm3836_vm1  ;;  %vm3839_vm15 = vcmp.lt.s32.totalorder %v2037_v10, 12  ;;  %v557_v11 = vperm.slane %v2556_v5, 1 }
 0x12f   :  { %1759 = vrot.lane.b32.xlu2 %v1753_v25, %s1925_s19  ;;  %1774 = vrot.lane.b32.xlu1 %v1773_v29, %s1928_s3  ;;  %v3834_v49 = vsel %vm2691_vm2, 4294967295, %v3833_v49  ;;  %v401_v62 = vperm.slane %v2699_v57, 0  ;;  %vm430_vm14 = vmand %vm429_vm0, %vm3839_vm15  ;;  %vm2752_vm15 = vcmp.eq.s32.totalorder %v611_v13, 1 }
 0x130   :  { %1769 = vrot.lane.b32.xlu0 %v1773_v29, %s1929_s24  ;;  %v2723_v34 = vsel %vm430_vm14, 1, %v3693_v8  ;;  %vm3846_vm14 = vcmask 728064  }
 0x131   :  { %vm2730_vm10 = vcmp.eq.s32.totalorder %v401_v62, 1  ;;  %v432_v14 = vperm.slane %v2723_v34, 0  ;;  %v434_v56 = vperm.slane %v2723_v34, 2 }
 0x132   :  { %v358_v30 = vpop.f32.mrf.mxu0  ;;  %v3841_v55 = vsel %vm2730_vm10, 4294967295, %v3840_v55 }
 0x133   :  { %v1746_v30 = vunpack.i.l.bf16 %v2617_v53  ;;  %vm2735_vm0 = vcmp.eq.s32.totalorder %v432_v14, 1 }
 0x134   :  { %v3843_v33 = vsel %vm2735_vm0, 4294967295, %v3842_v33  ;;  %vm3682_vm1 = vmpackc.low %vm2735_vm0, %vm2730_vm10  ;;  %vm2833_vm10 = vcmp.eq.s32.totalorder %v558_v37, 1  ;;  %v3866_v37 = vmov 0 }
 0x135   :  { %v447_v6 = vsel %vm3683_vm13, %v1746_v30, %v1747_v24  ;;  %vm3853_vm13 = vcmask 752640  }
 0x137   :  { %1764 = vrot.lane.b32.xlu2 %v1753_v25, %s1926_s22  ;;  %1789 = vrot.lane.b32.xlu1 %v1788_v32, %s1929_s24  ;;  %v2659_v25 = vpop.permute.xlu1 %1739 }
 0x138   :  { %1784 = vrot.lane.b32.xlu0 %v1773_v29, %s1927_s23 }
 0x13f   :  { %1779 = vrot.lane.b32.xlu2 %v1773_v29, %s1930_s25  ;;  %1814 = vrot.lane.b32.xlu1 %v1813_v35, %s1926_s22  ;;  %v503_v29 = vsel %vm3680_vm9, %v1736_v51, %v1737_v2  ;;  %vm2705_vm9 = vcmp.eq.s32.totalorder %v488_v50, 1  ;;  %v2766_v30 = vpop.permute.xlu1 %854  ;;  %v584_v50 = vperm.slane %v2575_v58, 1 }
 0x140   :  { %1794 = vrot.lane.b32.xlu0 %v1813_v35, %s1924_s18  ;;  %v1497_v54 = vpack.c.bf16 %v503_v29, %v476_v27  ;;  %vm3681_vm4 = vmpackc.low %vm2705_vm9, %vm2691_vm2  ;;  %vm3869_vm2 = vcmask 23552  }
 0x142   :  { %1498 = vmatpush.bf16.msk.msra.mxu3 %vm3681_vm4, %v1497_v54  ;;  %vm3847_vm4 = vcmask 1043456   ;;  %v523_v54 = vperm.slane %v2615_v4, 1 }
 0x144   :  { %vm2804_vm8 = vcmp.eq.s32.totalorder %v523_v54, 1 }
 0x147   :  { %1799 = vrot.lane.b32.xlu2 %v1813_v35, %s1923_s4  ;;  %1819 = vrot.lane.b32.xlu1 %v1788_v32, %s1930_s25 }
 0x148   :  { %1809 = vrot.lane.b32.xlu0 %v1813_v35, %s1925_s19  ;;  %v1741_v35 = vunpack.i.l.bf16 %v2659_v25 }
 0x14f   :  { %1804 = vrot.lane.b32.xlu2 %v1788_v32, %s1928_s3  ;;  %775 = vrot.lane.b32.xlu1 %v2476_v31, %s1928_s3  ;;  %v1742_v32 = vunpack.i.h.bf16 %v2659_v25  ;;  %v3879_v25 = vmov 0 }
 0x150   :  { %803 = vrot.lane.b32.xlu0 %v3695_v7, %s1926_s22 }
 0x151   :  { %v420_v21 = vsel %vm3684_vm7, %v1741_v35, %v1742_v32 }
 0x152   :  { %v1500_v46 = vpack.c.bf16 %v447_v6, %v420_v21 }
 0x154   :  { %1501 = vmatpush.bf16.msk.msra.mxu3 %vm3682_vm1, %v1500_v46  ;;  %vm3852_vm1 = vcmask 777216  }
 0x157   :  { %739 = vrot.lane.b32.xlu2 %v2459_v23, %s1927_s23  ;;  %884 = vperm.xlu1 %1707, %v2494_v36  }
 0x158   :  { %758 = vrot.lane.b32.xlu0 %v2476_v31, %s1929_s24 }
 0x15f   :  { %724 = vrot.lane.b32.xlu2 %v2476_v31, %s1930_s25  ;;  %595 = vrot.lane.b32.xlu1 %v3695_v7, %s1925_s19 }
 0x160   :  { %1824 = vrot.lane.b32.xlu0 %v1823_v43, %s1927_s23  ;;  %v2689_v43 = vpop.permute.xlu2 %820 }
 0x167   :  { %622 = vrot.lane.b32.xlu2 %v3695_v7, %s1924_s18  ;;  %473 = vrot.lane.b32.xlu1 %v2002_v0, %s1929_s24  ;;  %s1938_s18 = smov 60  }
 0x168   :  { %568 = vrot.lane.b32.xlu0 %v3695_v7, %s1923_s4  ;;  %s1937_s4 = smov 65  }
 0x16f   :  { %538 = vrot.lane.b32.xlu2 %v3695_v7, %s1926_s22  ;;  %444 = vrot.lane.b32.xlu1 %v2002_v0, %s1927_s23  ;;  %v490_v7 = vperm.slane %v2681_v39, 2 }
 0x170   :  { %417 = vrot.lane.b32.xlu0 %v2002_v0, %s1930_s25 }
 0x177   :  { %500 = vrot.lane.b32.xlu2 %v2002_v0, %s1928_s3  ;;  %v3837_v0 = vmov 0 }
 0x178   :  { %v3838_v0 = vsel %vm2705_vm9, 4294967295, %v3837_v0  ;;  %vm3870_vm9 = vcmask 269312  }
 0x181   :  { %v2749_v63 = vpop.permute.xlu2 %1749 }
 0x182   :  { %v3713_v1 = vunpack.i.l.bf16 %v2749_v63  ;;  %v3910_v6 = vunpack.i.l.bf16 %v2749_v63 }
 0x184   :  { %v626_v51 = vsel %vm3846_vm14, %v1712_v20, %v3713_v1  ;;  %v2773_v20 = vpop.permute.xlu0 %837  ;;  %vm2784_vm14 = vcmp.eq.s32.totalorder %v584_v50, 1  ;;  %v2820_v50 = vld [vmem:[%s3652_s5] sm:$0xf] }
 0x185   :  { %v632_v19 = vsel %vm2752_vm15, %v626_v51, 0.0  ;;  %3857 = vst [vmem:[#allocation6_spill] sm:$0xff] %v2820_v50 }
 0x186   :  { %v647_v9 = vpack.c.bf16 %v632_v19, %v632_v19 }
 0x188   :  { %v663_v27 = vsel %vm3847_vm4, %v647_v9, 0  ;;  %vm2780_vm4 = vcmp.eq.s32.totalorder %v557_v11, 1  ;;  %v3854_v9 = vmov 0  ;;  %v489_v11 = vperm.slane %v2681_v39, 1 }
 0x189   :  { %v2764_v29 = vpop.permute.xlu2 %1759  ;;  %684 = vmatpush.bf16.msrb.mxu0 %v663_v27  ;;  %vm3688_vm7 = vmpackc.low %vm2784_vm14, %vm2780_vm4  ;;  %v3855_v9 = vsel %vm2804_vm8, 4294967295, %v3854_v9 }
 0x18a   :  { %v3712_v38 = vunpack.i.l.bf16 %v2764_v29 }
 0x18c   :  { %v599_v19 = vsel %vm3853_vm13, %v1722_v47, %v3712_v38  ;;  %v462_v47 = vperm.slane %v2662_v22, 1  ;;  %vm2857_vm13 = vcmp.eq.s32.totalorder %v489_v11, 1  ;;  %v402_v11 = vperm.slane %v2699_v57, 1 }
 0x18d   :  { %v3867_v37 = vsel %vm2857_vm13, 4294967295, %v3866_v37 }
 0x191   :  { %v2768_v35 = vpop.permute.xlu2 %1764 }
 0x192   :  { %v3710_v46 = vunpack.i.l.bf16 %v2768_v35 }
 0x199   :  { %v2776_v62 = vpop.permute.xlu1 %1754  ;;  %v2778_v21 = vpop.permute.xlu2 %1779 }
 0x19a   :  { %v3711_v13 = vunpack.i.l.bf16 %v2776_v62  ;;  %v3707_v26 = vunpack.i.l.bf16 %v2778_v21 }
 0x19c   :  { %v572_v51 = vsel %vm3852_vm1, %v1717_v52, %v3711_v13  ;;  %v585_v52 = vperm.slane %v2575_v58, 2  ;;  %vm3856_vm1 = vcmask 1022976  }
 0x19d   :  { %v1504_v27 = vpack.c.bf16 %v599_v19, %v572_v51  ;;  %v542_v40 = vsel %vm3856_vm1, %v1727_v60, %v3710_v46  ;;  %vm3858_vm1 = vcmask 588800  }
 0x19e   :  { %1502 = vmatmul.msk.bf16.vlgmr.msra.gmra.mxu3 %vm3858_vm1, %v2820_v50  ;;  %vm2837_vm0 = vcmp.eq.s32.totalorder %v585_v52, 1  ;;  %v1507_v54 = vpack.c.bf16 %v542_v40, %v2013_v3  ;;  %vm2853_vm1 = vcmp.eq.s32.totalorder %v462_v47, 1 }
 0x19f   :  { %1505 = vmatpush.bf16.msk.msrb.mxu0 %vm3688_vm7, %v1504_v27  ;;  %v3864_v27 = vmov 0  ;;  %vm3868_vm7 = vmpackc.low %vm2804_vm8, %vm2336_vm11  ;;  %vm2924_vm11 = vcmp.eq.s32.totalorder %v490_v7, 1 }
 0x1a0   :  { %v3865_v27 = vsel %vm2853_vm1, 4294967295, %v3864_v27  ;;  %vm3697_vm5 = vmpackc.low %vm2857_vm13, %vm2853_vm1  ;;  %v3880_v25 = vsel %vm2924_vm11, 4294967295, %v3879_v25 }
 0x1a1   :  { %v2845_v58 = vpop.permute.xlu2 %1799  ;;  %v2847_v60 = vpop.permute.xlu1 %1774 }
 0x1a2   :  { %3863 = vst [vmem:[#allocation7_spill] sm:$0xff] %v2847_v60  ;;  %v3696_v51 = vunpack.i.l.bf16 %v2847_v60  ;;  %v2851_v19 = vpop.permute.xlu0 %1769 }
 0x1a3   :  { %v3709_v52 = vunpack.i.l.bf16 %v2851_v19  ;;  %1508 = vmatpush.bf16.msk.msrb.mxu0 %vm3868_vm7, %v1507_v54  ;;  %v433_v54 = vperm.slane %v2723_v34, 1  ;;  %vm3875_vm7 = vcmask 318464   ;;  %v524_v34 = vperm.slane %v2615_v4, 2 }
 0x1a4   :  { %v504_v3 = vsel %vm3869_vm2, %v1737_v2, %v3696_v51  ;;  %v421_v51 = vsel %vm3875_vm7, %v1742_v32, %v3707_v26  ;;  %v612_v32 = vperm.slane %v2524_v41, 2 }
 0x1a5   :  { %v477_v40 = vsel %vm3870_vm9, %v1732_v18, %v3709_v52  ;;  %vm2895_vm9 = vcmp.eq.s32.totalorder %v402_v11, 1  ;;  %vm2899_vm2 = vcmp.eq.s32.totalorder %v433_v54, 1 }
 0x1a6   :  { %v1510_v47 = vpack.c.bf16 %v504_v3, %v477_v40  ;;  %v3871_v3 = vmov 0  ;;  %v3873_v40 = vmov 0  ;;  %vm3704_vm1 = vmpackc.low %vm2899_vm2, %vm2895_vm9  ;;  %vm2943_vm7 = vcmp.eq.s32.totalorder %v612_v32, 1 }
 0x1a7   :  { %v3872_v3 = vsel %vm2895_vm9, 4294967295, %v3871_v3  ;;  %v3874_v40 = vsel %vm2899_vm2, 4294967295, %v3873_v40  ;;  %vm3897_vm9 = vcmask 752640  }
 0x1a8   :  { %1511 = vmatpush.bf16.msk.msrb.mxu0 %vm3697_vm5, %v1510_v47  ;;  %v463_v47 = vperm.slane %v2662_v22, 2  ;;  %vm3876_vm5 = vcmask 293888   ;;  %v3877_v22 = vmov 0  ;;  %vm3898_vm2 = vmmov %vm3897_vm9 }
 0x1a9   :  { %v2889_v17 = vpop.permute.xlu2 %1804  ;;  %v2891_v2 = vpop.permute.xlu1 %1789  ;;  %vm3899_vm8 = vmmov %vm3898_vm2  ;;  %v3959_v5 = vld [vmem:[#allocation7_spill] sm:$0xff] }
 0x1aa   :  { %v2893_v18 = vpop.permute.xlu0 %1784  ;;  %vm2920_vm13 = vcmp.eq.s32.totalorder %v463_v47, 1  ;;  %v1807_v4 = vunpack.i.h.bf16 %v2889_v17  ;;  %v1792_v12 = vunpack.i.h.bf16 %v2891_v2  ;;  %v1791_v10 = vunpack.i.l.bf16 %v2891_v2 }
 0x1ab   :  { %v3708_v8 = vunpack.i.l.bf16 %v2893_v18  ;;  %v3878_v22 = vsel %vm2920_vm13, 4294967295, %v3877_v22  ;;  %vm3884_vm13 = vcmask 728064   ;;  %v1782_v47 = vunpack.i.h.bf16 %v2778_v21 }
 0x1ac   :  { %v3960_v44 = vunpack.i.l.bf16 %v3959_v5  ;;  %v4013_v5 = vmov 0 }
 0x1ad   :  { %v448_v11 = vsel %vm3876_vm5, %v1747_v24, %v3708_v8  ;;  %vm3883_vm5 = vcmask 588800   ;;  %v1762_v8 = vunpack.i.h.bf16 %v2764_v29 }
 0x1ae   :  { %v1513_v39 = vpack.c.bf16 %v448_v11, %v421_v51  ;;  %v1752_v51 = vunpack.i.h.bf16 %v2749_v63 }
 0x1b0   :  { %1514 = vmatpush.bf16.msk.msrb.mxu0 %vm3704_vm1, %v1513_v39  ;;  %vm3885_vm1 = vmmov %vm3884_vm13 }
 0x1b1   :  { %v2938_v53 = vpop.permute.xlu2 %739  ;;  %v2940_v24 = vpop.permute.xlu1 %1814  ;;  %vm3886_vm11 = vmmov %vm3885_vm1 }
 0x1b2   :  { %v1795_v7 = vpop.permute.xlu0 %1794 }
 0x1b3   :  { %v1797_v54 = vunpack.i.h.bf16 %v1795_v7  ;;  %v1796_v41 = vunpack.i.l.bf16 %v1795_v7  ;;  %1515 = vmatmul.msk.bf16.vlgmr.msrb.gmra.mxu0 %vm3883_vm5, %v2820_v50  ;;  %vm3927_vm5 = vnez %v3865_v27  ;;  %v880_v27 = vld [vmem:[%s3652_s5] sm:$0xf] }
 0x1b5   :  { %v858_v11 = vsel %vm3884_vm13, %v1796_v41, %v2766_v30  ;;  %v856_v39 = vsel %vm3885_vm1, %v1797_v54, %v1752_v51  ;;  %v857_v26 = vsel %vm3886_vm11, %v1752_v51, %v1796_v41  ;;  %v403_v30 = vperm.slane %v2699_v57, 2 }
 0x1b6   :  { %v862_v52 = vsel %vm2541_vm12, %v856_v39, 0.0  ;;  %v863_v32 = vsel %vm2752_vm15, %v857_v26, 0.0  ;;  %v864_v7 = vsel %vm2943_vm7, %v858_v11, 0.0  ;;  %v1757_v54 = vunpack.i.h.bf16 %v2776_v62 }
 0x1b7   :  { %v877_v46 = vpack.c.bf16 %v862_v52, %v862_v52  ;;  %v878_v13 = vpack.c.bf16 %v863_v32, %v863_v32  ;;  %v879_v38 = vpack.c.bf16 %v864_v7, %v864_v7  ;;  %v1802_v51 = vunpack.i.h.bf16 %v2845_v58 }
 0x1b8   :  { %v1801_v41 = vunpack.i.l.bf16 %v2845_v58  ;;  %vm3887_vm11 = vcmask 1043456   ;;  %vm2972_vm13 = vcmp.eq.s32.totalorder %v403_v30, 1  ;;  %v1767_v32 = vunpack.i.h.bf16 %v2768_v35 }
 0x1b9   :  { %v2965_v39 = vpop.permute.xlu2 %724  ;;  %v2967_v15 = vpop.permute.xlu1 %1819  ;;  %v891_v26 = vsel %vm3887_vm11, %v877_v46, 0  ;;  %vm3888_vm12 = vmmov %vm3887_vm11  ;;  %v1777_v58 = vunpack.i.h.bf16 %v2847_v60  ;;  %vm2979_vm1 = vcmp.eq.s32.totalorder %v434_v56, 1  ;;  %v1817_v46 = vunpack.i.h.bf16 %v2940_v24 }
 0x1ba   :  { %v894_v52 = vsel %vm3888_vm12, %v878_v13, 0  ;;  %vm3889_vm15 = vmmov %vm3887_vm11  ;;  %v1810_v7 = vpop.permute.xlu0 %1809  ;;  %902 = vmatpush.bf16.msrb.mxu2 %v891_v26  ;;  %vm3894_vm11 = vcmask 777216   ;;  %v1772_v60 = vunpack.i.h.bf16 %v2851_v19 }
 0x1bb   :  { %v897_v11 = vsel %vm3889_vm15, %v879_v38, 0  ;;  %915 = vmatpush.bf16.msrb.mxu3 %v894_v52  ;;  %v1816_v38 = vunpack.i.l.bf16 %v2940_v24  ;;  %v1812_v13 = vunpack.i.h.bf16 %v1810_v7  ;;  %v1811_v30 = vunpack.i.l.bf16 %v1810_v7  ;;  %vm3895_vm12 = vmmov %vm3894_vm11 }
 0x1bc   :  { %928 = vmatpush.bf16.msra.mxu0 %v897_v11  ;;  %v824_v26 = vsel %vm3894_vm11, %v1801_v41, %v2689_v43  ;;  %v822_v56 = vsel %vm3895_vm12, %v1802_v51, %v1757_v54  ;;  %vm3896_vm15 = vmmov %vm3894_vm11  ;;  %v1806_v51 = vunpack.i.l.bf16 %v2889_v17  ;;  %vm3900_vm11 = vcmask 1022976  }
 0x1bd   :  { %v823_v52 = vsel %vm3896_vm15, %v1757_v54, %v1801_v41  ;;  %v841_v24 = vsel %vm3897_vm9, %v1811_v30, %v2773_v20  ;;  %v839_v11 = vsel %vm3898_vm2, %v1812_v13, %v1762_v8  ;;  %v840_v7 = vsel %vm3899_vm8, %v1762_v8, %v1811_v30  ;;  %vm3901_vm12 = vmmov %vm3900_vm11 }
 0x1be   :  { %v1556_v36 = vpack.c.bf16 %v841_v24, %v824_v26  ;;  %v1530_v50 = vpack.c.bf16 %v839_v11, %v822_v56  ;;  %v1543_v43 = vpack.c.bf16 %v840_v7, %v823_v52  ;;  %v805_v54 = vsel %vm3900_vm11, %v1817_v46, %v1767_v32  ;;  %vm3904_vm8 = vmpackc.low %vm2784_vm14, %vm2780_vm4 }
 0x1bf   :  { %v806_v41 = vsel %vm3901_vm12, %v1767_v32, %v1816_v38  ;;  %vm3902_vm9 = vnez %v3821_v59  ;;  %vm3014_vm15 = vcmp.eq.s32.totalorder %v524_v34, 1  ;;  %vm3907_vm11 = vmpackc.low %vm2837_vm0, %vm2833_vm10  ;;  %vm3909_vm12 = vcmask 23552  }
 0x1c0   :  { %vm3903_vm2 = vmpackc.low %vm2590_vm3, %vm3902_vm9  ;;  %1544 = vmatpush.bf16.msk.msrb.mxu3 %vm3904_vm8, %v1543_v43  ;;  %1557 = vmatpush.bf16.msk.msra.mxu0 %vm3907_vm11, %v1556_v36  ;;  %vm3908_vm3 = vcmask 269312   ;;  %v777_v14 = vsel %vm3909_vm12, %v1807_v4, %v1777_v58  ;;  %vm3911_vm4 = vcmask 728064   ;;  %v1533_v2 = vpack.c.bf16 %v805_v54, %v2465_v28 }
 0x1c1   :  { %1531 = vmatpush.bf16.msk.msrb.mxu2 %vm3903_vm2, %v1530_v50  ;;  %v623_v16 = vpop.permute.xlu2 %622  ;;  %v776_v59 = vpop.permute.xlu1 %775  ;;  %v760_v20 = vsel %vm3908_vm3, %v1792_v12, %v1772_v60  ;;  %v1546_v32 = vpack.c.bf16 %v806_v41, %v2459_v23  ;;  %vm3912_vm14 = vmmov %vm3908_vm3  ;;  %v1821_v46 = vunpack.i.l.bf16 %v2967_v15  ;;  %vm3913_vm9 = vcmask 1022976  }
 0x1c2   :  { %v627_v50 = vsel %vm3911_vm4, %v3910_v6, %v623_v16  ;;  %v804_v17 = vpop.permute.xlu0 %803  ;;  %v761_v34 = vsel %vm3912_vm14, %v1772_v60, %v1791_v10  ;;  %vm3914_vm2 = vnez %v3752_v45  ;;  %vm3915_vm11 = vmmov %vm3909_vm12  ;;  %vm3916_vm3 = vnez %v3787_v48 }
 0x1c3   :  { %v807_v36 = vsel %vm3913_vm9, %v1816_v38, %v804_v17  ;;  %vm3724_vm8 = vmpackc.low %vm3014_vm15, %vm3914_vm2  ;;  %v633_v12 = vsel %vm2943_vm7, %v627_v50, 0.0  ;;  %v778_v63 = vsel %vm3915_vm11, %v1777_v58, %v1806_v51  ;;  %vm3918_vm4 = vnez %v3855_v9 }
 0x1c4   :  { %v1559_v13 = vpack.c.bf16 %v807_v36, %v2476_v31  ;;  %vm3917_vm12 = vmpackc.low %vm2627_vm6, %vm3916_vm3  ;;  %vm3919_vm14 = vnez %v3791_v61  ;;  %v648_v60 = vpack.c.bf16 %v633_v12, %v633_v12  ;;  %vm3921_vm7 = vcmask 1043456  }
 0x1c5   :  { %1534 = vmatpush.bf16.msk.msrb.mxu2 %vm3917_vm12, %v1533_v2  ;;  %vm3920_vm9 = vmpackc.low %vm3918_vm4, %vm3919_vm14  ;;  %v1536_v58 = vpack.c.bf16 %v777_v14, %v760_v20  ;;  %v1549_v38 = vpack.c.bf16 %v778_v63, %v761_v34  ;;  %v1787_v30 = vunpack.i.h.bf16 %v2893_v18  ;;  %vm3922_vm6 = vcmask 318464  }
 0x1c6   :  { %1547 = vmatpush.bf16.msk.msrb.mxu3 %vm3920_vm9, %v1546_v32  ;;  %1560 = vmatpush.bf16.msk.msra.mxu0 %vm3724_vm8, %v1559_v13  ;;  %v666_v42 = vsel %vm3921_vm7, %v648_v60, 0  ;;  %v727_v9 = vsel %vm3922_vm6, %v1782_v47, %v1821_v46  ;;  %vm3923_vm11 = vnez %v3838_v0  ;;  %vm3924_vm12 = vnez %v3834_v49 }
 0x1c7   :  { %697 = vmatpush.bf16.msrb.mxu1 %v666_v42  ;;  %vm3925_vm4 = vmpackc.low %vm3923_vm11, %vm3924_vm12  ;;  %vm3926_vm9 = vnez %v3867_v37  ;;  %vm3929_vm7 = vcmask 293888   ;;  %vm3930_vm6 = vcmask 23552   ;;  %vm3931_vm14 = vcmask 269312  }
 0x1c8   :  { %vm3928_vm8 = vmpackc.low %vm3926_vm9, %vm3927_vm5  ;;  %v744_v26 = vsel %vm3929_vm7, %v1787_v30, %v2938_v53  ;;  %v779_v24 = vsel %vm3930_vm6, %v1806_v51, %v776_v59  ;;  %vm3932_vm11 = vnez %v3874_v40  ;;  %vm3933_vm12 = vnez %v3872_v3 }
 0x1c9   :  { %1537 = vmatpush.bf16.msk.msrb.mxu2 %vm3925_vm4, %v1536_v58  ;;  %v3072_v4 = vpop.permute.xlu1 %884  ;;  %v1552_v52 = vpack.c.bf16 %v744_v26, %v727_v9  ;;  %vm3934_vm4 = vmpackc.low %vm3932_vm11, %vm3933_vm12  ;;  %vm3935_vm5 = vnez %v3880_v25  ;;  %vm3938_vm7 = vcmask 588800   ;;  %vm3940_vm6 = vcmask 293888   ;;  %v539_v41 = vpop.permute.xlu2 %538 }
 0x1ca   :  { %1550 = vmatpush.bf16.msk.msrb.mxu3 %vm3928_vm8, %v1549_v38  ;;  %v759_v56 = vpop.permute.xlu0 %758  ;;  %vm3936_vm8 = vnez %v3878_v22  ;;  %vm3942_vm12 = vmmov %vm3940_vm6  ;;  %v3949_v14 = vunpack.i.l.bf16 %v2776_v62  ;;  %v3953_v6 = vunpack.i.l.bf16 %v2768_v35  ;;  %v3956_v2 = vunpack.i.l.bf16 %v2851_v19 }
 0x1cb   :  { %v762_v0 = vsel %vm3931_vm14, %v1791_v10, %v759_v56  ;;  %vm3937_vm9 = vmpackc.low %vm3935_vm5, %vm3936_vm8  ;;  %v1822_v10 = vunpack.i.h.bf16 %v2967_v15  ;;  %vm3939_vm14 = vcmask 318464   ;;  %v3947_v15 = vunpack.i.l.bf16 %v2764_v29  ;;  %v1910_v29 = vld [vmem:[%s3646_s0 + $0x10] sm:$0xff]  ;;  %s1931_s0 = smov 68  }
 0x1cc   :  { %v1562_v49 = vpack.c.bf16 %v779_v24, %v762_v0  ;;  %v728_v7 = vsel %vm3939_vm14, %v1821_v46, %v2965_v39  ;;  %vm3941_vm11 = vmmov %vm3939_vm14  ;;  %v3962_v12 = vunpack.i.l.bf16 %v2893_v18  ;;  %v3964_v19 = vunpack.i.l.bf16 %v2778_v21  ;;  %v3968_v18 = vld [vmem:[#allocation6_spill] sm:$0xff] }
 0x1cd   :  { %v726_v51 = vsel %vm3941_vm11, %v1822_v10, %v1782_v47  ;;  %vm3946_vm14 = vmpackc.low %vm2979_vm1, %vm2972_vm13  ;;  %vm3950_vm11 = vcmask 777216   ;;  %v3969_v0 = vmov 0.0  }
 0x1ce   :  { %1553 = vmatpush.bf16.msk.msrb.mxu3 %vm3934_vm4, %v1552_v52  ;;  %1563 = vmatpush.bf16.msk.msra.mxu0 %vm3937_vm9, %v1562_v49  ;;  %vm3943_vm4 = vnez %v3843_v33  ;;  %vm3944_vm9 = vnez %v3841_v55 }
 0x1d1   :  { %1554 = vmatmul.msk.bf16.vlgmr.msrb.gmra.mxu3 %vm3938_vm7, %v880_v27  ;;  %v596_v37 = vpop.permute.xlu1 %595  ;;  %vm3945_vm7 = vmpackc.low %vm3943_vm4, %vm3944_vm9  ;;  %vm3954_vm9 = vcmask 1022976   ;;  %v501_v17 = vpop.permute.xlu2 %500 }
 0x1d2   :  { %v1825_v40 = vpop.permute.xlu0 %1824  ;;  %v543_v50 = vsel %vm3954_vm9, %v3953_v6, %v539_v41  ;;  %v3976_v41 = vmov 0  }
 0x1d3   :  { %v1827_v11 = vunpack.i.h.bf16 %v1825_v40  ;;  %v1826_v3 = vunpack.i.l.bf16 %v1825_v40  ;;  %v1520_v62 = vpack.c.bf16 %v543_v50, %v1910_v29  ;;  %v1911_v40 = vld [vmem:[%s3647_s1] sm:$0x7] }
 0x1d5   :  { %v745_v43 = vsel %vm3940_vm6, %v2938_v53, %v1827_v11  ;;  %v743_v54 = vsel %vm3942_vm12, %v1826_v3, %v1787_v30  ;;  %vm3948_vm6 = vcmask 752640   ;;  %vm3951_vm12 = vcmask 588800   ;;  %v3189_v11 = vld [vmem:[%s3648_s2] sm:$0x7] }
 0x1d6   :  { %v1565_v16 = vpack.c.bf16 %v745_v43, %v728_v7  ;;  %v1539_v59 = vpack.c.bf16 %v743_v54, %v726_v51  ;;  %v600_v20 = vsel %vm3948_vm6, %v3947_v15, %v596_v37  ;;  %vm3952_vm4 = vmmov %vm3951_vm12  ;;  %vm3729_vm9 = vcmp.ge.s32.totalorder %v3189_v11, 5  ;;  %v3971_v7 = vld [vmem:[#allocation3_spill] sm:$0xff] }
 0x1d7   :  { %vm3958_vm6 = vmpackc.low %vm3014_vm15, %vm3914_vm2 }
 0x1d8   :  { %1540 = vmatpush.bf16.msk.msrb.mxu2 %vm3945_vm7, %v1539_v59  ;;  %1566 = vmatpush.bf16.msk.msra.mxu0 %vm3946_vm14, %v1565_v16  ;;  %vm3955_vm7 = vmpackc.low %vm2837_vm0, %vm2833_vm10  ;;  %vm3957_vm14 = vcmask 269312   ;;  %vm3961_vm10 = vcmask 23552   ;;  %vm3963_vm0 = vcmask 293888  }
 0x1d9   :  { %v474_v53 = vpop.permute.xlu1 %473  ;;  %v505_v46 = vsel %vm3961_vm10, %v3960_v44, %v501_v17  ;;  %vm3966_vm15 = vmpackc.low %vm3935_vm5, %vm3936_vm8  ;;  %vm3725_vm5 = vcmp.ge.s32.totalorder %v3189_v11, 4294967291 }
 0x1da   :  { %v569_v39 = vpop.permute.xlu0 %568  ;;  %v478_v32 = vsel %vm3957_vm14, %v3956_v2, %v474_v53  ;;  %v3978_v53 = vld [vmem:[#allocation4_spill] sm:$0xff] }
 0x1db   :  { %v573_v33 = vsel %vm3950_vm11, %v3949_v14, %v569_v39  ;;  %1541 = vmatmul.msk.bf16.vlgmr.msrb.gmra.mxu2 %vm3951_vm12, %v880_v27  ;;  %1567 = vmatmul.msk.bf16.vlgmr.msra.gmra.mxu0 %vm3952_vm4, %v880_v27  ;;  %v1523_v36 = vpack.c.bf16 %v505_v46, %v478_v32  ;;  %vm3965_vm11 = vcmask 318464   ;;  %vm3967_vm12 = vmpackc.low %vm2979_vm1, %vm2972_vm13  ;;  %v3970_v27 = vld [vmem:[#allocation5_spill] sm:$0xff]  ;;  %vm1102_vm13 = vcmp.ge.s32.totalorder %v1911_v40, 4294967291 }
 0x1dc   :  { %v1517_v55 = vpack.c.bf16 %v600_v20, %v573_v33  ;;  %vm1103_vm1 = vcmp.lt.s32.totalorder %v1911_v40, 7 }
 0x1dd   :  { %vm1104_vm8 = vmand %vm1102_vm13, %vm1103_vm1  ;;  %vm945_vm1 = vcmp.ge.s32.totalorder %v1911_v40, 5 }
 0x1de   :  { %1518 = vmatpush.bf16.msk.msrb.mxu1 %vm3955_vm7, %v1517_v55  ;;  %vm1010_vm7 = vcmp.lt.s32.totalorder %v3189_v11, 7  ;;  %vm1159_vm14 = vmand %vm1104_vm8, %vm3725_vm5  ;;  %vm946_vm5 = vcmp.lt.s32.totalorder %v1911_v40, 17 }
 0x1df   :  { %vm1105_vm10 = vmand %vm1104_vm8, %vm3729_vm9 }
 0x1e1   :  { %v445_v34 = vpop.permute.xlu1 %444 }
 0x1e2   :  { %1521 = vmatpush.bf16.msk.msrb.mxu1 %vm3958_vm6, %v1520_v62  ;;  %v418_v35 = vpop.permute.xlu0 %417  ;;  %v449_v63 = vsel %vm3963_vm0, %v3962_v12, %v445_v34  ;;  %vm3727_vm6 = vcmp.lt.s32.totalorder %v3189_v11, 17  ;;  %vm3972_vm0 = vcmp.ge.s32.totalorder %v3971_v7, 0 }
 0x1e3   :  { %v422_v13 = vsel %vm3965_vm11, %v3964_v19, %v418_v35  ;;  %vm1132_vm11 = vmand %vm1104_vm8, %vm3972_vm0  ;;  %vm3977_vm8 = vcmp.ge.s32.totalorder %v3189_v11, 4294967291  ;;  %vm3726_vm0 = vcmask 1006592   ;;  %v4016_v19 = vmov 0 }
 0x1e4   :  { %v1526_v8 = vpack.c.bf16 %v449_v63, %v422_v13 }
 0x1e6   :  { %1524 = vmatpush.bf16.msk.msrb.mxu1 %vm3966_vm15, %v1523_v36  ;;  %vm1160_vm15 = vmand %vm1159_vm14, %vm1010_vm7  ;;  %vm3979_vm14 = vnez %v3978_v53 }
 0x1e7   :  { %v1161_v16 = vsel %vm1160_vm15, 1, %v3976_v41 }
 0x1e8   :  { %v1162_v55 = vperm.slane %v1161_v16, 0  ;;  %v1163_v6 = vperm.slane %v1161_v16, 1  ;;  %v1164_v50 = vperm.slane %v1161_v16, 2 }
 0x1ea   :  { %1527 = vmatpush.bf16.msk.msrb.mxu1 %vm3967_vm12, %v1526_v8  ;;  %vm1106_vm12 = vmand %vm1105_vm10, %vm3727_vm6  ;;  %vm4002_vm6 = vcmask 515072  }
 0x1eb   :  { %vm1071_vm10 = vmand %vm3979_vm14, %vm3977_vm8  ;;  %v1107_v14 = vsel %vm1106_vm12, 1, %v3976_v41  ;;  %vm3982_vm12 = vcmask 1043456  }
 0x1ec   :  { %vm1072_vm15 = vmand %vm1071_vm10, %vm1010_vm7  ;;  %v1108_v17 = vperm.slane %v1107_v14, 0  ;;  %v1109_v35 = vperm.slane %v1107_v14, 1  ;;  %v1110_v36 = vperm.slane %v1107_v14, 2  ;;  %vm3263_vm10 = vcmp.eq.s32.totalorder %v1163_v6, 1 }
 0x1ed   :  { %1528 = vmatmul.msk.bf16.vlgmr.msrb.gmra.mxu1 %vm3952_vm4, %v3968_v18  ;;  %vm3973_vm4 = vcmp.lt.s32.totalorder %v3971_v7, 12  ;;  %v1073_v12 = vsel %vm1072_vm15, 1, %v3976_v41  ;;  %vm1037_vm15 = vmand %vm3979_vm14, %vm3729_vm9  ;;  %vm4005_vm14 = vcmask 449536  }
 0x1ee   :  { %vm3209_vm13 = vmand %vm1132_vm11, %vm3973_vm4  ;;  %vm3287_vm4 = vcmp.eq.s32.totalorder %v1109_v35, 1  ;;  %v1076_v40 = vperm.slane %v1073_v12, 2 }
 0x1ef   :  { %vm3229_vm11 = vmand %vm945_vm1, %vm946_vm5  ;;  %v1134_v29 = vsel %vm3209_vm13, 1, %v3976_v41 }
 0x1f0   :  { %vm3983_vm13 = vmmov %vm3977_vm8  ;;  %v1135_v44 = vperm.slane %v1134_v29, 0  ;;  %v1136_v46 = vperm.slane %v1134_v29, 1  ;;  %vm3259_vm8 = vcmp.eq.s32.totalorder %v1162_v55, 1  ;;  %v1137_v8 = vperm.slane %v1134_v29, 2 }
 0x1f1   :  { %vm3254_vm1 = vmand %vm3229_vm11, %vm3983_vm13  ;;  %vm3277_vm13 = vcmp.eq.s32.totalorder %v1108_v17, 1 }
 0x1f2   :  { %vm3295_vm5 = vcmp.eq.s32.totalorder %v1135_v44, 1  ;;  %vm3308_vm2 = vcmp.eq.s32.totalorder %v1137_v8, 1  ;;  %vm4006_vm9 = vmmov %vm4002_vm6 }
 0x1f3   :  { %vm4007_vm3 = vmmov %vm4002_vm6 }
 0x221   :  { %v3155_v60 = vpop.f32.mrf.mxu3 }
 0x229   :  { %v679_v21 = vpop.f32.mrf.mxu3 }
 0x230   :  { %v3157_v47 = vpop.f32.mrf.mxu0 }
 0x238   :  { %v692_v25 = vpop.f32.mrf.mxu0 }
 0x254   :  { %v921_v42 = vpop.f32.mrf.mxu3 }
 0x255   :  { %v3167_v56 = vadd.f32 %v921_v42, %v3072_v4 }
 0x257   :  { %v1331_v59 = vpack.c.bf16 %v3167_v56, %v3167_v56 }
 0x258   :  { %v934_v22 = vpop.f32.mrf.mxu0 }
 0x259   :  { %v3164_v9 = vadd.f32 %v934_v22, %v3072_v4  ;;  %v3240_v2 = vsel %vm3982_vm12, %v1331_v59, 0  ;;  %vm3267_vm12 = vcmp.eq.s32.totalorder %v1164_v50, 1 }
 0x25b   :  { %v1868_v52 = vpack.i.bf16 %v3164_v9, %v3167_v56  ;;  %v1863_v49 = vpack.i.bf16 %v3164_v9, %v3969_v0 }
 0x25c   :  { %v923_v58 = vpop.f32.mrf.mxu3 }
 0x25e   :  { %v908_v38 = vpop.f32.mrf.mxu2 }
 0x25f   :  { %v3160_v30 = vadd.f32 %v908_v38, %v3072_v4  ;;  %v1260_v4 = vld [vmem:[%s3653_s10] sm:$0xff] }
 0x260   :  { %v936_v1 = vpop.f32.mrf.mxu0 }
 0x261   :  { %v1838_v57 = vpack.i.bf16 0.0, %v3160_v30  ;;  %v1873_v24 = vpack.i.bf16 %v3167_v56, %v3160_v30 }
 0x263   :  { %1839 = vrot.lane.b32.xlu1 %v1838_v57, %s1931_s0  ;;  %1834 = vrot.lane.b32.xlu0 %v1838_v57, %s1932_s13 }
 0x264   :  { %1829 = vrot.lane.b32.xlu2 %v1838_v57, %s1933_s14 }
 0x266   :  { %v910_v26 = vpop.f32.mrf.mxu2 }
 0x26a   :  { %v3363_v8 = vpop.f32.mrf.mxu1 }
 0x26b   :  { %1854 = vrot.lane.b32.xlu1 %v1868_v52, %s1931_s0  ;;  %1844 = vrot.lane.b32.xlu0 %v1868_v52, %s1933_s14 }
 0x26c   :  { %1869 = vrot.lane.b32.xlu2 %v1868_v52, %s1934_s15 }
 0x273   :  { %1859 = vrot.lane.b32.xlu1 %v1838_v57, %s1934_s15  ;;  %1849 = vrot.lane.b32.xlu0 %v1868_v52, %s1932_s13  ;;  %v1074_v52 = vperm.slane %v1073_v12, 0 }
 0x274   :  { %1874 = vrot.lane.b32.xlu2 %v1873_v24, %s1935_s16 }
 0x27b   :  { %1864 = vrot.lane.b32.xlu1 %v1863_v49, %s1935_s16  ;;  %1879 = vrot.lane.b32.xlu0 %v1873_v24, %s1936_s17 }
 0x27c   :  { %1884 = vrot.lane.b32.xlu2 %v1873_v24, %s1937_s4 }
 0x283   :  { %1904 = vrot.lane.b32.xlu1 %v1863_v49, %s1938_s18  ;;  %1894 = vrot.lane.b32.xlu0 %v1873_v24, %s1938_s18 }
 0x284   :  { %1889 = vrot.lane.b32.xlu2 %v1863_v49, %s1936_s17 }
 0x28b   :  { %1269 = vperm.xlu1 %1707, %v1260_v4   ;;  %1899 = vrot.lane.b32.xlu0 %v1863_v49, %s1937_s4  ;;  %v1075_v4 = vperm.slane %v1073_v12, 1 }
 0x28c   :  { %653 = vperm.xlu2 %1908, %v3970_v27  }
 0x2be   :  { %v3179_v10 = vpop.permute.xlu2 %1829 }
 0x2bf   :  { %v1832_v62 = vunpack.i.h.bf16 %v3179_v10  ;;  %v1831_v32 = vunpack.i.l.bf16 %v3179_v10  ;;  %v4003_v10 = vmov 0 }
 0x2c0   :  { %v4004_v10 = vsel %vm3308_vm2, 4294967295, %v4003_v10 }
 0x2c6   :  { %v3181_v37 = vpop.permute.xlu2 %1869 }
 0x2c7   :  { %v1872_v39 = vunpack.i.h.bf16 %v3181_v37  ;;  %v1871_v15 = vunpack.i.l.bf16 %v3181_v37 }
 0x2c9   :  { %v3248_v34 = vsel %vm3726_vm0, %v1871_v15, %v1872_v39  ;;  %vm1011_vm0 = vmand %vm3254_vm1, %vm1010_vm7  ;;  %vm3299_vm7 = vcmp.eq.s32.totalorder %v1136_v46, 1  ;;  %vm3303_vm1 = vcmp.eq.s32.totalorder %v1110_v36, 1 }
 0x2ca   :  { %v1585_v18 = vpack.c.bf16 %v3248_v34, %v3167_v56  ;;  %v3313_v43 = vsel %vm1011_vm0, 1, %v3976_v41  ;;  %vm4015_vm0 = vcmask 1043456  }
 0x2cb   :  { %v1013_v44 = vperm.slane %v3313_v43, 0  ;;  %v1014_v46 = vperm.slane %v3313_v43, 1 }
 0x2ce   :  { %v3193_v3 = vpop.permute.xlu2 %1874 }
 0x2cf   :  { %v1877_v21 = vunpack.i.h.bf16 %v3193_v3  ;;  %v1876_v25 = vunpack.i.l.bf16 %v3193_v3 }
 0x2d1   :  { %v3320_v16 = vsel %vm4005_vm14, %v1876_v25, %v1877_v21  ;;  %vm4030_vm14 = vcmask 596992  }
 0x2d5   :  { %v3213_v51 = vpop.permute.xlu1 %1839  ;;  %v3215_v54 = vpop.permute.xlu0 %1834 }
 0x2d6   :  { %v3226_v20 = vpop.permute.xlu2 %1884  ;;  %v1842_v6 = vunpack.i.h.bf16 %v3213_v51  ;;  %v1841_v36 = vunpack.i.l.bf16 %v3213_v51  ;;  %v1837_v12 = vunpack.i.h.bf16 %v3215_v54 }
 0x2d7   :  { %v1886_v56 = vunpack.i.l.bf16 %v3226_v20 }
 0x2dd   :  { %v3275_v42 = vpop.permute.xlu1 %1854  ;;  %v1845_v22 = vpop.permute.xlu0 %1844 }
 0x2de   :  { %v3285_v38 = vpop.permute.xlu2 %1889  ;;  %v1847_v1 = vunpack.i.h.bf16 %v1845_v22  ;;  %v1846_v57 = vunpack.i.l.bf16 %v1845_v22  ;;  %v1857_v51 = vunpack.i.h.bf16 %v3275_v42  ;;  %v1856_v22 = vunpack.i.l.bf16 %v3275_v42 }
 0x2df   :  { %v1891_v58 = vunpack.i.l.bf16 %v3285_v38 }
 0x2e0   :  { %v1179_v27 = vsel %vm4002_vm6, %v1847_v1, %v1832_v62  ;;  %v1177_v59 = vsel %vm4006_vm9, %v1831_v32, %v1846_v57  ;;  %v1178_v53 = vsel %vm4007_vm3, %v1846_v57, %v1847_v1  ;;  %vm4008_vm6 = vcmp.lt.s32.totalorder %v3189_v11, 17 }
 0x2e1   :  { %v1185_v14 = vsel %vm3267_vm12, %v1179_v27, 0.0  ;;  %vm3328_vm2 = vmand %vm1037_vm15, %vm4008_vm6  ;;  %v1183_v50 = vsel %vm3259_vm8, %v1177_v59, 0.0  ;;  %v1184_v29 = vsel %vm3263_vm10, %v1178_v53, 0.0  ;;  %vm3337_vm9 = vcmp.eq.s32.totalorder %v1074_v52, 1 }
 0x2e2   :  { %v1200_v62 = vpack.c.bf16 %v1185_v14, %v1185_v14  ;;  %v1198_v32 = vpack.c.bf16 %v1183_v50, %v1183_v50  ;;  %v1199_v35 = vpack.c.bf16 %v1184_v29, %v1184_v29  ;;  %vm3341_vm3 = vcmp.eq.s32.totalorder %v1075_v4, 1  ;;  %vm4018_vm12 = vmmov %vm4015_vm0  ;;  %v1202_v14 = vld [vmem:[%s3655_s8] sm:$0xff] }
 0x2e3   :  { %v4014_v5 = vsel %vm3341_vm3, 4294967295, %v4013_v5  ;;  %vm3354_vm10 = vcmp.eq.s32.totalorder %v1076_v40, 1  ;;  %v3361_v13 = vsel %vm3328_vm2, 1, %v3976_v41  ;;  %vm4019_vm15 = vmmov %vm4015_vm0  ;;  %v1836_v27 = vunpack.i.l.bf16 %v3215_v54  ;;  %1205 = vperm.xlu0 %1909, %v1202_v14  }
 0x2e4   :  { %v1218_v63 = vsel %vm4015_vm0, %v1200_v62, 0  ;;  %v4017_v19 = vsel %vm3354_vm10, 4294967295, %v4016_v19  ;;  %v1212_v52 = vsel %vm4018_vm12, %v1198_v32, 0  ;;  %v1215_v4 = vsel %vm4019_vm15, %v1199_v35, 0  ;;  %vm4031_vm8 = vmmov %vm4030_vm14 }
 0x2e5   :  { %v1860_v1 = vpop.permute.xlu1 %1859  ;;  %v1850_v57 = vpop.permute.xlu0 %1849  ;;  %1249 = vmatpush.bf16.msra.mxu3 %v1218_v63  ;;  %1223 = vmatpush.bf16.msra.mxu1 %v1212_v52  ;;  %v1015_v53 = vperm.slane %v3313_v43, 2  ;;  %vm4020_vm0 = vcmp.ge.s32.totalorder %v3189_v11, 5  ;;  %vm3387_vm15 = vcmp.eq.s32.totalorder %v1013_v44, 1  ;;  %v4023_v54 = vmov 0 }
 0x2e6   :  { %v3374_v40 = vpop.permute.xlu2 %653  ;;  %v1852_v59 = vunpack.i.h.bf16 %v1850_v57  ;;  %v1851_v42 = vunpack.i.l.bf16 %v1850_v57  ;;  %1236 = vmatpush.bf16.msra.mxu2 %v1215_v4  ;;  %vm3381_vm12 = vmand %vm3229_vm11, %vm4020_vm0  ;;  %v4024_v54 = vsel %vm3387_vm15, 4294967295, %v4023_v54  ;;  %v1040_v50 = vperm.slane %v3361_v13, 0 }
 0x2e7   :  { %v678_v55 = vadd.f32 %v3155_v60, %v3374_v40  ;;  %vm3392_vm6 = vcmp.eq.s32.totalorder %v1014_v46, 1  ;;  %v4025_v29 = vmov 0  ;;  %vm4027_vm2 = vcmp.ge.s32.totalorder %v3971_v7, 0 }
 0x2e8   :  { %v4026_v29 = vsel %vm3392_vm6, 4294967295, %v4025_v29  ;;  %vm3400_vm0 = vmand %vm3229_vm11, %vm4027_vm2  ;;  %v1862_v62 = vunpack.i.h.bf16 %v1860_v1  ;;  %v1861_v60 = vunpack.i.l.bf16 %v1860_v1  ;;  %v1125_v32 = vsel %vm4030_vm14, %v1852_v59, %v1837_v12 }
 0x2e9   :  { %v1123_v35 = vsel %vm4031_vm8, %v1836_v27, %v1851_v42  ;;  %vm4032_vm15 = vnez %v4004_v10  ;;  %vm4033_vm6 = vcmask 556032   ;;  %v1264_v33 = vpack.c.bf16 %v678_v55, %v678_v55  ;;  %v3472_v10 = vld [vmem:[%s3654_s9] sm:$0xf] }
 0x2ea   :  { %v1152_v44 = vsel %vm4033_vm6, %v1857_v51, %v1842_v6  ;;  %vm4034_vm3 = vmmov %vm4033_vm6  ;;  %v1041_v63 = vperm.slane %v3361_v13, 1  ;;  %vm4035_vm11 = vcmp.lt.s32.totalorder %v3189_v11, 17  ;;  %v1124_v52 = vsel %vm4030_vm14, %v1851_v42, %v1852_v59 }
 0x2eb   :  { %v1150_v46 = vsel %vm4034_vm3, %v1841_v36, %v1856_v22  ;;  %vm3417_vm2 = vmand %vm3381_vm12, %vm4035_vm11  ;;  %v1595_v57 = vpack.c.bf16 %v1152_v44, %v1125_v32  ;;  %vm4039_vm6 = vcmp.lt.s32.totalorder %v3971_v7, 12  ;;  %vm4042_vm10 = vcmask 1043456  }
 0x2ec   :  { %vm4038_vm8 = vmmov %vm4034_vm3  ;;  %v1569_v4 = vpack.c.bf16 %v1150_v46, %v1123_v35  ;;  %v1277_v36 = vsel %vm4042_vm10, %v1264_v33, 0  ;;  %vm3432_vm12 = vcmp.eq.s32.totalorder %v1015_v53, 1  ;;  %vm4045_vm11 = vcmask 1006592  }
 0x2ed   :  { %v1151_v1 = vsel %vm4038_vm8, %v1856_v22, %v1857_v51  ;;  %vm3427_vm3 = vmand %vm3400_vm0, %vm4039_vm6  ;;  %v1042_v51 = vperm.slane %v3361_v13, 2  ;;  %v1095_v22 = vsel %vm4045_vm11, %v1872_v39, %v1862_v62  ;;  %vm3453_vm14 = vcmp.eq.s32.totalorder %v1040_v50, 1  ;;  %v705_v39 = vpop.f32.mrf.mxu1  ;;  %1292 = vmatpush.bf16.msrb.mxu0 %v1277_v36  ;;  %v1865_v24 = vpop.permute.xlu1 %1864 }
 0x2ee   :  { %v1582_v11 = vpack.c.bf16 %v1151_v1, %v1124_v52  ;;  %vm4046_vm8 = vmmov %vm4045_vm11  ;;  %v3460_v37 = vsel %vm3417_vm2, 1, %v3976_v41  ;;  %v1880_v49 = vpop.permute.xlu0 %1879  ;;  %v3485_v26 = vsel %vm3427_vm3, 1, %v3976_v41  ;;  %v1867_v0 = vunpack.i.h.bf16 %v1865_v24 }
 0x2ef   :  { %v1093_v7 = vsel %vm4046_vm8, %v1861_v60, %v1871_v15  ;;  %vm4047_vm0 = vmpackc.low %vm3295_vm5, %vm3277_vm13  ;;  %v1892_v15 = vunpack.i.h.bf16 %v3285_v38  ;;  %vm4052_vm13 = vnez %v3787_v48  ;;  %v1866_v59 = vunpack.i.l.bf16 %v1865_v24 }
 0x2f0   :  { %1570 = vmatpush.bf16.msk.msra.mxu1 %vm4047_vm0, %v1569_v4  ;;  %vm4048_vm10 = vmpackc.low %vm4032_vm15, %vm3303_vm1  ;;  %vm3478_vm15 = vcmp.eq.s32.totalorder %v1041_v63, 1  ;;  %v1882_v42 = vunpack.i.h.bf16 %v1880_v49  ;;  %v1881_v53 = vunpack.i.l.bf16 %v1880_v49  ;;  %v1598_v55 = vpack.c.bf16 %v1095_v22, %v3164_v9 }
 0x2f1   :  { %1596 = vmatpush.bf16.msk.msra.mxu3 %vm4048_vm10, %v1595_v57  ;;  %vm4051_vm5 = vmpackc.low %vm3299_vm7, %vm3287_vm4  ;;  %1362 = vmatpush.bf16.msra.mxu0 %v3240_v2  ;;  %vm4055_vm4 = vnez %v3791_v61  ;;  %vm4056_vm7 = vnez %v4014_v5  ;;  %v1572_v41 = vpack.c.bf16 %v1093_v7, %v3160_v30  ;;  %vm4057_vm6 = vnez %v3752_v45  ;;  %v1201_v57 = vld [vmem:[%s3656_s7] sm:$0xf] }
 0x2f2   :  { %1583 = vmatpush.bf16.msk.msra.mxu2 %vm4051_vm5, %v1582_v11  ;;  %vm4058_vm3 = vnez %v4017_v19  ;;  %vm3501_vm8 = vcmp.eq.s32.totalorder %v1042_v51, 1  ;;  %v4059_v2 = vmov 0  ;;  %v954_v50 = vperm.slane %v3460_v37, 1 }
 0x2f3   :  { %v4060_v2 = vsel %vm3501_vm8, 4294967295, %v4059_v2  ;;  %vm4061_vm0 = vcmask 449536   ;;  %vm4063_vm5 = vcmask 39936   ;;  %vm4065_vm11 = vcmask 64512   ;;  %vm4067_vm8 = vmpackc.low %vm3337_vm9, %vm4052_vm13 }
 0x2f4   :  { %v1030_v43 = vsel %vm4061_vm0, %v1877_v21, %v1867_v0  ;;  %vm4062_vm10 = vmmov %vm4061_vm0  ;;  %v1057_v60 = vsel %vm4063_vm5, %v1882_v42, %v1892_v15  ;;  %1607 = vmatmul.msk.bf16.vlgmr.msrb.gmra.mxu0 %vm4065_vm11, %v3472_v10  ;;  %1573 = vmatpush.bf16.msk.msra.mxu1 %vm4067_vm8, %v1572_v41  ;;  %vm4069_vm11 = vnez %v4024_v54  ;;  %v985_v3 = vperm.slane %v3485_v26, 1 }
 0x2f5   :  { %v1028_v62 = vsel %vm4062_vm10, %v1866_v59, %v1876_v25  ;;  %vm4064_vm2 = vmmov %vm4063_vm5  ;;  %v704_v48 = vadd.f32 %v3363_v8, %v3374_v40  ;;  %v1601_v21 = vpack.c.bf16 %v1057_v60, %v1030_v43  ;;  %vm4071_vm13 = vnez %v4026_v29  ;;  %v1905_v29 = vpop.permute.xlu1 %1904 }
 0x2f6   :  { %v1055_v32 = vsel %vm4064_vm2, %v1891_v58, %v1881_v53  ;;  %vm4066_vm1 = vmmov %vm4064_vm2  ;;  %vm971_vm8 = vcmask 531456   ;;  %v1887_v61 = vunpack.i.h.bf16 %v3226_v20  ;;  %vm998_vm0 = vcmask 490496   ;;  %v1895_v45 = vpop.permute.xlu0 %1894 }
 0x2f7   :  { %v1056_v35 = vsel %vm4066_vm1, %v1881_v53, %v1882_v42  ;;  %v1575_v44 = vpack.c.bf16 %v1055_v32, %v1028_v62  ;;  %vm4068_vm2 = vmpackc.low %vm4056_vm7, %vm4055_vm4  ;;  %v1897_v17 = vunpack.i.h.bf16 %v1895_v45  ;;  %v1896_v5 = vunpack.i.l.bf16 %v1895_v45 }
 0x2f8   :  { %1586 = vmatpush.bf16.msk.msra.mxu2 %vm4068_vm2, %v1585_v18  ;;  %vm1574_vm1 = vmpackc.low %vm3453_vm14, %vm4069_vm11  ;;  %v1588_v25 = vpack.c.bf16 %v1056_v35, %v3320_v16  ;;  %vm4072_vm14 = vnez %v4060_v2  ;;  %v1266_v16 = vpack.c.bf16 %v704_v48, %v704_v48  ;;  %v973_v19 = vsel %vm971_vm8, %v1886_v56, %v1887_v61 }
 0x2f9   :  { %vm4070_vm9 = vmpackc.low %vm4058_vm3, %vm4057_vm6  ;;  %1576 = vmatpush.bf16.msk.msra.mxu1 %vm1574_vm1, %v1575_v44  ;;  %vm3553_vm6 = vcmp.eq.s32.totalorder %v954_v50, 1  ;;  %vm3557_vm3 = vcmp.eq.s32.totalorder %v985_v3, 1  ;;  %v1000_v20 = vsel %vm998_vm0, %v1896_v5, %v1897_v17  ;;  %v953_v8 = vperm.slane %v3460_v37, 0 }
 0x2fa   :  { %1599 = vmatpush.bf16.msk.msra.mxu3 %vm4070_vm9, %v1598_v55  ;;  %vm1587_vm4 = vmpackc.low %vm3478_vm15, %vm4071_vm13  ;;  %v984_v54 = vperm.slane %v3485_v26, 0  ;;  %v1591_v46 = vpack.c.bf16 %v1000_v20, %v973_v19  ;;  %v955_v33 = vperm.slane %v3460_v37, 2  ;;  %v986_v63 = vperm.slane %v3485_v26, 2 }
 0x2fb   :  { %vm1600_vm7 = vmpackc.low %vm4072_vm14, %vm3432_vm12  ;;  %vm4077_vm15 = vcmask 1043456   ;;  %v691_v1 = vadd.f32 %v3157_v47, %v3374_v40  ;;  %v1907_v52 = vunpack.i.h.bf16 %v1905_v29  ;;  %v1906_v4 = vunpack.i.l.bf16 %v1905_v29 }
 0x2fc   :  { %1589 = vmatpush.bf16.msk.msra.mxu2 %vm1587_vm4, %v1588_v25  ;;  %vm1590_vm12 = vmpackc.low %vm3557_vm3, %vm3553_vm6  ;;  %v1283_v12 = vsel %vm4077_vm15, %v1266_v16, 0  ;;  %vm3577_vm10 = vcmp.eq.s32.totalorder %v953_v8, 1  ;;  %vm3581_vm5 = vcmp.eq.s32.totalorder %v984_v54, 1  ;;  %vm3585_vm2 = vcmp.eq.s32.totalorder %v955_v33, 1 }
 0x2fd   :  { %vm3589_vm11 = vcmp.eq.s32.totalorder %v986_v63, 1  ;;  %vm4086_vm1 = vcmask 588800   ;;  %v1265_v22 = vpack.c.bf16 %v691_v1, %v691_v1  ;;  %vm1577_vm9 = vmpackc.low %vm3581_vm5, %vm3577_vm10  ;;  %v1330_v7 = vpack.c.bf16 %v3160_v30, %v3160_v30 }
 0x2fe   :  { %1602 = vmatpush.bf16.msk.msra.mxu3 %vm1600_vm7, %v1601_v21  ;;  %v1900_v36 = vpop.permute.xlu0 %1899  ;;  %v1001_v13 = vsel %vm998_vm0, %v1897_v17, %v1907_v52  ;;  %v999_v37 = vsel %vm998_vm0, %v1906_v4, %v1896_v5  ;;  %vm4087_vm13 = vcmask 64512   ;;  %vm1603_vm4 = vmpackc.low %vm3589_vm11, %vm3585_vm2  ;;  %v1332_v30 = vpack.c.bf16 %v3164_v9, %v3164_v9 }
 0x2ff   :  { %v1902_v40 = vunpack.i.h.bf16 %v1900_v36  ;;  %v1901_v51 = vunpack.i.l.bf16 %v1900_v36  ;;  %vm4088_vm14 = vmmov %vm4077_vm15  ;;  %v1262_v17 = vmax.f32 %v2459_v23, 0.0  ;;  %v1263_v23 = vmax.f32 %v2476_v31, 0.0 }
 0x300   :  { %1592 = vmatpush.bf16.msk.msra.mxu2 %vm1590_vm12, %v1591_v46  ;;  %v1280_v49 = vsel %vm4088_vm14, %v1265_v22, 0  ;;  %vm4089_vm7 = vmmov %vm4088_vm14  ;;  %v1261_v46 = vmax.f32 %v2465_v28, 0.0 }
 0x301   :  { %v974_v39 = vsel %vm971_vm8, %v1887_v61, %v1902_v40  ;;  %v972_v15 = vsel %vm971_vm8, %v1901_v51, %v1886_v56  ;;  %v1334_v38 = vsel %vm4089_vm7, %v1330_v7, 0  ;;  %vm4090_vm8 = vmmov %vm4086_vm1  ;;  %v1270_v56 = vpop.permute.xlu1 %1269 }
 0x302   :  { %v1578_v58 = vpack.c.bf16 %v999_v37, %v972_v15  ;;  %v1604_v24 = vpack.c.bf16 %v1001_v13, %v974_v39  ;;  %vm4091_vm0 = vmmov %vm4086_vm1 }
 0x303   :  { %1593 = vmatmul.msk.bf16.vlgmr.msra.gmra.mxu2 %vm4086_vm1, %v1201_v57  ;;  %vm4092_vm6 = vmmov %vm4089_vm7 }
 0x304   :  { %1318 = vmatpush.bf16.msrb.mxu2 %v1283_v12  ;;  %1611 = vmatmul.msk.bf16.vlgmr.msra.gmra.mxu0 %vm4087_vm13, %v3472_v10  ;;  %v1340_v26 = vsel %vm4092_vm6, %v1332_v30, 0  ;;  %vm4093_vm3 = vmmov %vm4087_vm13 }
 0x305   :  { %1579 = vmatpush.bf16.msk.msra.mxu1 %vm1577_vm9, %v1578_v58  ;;  %1605 = vmatpush.bf16.msk.msra.mxu3 %vm1603_vm4, %v1604_v24  ;;  %vm4094_vm12 = vmmov %vm4093_vm3 }
 0x306   :  { %vm4095_vm15 = vmmov %vm4093_vm3 }
 0x307   :  { %vm4096_vm10 = vmmov %vm4093_vm3 }
 0x308   :  { %1580 = vmatmul.msk.bf16.vlgmr.msra.gmra.mxu1 %vm4090_vm8, %v1201_v57  ;;  %1606 = vmatmul.msk.bf16.vlgmr.msra.gmra.mxu3 %vm4091_vm0, %v1201_v57  ;;  %vm4097_vm5 = vmmov %vm4092_vm6 }
 0x309   :  { %1305 = vmatpush.bf16.msrb.mxu1 %v1280_v49  ;;  %1349 = vmatpush.bf16.msrb.mxu3 %v1334_v38  ;;  %vm4098_vm2 = vmmov %vm4097_vm5 }
 0x30a   :  { %vm4099_vm11 = vmmov %vm4093_vm3 }
 0x30b   :  { %vm4100_vm1 = vmmov %vm4093_vm3 }
 0x30c   :  { %vm4101_vm9 = vmmov %vm4098_vm2 }
 0x30d   :  { %1375 = vmatpush.bf16.msra.mxu1 %v1340_v26  ;;  %vm4102_vm13 = vmmov %vm4100_vm1 }
 0x313   :  { %1609 = vmatmul.msk.bf16.vlgmr.msrb.gmra.mxu2 %vm4093_vm3, %v3472_v10 }
 0x318   :  { %1608 = vmatmul.msk.bf16.vlgmr.msrb.gmra.mxu1 %vm4094_vm12, %v3472_v10  ;;  %1610 = vmatmul.msk.bf16.vlgmr.msrb.gmra.mxu3 %vm4095_vm15, %v3472_v10 }
 0x328   :  { %1612 = vmatmul.msk.bf16.vlgmr.msra.gmra.mxu1 %vm4096_vm10, %v3472_v10 }
 0x355   :  { %v1206_v42 = vpop.permute.xlu0 %1205 }
 0x371   :  { %v1294_v9 = vpop.f32.mrf.mxu0 }
 0x372   :  { %v1295_v34 = vadd.f32 %v1294_v9, %v1270_v56 }
 0x374   :  { %v1324_v19 = vmax.f32 %v1295_v34, 0.0 }
 0x376   :  { %v1327_v1 = vadd.f32 %v1324_v19, %v1261_v46 }
 0x379   :  { %v1296_v0 = vpop.f32.mrf.mxu0 }
 0x381   :  { %v1364_v59 = vpop.f32.mrf.mxu0 }
 0x382   :  { %v1365_v18 = vadd.f32 %v1364_v59, %v1270_v56 }
 0x384   :  { %v1382_v20 = vmax.f32 %v1365_v18, 0.0 }
 0x385   :  { %v1229_v55 = vpop.f32.mrf.mxu1 }
 0x386   :  { %v1242_v53 = vpop.f32.mrf.mxu2  ;;  %v1230_v2 = vadd.f32 %v1229_v55, %v1206_v42 }
 0x387   :  { %v1243_v14 = vadd.f32 %v1242_v53, %v1206_v42 }
 0x388   :  { %v1387_v62 = vpack.c.bf16 %v1230_v2, %v1230_v2 }
 0x389   :  { %v1388_v41 = vpack.c.bf16 %v1243_v14, %v1243_v14  ;;  %v1366_v50 = vpop.f32.mrf.mxu0 }
 0x38a   :  { %v1391_v60 = vsel %vm4098_vm2, %v1387_v62, 0 }
 0x38b   :  { %v1394_v43 = vsel %vm4097_vm5, %v1388_v41, 0  ;;  %v1255_v35 = vpop.f32.mrf.mxu3  ;;  %1406 = vmatpush.bf16.msra.mxu2 %v1391_v60 }
 0x38c   :  { %1419 = vmatpush.bf16.msra.mxu3 %v1394_v43  ;;  %v1256_v44 = vadd.f32 %v1255_v35, %v1206_v42 }
 0x38d   :  { %v1231_v3 = vpop.f32.mrf.mxu1 }
 0x38e   :  { %v1244_v32 = vpop.f32.mrf.mxu2  ;;  %v1389_v48 = vpack.c.bf16 %v1256_v44, %v1256_v44  ;;  %1613 = vmatmul.msk.bf16.vlgmr.msra.gmra.mxu2 %vm4100_vm1, %v3472_v10 }
 0x38f   :  { %1614 = vmatmul.msk.bf16.vlgmr.msra.gmra.mxu3 %vm4099_vm11, %v3472_v10 }
 0x390   :  { %v1397_v21 = vsel %vm4101_vm9, %v1389_v48, 0 }
 0x391   :  { %1432 = vmatpush.bf16.msrb.mxu0 %v1397_v21 }
 0x393   :  { %v1257_v25 = vpop.f32.mrf.mxu3 }
 0x394   :  { %1615 = vmatmul.msk.bf16.vlgmr.msrb.gmra.mxu0 %vm4102_vm13, %v3472_v10 }
 0x395   :  { %v1307_v45 = vpop.f32.mrf.mxu1 }
 0x396   :  { %v1320_v61 = vpop.f32.mrf.mxu2  ;;  %v1308_v16 = vadd.f32 %v1307_v45, %v1270_v56 }
 0x397   :  { %v1321_v57 = vadd.f32 %v1320_v61, %v1270_v56 }
 0x398   :  { %v1325_v5 = vmax.f32 %v1308_v16, 0.0 }
 0x399   :  { %v1326_v6 = vmax.f32 %v1321_v57, 0.0 }
 0x39a   :  { %v1328_v8 = vadd.f32 %v1325_v5, %v1262_v17 }
 0x39b   :  { %v1351_v54 = vpop.f32.mrf.mxu3  ;;  %v1329_v27 = vadd.f32 %v1326_v6, %v1263_v23 }
 0x39c   :  { %v1352_v33 = vadd.f32 %v1351_v54, %v1270_v56  ;;  %v1385_v63 = vadd.f32 %v1382_v20, %v1328_v8 }
 0x39d   :  { %v1309_v12 = vpop.f32.mrf.mxu1 }
 0x39e   :  { %v1322_v29 = vpop.f32.mrf.mxu2  ;;  %v1381_v10 = vmax.f32 %v1352_v33, 0.0 }
 0x3a0   :  { %v1384_v52 = vadd.f32 %v1381_v10, %v1327_v1 }
 0x3a3   :  { %v1353_v4 = vpop.f32.mrf.mxu3 }
 0x3a5   :  { %v1377_v11 = vpop.f32.mrf.mxu1 }
 0x3a6   :  { %v1378_v36 = vadd.f32 %v1377_v11, %v1270_v56 }
 0x3a8   :  { %v1383_v47 = vmax.f32 %v1378_v36, 0.0 }
 0x3aa   :  { %v1386_v40 = vadd.f32 %v1383_v47, %v1329_v27 }
 0x3ad   :  { %v1379_v51 = vpop.f32.mrf.mxu1 }
 0x411   :  { %v1408_v28 = vpop.f32.mrf.mxu2  ;;  %v1434_v13 = vpop.f32.mrf.mxu0 }
 0x412   :  { %v1421_v22 = vpop.f32.mrf.mxu3  ;;  %v1409_v39 = vadd.f32 %v1408_v28, %v1270_v56  ;;  %v1435_v15 = vadd.f32 %v1434_v13, %v1270_v56 }
 0x413   :  { %v1422_v7 = vadd.f32 %v1421_v22, %v1270_v56 }
 0x414   :  { %v1438_v24 = vmax.f32 %v1409_v39, 0.0  ;;  %v1440_v30 = vmax.f32 %v1435_v15, 0.0 }
 0x415   :  { %v1439_v37 = vmax.f32 %v1422_v7, 0.0 }
 0x416   :  { %v1441_v31 = vadd.f32 %v1438_v24, %v1384_v52  ;;  %v1443_v49 = vadd.f32 %v1440_v30, %v1386_v40 }
 0x417   :  { %v1442_v58 = vadd.f32 %v1439_v37, %v1385_v63 }
 0x418   :  { %1444 = vst [vmem:[%s3657_s11] sm:$0xff] %v1441_v31 }
 0x419   :  { %1445 = vst [vmem:[%s3657_s11 + $0x8] sm:$0xff] %v1442_v58  ;;  %v1410_v26 = vpop.f32.mrf.mxu2  ;;  %v1436_v9 = vpop.f32.mrf.mxu0 }
 0x41a   :  { %v1423_v38 = vpop.f32.mrf.mxu3  ;;  %1446 = vst [vmem:[%s3657_s11 + $0x10] sm:$0xff] %v1443_v49 }

</bundles_post_ra>
